<compile_context>
chip_gen: v7x
topology: tpu7x:2x2x1
jax: 0.10.0
libtpu: 0.0.40
codegen_flags: <defaults>
</compile_context>

<pallas_src>
import functools

import jax
import jax.numpy as jnp
from jax.experimental import pallas as pl
from jax.experimental.pallas import tpu as pltpu


def _round_up(x, m):
    return ((x + m - 1) // m) * m


# ---------------------------------------------------------------------------
# Fused conv kernel:  out[b] = norm/act( W_aug @ colT[b] )   (K-accumulated)
# ---------------------------------------------------------------------------
def _conv_fused_kernel(*refs, norm, act, nk, hw_valid, c_valid, eps):
    if norm in ("adain", "ln"):
        w_ref, col_ref, g_ref, b_ref, o_ref, acc_ref = refs
    else:
        w_ref, col_ref, o_ref, acc_ref = refs
        g_ref = b_ref = None

    k = pl.program_id(1)

    @pl.when(k == 0)
    def _():
        acc_ref[...] = jnp.zeros_like(acc_ref)

    # MXU: bf16 x bf16 -> f32 accumulate.  col block is (1, tk, N_pad).
    acc_ref[...] += jnp.dot(w_ref[...], col_ref[0],
                            preferred_element_type=jnp.float32)

    @pl.when(k == nk - 1)
    def _():
        y = acc_ref[...]                                   # (C_pad, N_pad) f32
        if norm in ("in", "adain"):
            # Per-row (per b,c) instance norm over the valid Ho*Wo lanes.
            # Padded lanes are exactly zero, so sums only need a count fix.
            inv_n = 1.0 / hw_valid
            mean = jnp.sum(y, axis=-1, keepdims=True) * inv_n
            ex2 = jnp.sum(y * y, axis=-1, keepdims=True) * inv_n
            var = jnp.maximum(ex2 - mean * mean, 0.0)      # biased (PyTorch IN)
            y = (y - mean) * jax.lax.rsqrt(var + eps)
            if norm == "adain":
                y = y * g_ref[0] + b_ref[0]                # (C_pad,1) broadcast
        elif norm == "ln":
            # MUNIT LayerNorm: per-sample mean / unbiased std over C*H*W,
            # divide by (std + eps), then per-channel affine.
            cnt = float(c_valid * hw_valid)
            s1 = jnp.sum(y, axis=-1, keepdims=True)
            s2 = jnp.sum(y * y, axis=-1, keepdims=True)
            mean = jnp.sum(s1, axis=0, keepdims=True) * (1.0 / cnt)
            ex2 = jnp.sum(s2, axis=0, keepdims=True) * (1.0 / cnt)
            var = jnp.maximum(ex2 - mean * mean, 0.0)
            std = jnp.sqrt(var * (cnt / max(cnt - 1.0, 1.0)))
            y = (y - mean) / (std + eps)
            y = y * g_ref[...] + b_ref[...]                # (C_pad,1) broadcast
        if act == "relu":
            y = jnp.maximum(y, 0.0)
        elif act == "tanh":
            y = jnp.tanh(y)
        o_ref[0] = y.astype(o_ref.dtype)


def _conv_gemm(w_aug, col, *, tk, norm, act, hw_valid, c_valid, eps=1e-5,
               gamma=None, beta=None):
    B, K_pad, N_pad = col.shape
    C_pad = w_aug.shape[0]
    nk = K_pad // tk

    in_specs = [
        pl.BlockSpec((C_pad, tk), lambda b, k: (0, k)),
        pl.BlockSpec((1, tk, N_pad), lambda b, k: (b, k, 0)),
    ]
    args = [w_aug, col]
    if norm == "adain":
        in_specs += [pl.BlockSpec((1, C_pad, 1), lambda b, k: (b, 0, 0)),
                     pl.BlockSpec((1, C_pad, 1), lambda b, k: (b, 0, 0))]
        args += [gamma, beta]
    elif norm == "ln":
        in_specs += [pl.BlockSpec((C_pad, 1), lambda b, k: (0, 0)),
                     pl.BlockSpec((C_pad, 1), lambda b, k: (0, 0))]
        args += [gamma, beta]

    flops = 2 * B * C_pad * N_pad * K_pad
    transc = B * C_pad * N_pad if act == "tanh" else 0
    bytes_accessed = (2 * C_pad * K_pad              # bf16 weights (resident)
                      + 2 * B * K_pad * N_pad        # bf16 im2col columns
                      + 4 * B * C_pad * N_pad)       # f32 output

    kernel = functools.partial(
        _conv_fused_kernel, norm=norm, act=act, nk=nk,
        hw_valid=float(hw_valid), c_valid=float(c_valid), eps=eps)

    return pl.pallas_call(
        kernel,
        out_shape=jax.ShapeDtypeStruct((B, C_pad, N_pad), jnp.float32),
        grid=(B, nk),
        in_specs=in_specs,
        out_specs=pl.BlockSpec((1, C_pad, N_pad), lambda b, k: (b, 0, 0)),
        scratch_shapes=[pltpu.VMEM((C_pad, N_pad), jnp.float32)],
        compiler_params=pltpu.CompilerParams(
            dimension_semantics=("parallel", "arbitrary"),
            vmem_limit_bytes=32 * 1024 * 1024),
        cost_estimate=pl.CostEstimate(flops=flops, transcendentals=transc,
                                      bytes_accessed=bytes_accessed),
    )(*args)


# ---------------------------------------------------------------------------
# MUNIT Conv2dBlock:  reflect-pad -> conv -> norm -> activation (all fused)
# ---------------------------------------------------------------------------
def conv2d_block(x, p, *, stride, pad, norm="none", act="none", adain_gb=None):
    w, bias = p["w"], p["b"]
    Cout, Cin, kh, kw = w.shape
    B, _, H, W = x.shape
    Hp, Wp = H + 2 * pad, W + 2 * pad
    Ho = (Hp - kh) // stride + 1
    Wo = (Wp - kw) // stride + 1
    HW = Ho * Wo

    K_eff = Cin * kh * kw + 1                      # +1: folded bias row
    K_pad = _round_up(K_eff, 128)
    tk = K_pad if K_pad <= 1024 else 1024
    K_pad = _round_up(K_pad, tk)
    C_pad = _round_up(Cout, 16)
    N_pad = _round_up(HW, 128)
    # TODO(synk): tile the spatial (lane) axis and hoist the norm epilogue to a
    # second pass for production resolutions (HW > 4096); toy shapes fit one tile.
    assert N_pad <= 4096

    # --- im2col, transposed so the lane dim is the spatial dim -------------
    xp = x
    if pad > 0:
        xp = jnp.pad(xp, ((0, 0), (0, 0), (pad, pad), (pad, pad)), mode="reflect")
    taps = []
    for i in range(kh):
        for j in range(kw):
            taps.append(xp[:, :, i:i + stride * Ho:stride, j:j + stride * Wo:stride])
    col = jnp.stack(taps, axis=2).reshape(B, Cin * kh * kw, HW)
    col = jnp.concatenate([col, jnp.ones((B, 1, HW), col.dtype)], axis=1)
    col = jnp.pad(col, ((0, 0), (0, K_pad - K_eff), (0, N_pad - HW)))
    col = col.astype(jnp.bfloat16)
    # TODO(synk): fuse the tap gather into the kernel (pl.ANY input + in-kernel
    # DMA) so the kh*kw-blown-up matrix never hits HBM at production sizes.

    # --- weights: (Cout, Cin*kh*kw | bias), zero-padded, bf16 ---------------
    wm = jnp.concatenate([w.reshape(Cout, Cin * kh * kw), bias.reshape(Cout, 1)],
                         axis=1)
    wm = jnp.pad(wm, ((0, C_pad - Cout), (0, K_pad - K_eff))).astype(jnp.bfloat16)

    gamma = beta = None
    if norm == "adain":                             # per (b, c) scale / shift
        g_a, b_a = adain_gb                         # (B, Cout) each
        gamma = jnp.pad(g_a, ((0, 0), (0, C_pad - Cout)), constant_values=1.0
                        ).reshape(B, C_pad, 1).astype(jnp.float32)
        beta = jnp.pad(b_a, ((0, 0), (0, C_pad - Cout))
                       ).reshape(B, C_pad, 1).astype(jnp.float32)
    elif norm == "ln":                              # per-channel affine
        gamma = jnp.pad(p["ln_gamma"], (0, C_pad - Cout), constant_values=1.0
                        ).reshape(C_pad, 1).astype(jnp.float32)
        beta = jnp.pad(p["ln_beta"], (0, C_pad - Cout)
                       ).reshape(C_pad, 1).astype(jnp.float32)

    out = _conv_gemm(wm, col, tk=tk, norm=norm, act=act,
                     hw_valid=HW, c_valid=Cout, gamma=gamma, beta=beta)
    return out[:, :Cout, :HW].reshape(B, Cout, Ho, Wo)


# ---------------------------------------------------------------------------
# Fused small kernels: style head (avg-pool + 1x1 conv), 3-layer MLP
# ---------------------------------------------------------------------------
def _style_head_kernel(h_ref, w_ref, b_ref, o_ref, *, inv_hw):
    pooled = jnp.sum(h_ref[...], axis=-1) * inv_hw          # (B, C)
    o_ref[...] = jnp.dot(pooled, w_ref[...],
                         preferred_element_type=jnp.float32) + b_ref[...]


def _mlp_kernel(s_ref, w1_ref, b1_ref, w2_ref, b2_ref, w3_ref, b3_ref, o_ref):
    h = jnp.dot(s_ref[...], w1_ref[...],
                preferred_element_type=jnp.float32) + b1_ref[...]
    h = jnp.maximum(h, 0.0)
    h = jnp.dot(h, w2_ref[...], preferred_element_type=jnp.float32) + b2_ref[...]
    h = jnp.maximum(h, 0.0)
    o_ref[...] = jnp.dot(h, w3_ref[...],
                         preferred_element_type=jnp.float32) + b3_ref[...]


def mlp_forward(s, mlp):
    B = s.shape[0]
    n_out = mlp[2]["w"].shape[0]
    args = [s.astype(jnp.float32)]
    for layer in mlp:
        args.append(layer["w"].T.astype(jnp.float32))
        args.append(layer["b"].reshape(1, -1).astype(jnp.float32))
    return pl.pallas_call(
        _mlp_kernel,
        out_shape=jax.ShapeDtypeStruct((B, n_out), jnp.float32),
    )(*args)


# ---------------------------------------------------------------------------
# Deterministic parameter construction (synthetic init — no checkpoint load).
# NOTE: params contain only arrays; all dims are derived from weight shapes.
# ---------------------------------------------------------------------------
def _init_conv(key, cout, cin, k):
    w = jax.random.normal(key, (cout, cin, k, k), jnp.float32) * 0.02
    return {"w": w, "b": jnp.zeros((cout,), jnp.float32)}


def _init_linear(key, cout, cin):
    w = jax.random.normal(key, (cout, cin), jnp.float32) * 0.02
    return {"w": w, "b": jnp.zeros((cout,), jnp.float32)}


def init_params(key, input_dim=3, dim=8, style_dim=8, n_res=1, mlp_dim=16):
    keys = iter(jax.random.split(key, 64))
    p = {}

    # StyleEncoder (MUNIT: 4 downsamples, norm='none')
    se = [_init_conv(next(keys), dim, input_dim, 7)]
    d = dim
    for _ in range(2):
        se.append(_init_conv(next(keys), 2 * d, d, 4)); d *= 2
    for _ in range(2):
        se.append(_init_conv(next(keys), d, d, 4))
    p["style_convs"] = se
    p["style_out"] = _init_conv(next(keys), style_dim, d, 1)

    # ContentEncoder (2 downsamples, norm='in', n_res residual blocks)
    ce = [_init_conv(next(keys), dim, input_dim, 7)]
    d = dim
    for _ in range(2):
        ce.append(_init_conv(next(keys), 2 * d, d, 4)); d *= 2
    p["content_convs"] = ce
    p["content_res"] = [(_init_conv(next(keys), d, d, 3),
                         _init_conv(next(keys), d, d, 3)) for _ in range(n_res)]
    content_dim = d

    # Decoder (AdaIN res blocks -> 2x [upsample + LN conv] -> tanh conv)
    p["dec_res"] = [(_init_conv(next(keys), content_dim, content_dim, 3),
                     _init_conv(next(keys), content_dim, content_dim, 3))
                    for _ in range(n_res)]
    dd = content_dim
    ups = []
    for _ in range(2):
        c = _init_conv(next(keys), dd // 2, dd, 5)
        c["ln_gamma"] = jax.random.uniform(next(keys), (dd // 2,), jnp.float32)
        c["ln_beta"] = jnp.zeros((dd // 2,), jnp.float32)
        ups.append(c); dd //= 2
    p["dec_ups"] = ups
    p["dec_out"] = _init_conv(next(keys), input_dim, dd, 7)

    # MLP: style -> AdaIN params (n_res * 2 AdaIN layers * 2 * content_dim)
    num_adain = n_res * 2 * 2 * content_dim
    p["mlp"] = [_init_linear(next(keys), mlp_dim, style_dim),
                _init_linear(next(keys), mlp_dim, mlp_dim),
                _init_linear(next(keys), num_adain, mlp_dim)]
    return p


# ---------------------------------------------------------------------------
# AdaINGen pieces
# ---------------------------------------------------------------------------
def enc_style(x, p):
    h = conv2d_block(x, p["style_convs"][0], stride=1, pad=3, norm="none", act="relu")
    for c in p["style_convs"][1:]:
        h = conv2d_block(h, c, stride=2, pad=1, norm="none", act="relu")
    B, C, H, W = h.shape
    S = p["style_out"]["w"].shape[0]
    HW = H * W
    HW_pad = _round_up(HW, 128)
    h3 = jnp.pad(h.reshape(B, C, HW), ((0, 0), (0, 0), (0, HW_pad - HW))
                 ).astype(jnp.float32)
    wmat = p["style_out"]["w"].reshape(S, C).T.astype(jnp.float32)   # 1x1 conv
    bvec = p["style_out"]["b"].reshape(1, S).astype(jnp.float32)
    s = pl.pallas_call(
        functools.partial(_style_head_kernel, inv_hw=1.0 / HW),
        out_shape=jax.ShapeDtypeStruct((B, S), jnp.float32),
    )(h3, wmat, bvec)
    return s.reshape(B, S, 1, 1)


def enc_content(x, p):
    h = conv2d_block(x, p["content_convs"][0], stride=1, pad=3, norm="in", act="relu")
    for c in p["content_convs"][1:]:
        h = conv2d_block(h, c, stride=2, pad=1, norm="in", act="relu")
    for c1, c2 in p["content_res"]:
        r = conv2d_block(h, c1, stride=1, pad=1, norm="in", act="relu")
        r = conv2d_block(r, c2, stride=1, pad=1, norm="in", act="none")
        h = h + r
    return h


def decode(content, style, p):
    B = content.shape[0]
    nf = p["dec_res"][0][0]["w"].shape[0]          # content feature dim (static)

    # MLP -> AdaIN parameters (MUNIT order per AdaIN layer: [mean | std])
    adain = mlp_forward(style.reshape(B, -1), p["mlp"])

    x = content
    off = 0
    for c1, c2 in p["dec_res"]:
        m1 = adain[:, off:off + nf]; s1 = adain[:, off + nf:off + 2 * nf]; off += 2 * nf
        m2 = adain[:, off:off + nf]; s2 = adain[:, off + nf:off + 2 * nf]; off += 2 * nf
        r = conv2d_block(x, c1, stride=1, pad=1, norm="adain", act="relu",
                         adain_gb=(s1, m1))
        r = conv2d_block(r, c2, stride=1, pad=1, norm="adain", act="none",
                         adain_gb=(s2, m2))
        x = x + r
    for c_up in p["dec_ups"]:
        x = jnp.repeat(jnp.repeat(x, 2, axis=2), 2, axis=3)   # nearest 2x upsample
        # TODO(synk): fold the nearest-2x upsample into the conv patch gather to
        # avoid materializing the 4x-larger activation in HBM at scale.
        x = conv2d_block(x, c_up, stride=1, pad=2, norm="ln", act="relu")
    x = conv2d_block(x, p["dec_out"], stride=1, pad=3, norm="none", act="tanh")
    return x


def munit_forward(params, x_a, x_b):
    """MUNIT_Trainer.forward: x_ab = decode(enc_content(x_a), enc_style(x_b))."""
    s_b = enc_style(x_b, params)
    c_a = enc_content(x_a, params)
    x_ab = decode(c_a, s_b, params)
    return x_ab


# ---------------------------------------------------------------------------
if __name__ == "__main__":
    key = jax.random.PRNGKey(0)
    kp, ka, kb = jax.random.split(key, 3)

    B, C, H, W = 2, 3, 16, 16
    params = init_params(kp, input_dim=C, dim=8, style_dim=8, n_res=1, mlp_dim=16)
    x_a = jax.random.normal(ka, (B, C, H, W), jnp.float32)
    x_b = jax.random.normal(kb, (B, C, H, W), jnp.float32)

    fwd = jax.jit(munit_forward)
    x_ab = jax.block_until_ready(fwd(params, x_a, x_b))

    assert x_ab.shape == (B, C, H, W), x_ab.shape
    assert bool(jnp.all(jnp.isfinite(x_ab)))
    assert bool(jnp.all(jnp.abs(x_ab) <= 1.0 + 1e-6))   # tanh output range
    print("KERNEL_OK")
</pallas_src>

<mosaic_0001>
module attributes {stable_mosaic.version = 11 : i64} {
  func.func @_conv_fused_kernel(%arg0: i32, %arg1: i32, %arg2: memref<16x256xbf16, #tpu.memory_space<vmem>>, %arg3: memref<1x256x256xbf16, #tpu.memory_space<vmem>>, %arg4: memref<1x16x256xf32, #tpu.memory_space<vmem>>, %arg5: memref<16x256xf32, #tpu.memory_space<vmem>>) attributes {dimension_semantics = [#tpu.dimension_semantics<parallel>, #tpu.dimension_semantics<arbitrary>], iteration_bounds = array<i64: 2, 1>, scalar_prefetch = 0 : i64, scratch_operands = 1 : i64, tpu.core_type = #tpu.core_type<tc>, window_params = [{transform_indices = @transform_0, window_bounds = array<i64: 16, 256>}, {transform_indices = @transform_1, window_bounds = array<i64: 1, 256, 256>}, {transform_indices = @transform_2, window_bounds = array<i64: 1, 16, 256>}]} {
    %c0_i32 = arith.constant 0 : i32
    %0 = arith.cmpi eq, %arg1, %c0_i32 : i32
    %1 = arith.extui %0 : i1 to i32
    %c0_i32_0 = arith.constant 0 : i32
    %2 = arith.cmpi ne, %1, %c0_i32_0 : i32
    scf.if %2 {
      %cst_11 = arith.constant 0.000000e+00 : f32
      %13 = vector.broadcast %cst_11 : f32 to vector<16x256xf32>
      %c0_12 = arith.constant 0 : index
      %c0_13 = arith.constant 0 : index
      %14 = vector.load %arg5[%c0_12, %c0_13] : memref<16x256xf32, #tpu.memory_space<vmem>>, vector<16x256xf32>
      tpu.vector_store %arg5[%c0_12, %c0_13], %13 {strides = array<i32>} : memref<16x256xf32, #tpu.memory_space<vmem>>, vector<16x256xf32>,
    } else {
    }
    %c0 = arith.constant 0 : index
    %c0_1 = arith.constant 0 : index
    %3 = vector.load %arg5[%c0, %c0_1] : memref<16x256xf32, #tpu.memory_space<vmem>>, vector<16x256xf32>
    %c0_2 = arith.constant 0 : index
    %c0_3 = arith.constant 0 : index
    %4 = vector.load %arg2[%c0_2, %c0_3] : memref<16x256xbf16, #tpu.memory_space<vmem>>, vector<16x256xbf16>
    %c0_4 = arith.constant 0 : index
    %c0_5 = arith.constant 0 : index
    %c0_6 = arith.constant 0 : index
    %5 = vector.load %arg3[%c0_4, %c0_5, %c0_6] : memref<1x256x256xbf16, #tpu.memory_space<vmem>>, vector<1x256x256xbf16>
    %6 = vector.shape_cast %5 : vector<1x256x256xbf16> to vector<256x256xbf16>
    %cst = arith.constant dense<0.000000e+00> : vector<16x256xf32>
    %7 = tpu.matmul %4, %6, %cst {dimension_numbers = #tpu.dot_dimension_numbers<[1], [0], [0], [1], [0, 0, 1, 1], [], []>} : vector<16x256xbf16>, vector<256x256xbf16>, vector<16x256xf32> -> vector<16x256xf32>
    %8 = arith.addf %3, %7 : vector<16x256xf32>
    %c0_7 = arith.constant 0 : index
    %c0_8 = arith.constant 0 : index
    %9 = vector.load %arg5[%c0_7, %c0_8] : memref<16x256xf32, #tpu.memory_space<vmem>>, vector<16x256xf32>
    tpu.vector_store %arg5[%c0_7, %c0_8], %8 {strides = array<i32>} : memref<16x256xf32, #tpu.memory_space<vmem>>, vector<16x256xf32>,
    %c0_i32_9 = arith.constant 0 : i32
    %10 = arith.cmpi eq, %arg1, %c0_i32_9 : i32
    %11 = arith.extui %10 : i1 to i32
    %c0_i32_10 = arith.constant 0 : i32
    %12 = arith.cmpi ne, %11, %c0_i32_10 : i32
    scf.if %12 {
      %c0_11 = arith.constant 0 : index
      %c0_12 = arith.constant 0 : index
      %13 = vector.load %arg5[%c0_11, %c0_12] : memref<16x256xf32, #tpu.memory_space<vmem>>, vector<16x256xf32>
      %cst_13 = arith.constant 0.000000e+00 : f32
      %14 = vector.broadcast %cst_13 : f32 to vector<16x256xf32>
      %15 = arith.maximumf %13, %14 : vector<16x256xf32>
      %c0_14 = arith.constant 0 : index
      %c0_15 = arith.constant 0 : index
      %c0_16 = arith.constant 0 : index
      %16 = vector.load %arg4[%c0_14, %c0_15, %c0_16] : memref<1x16x256xf32, #tpu.memory_space<vmem>>, vector<1x16x256xf32>
      %17 = vector.shape_cast %16 : vector<1x16x256xf32> to vector<16x256xf32>
      %18 = vector.shape_cast %15 : vector<16x256xf32> to vector<1x16x256xf32>
      tpu.vector_store %arg4[%c0_14, %c0_15, %c0_16], %18 {strides = array<i32>} : memref<1x16x256xf32, #tpu.memory_space<vmem>>, vector<1x16x256xf32>,
    } else {
    }
    return
  }
  func.func @transform_0(%arg0: i32, %arg1: i32) -> (i32, i32) {
    %c0_i32 = arith.constant 0 : i32
    %c0_i32_0 = arith.constant 0 : i32
    return %c0_i32, %arg1 : i32, i32
  }
  func.func @transform_1(%arg0: i32, %arg1: i32) -> (i32, i32, i32) {
    %c0_i32 = arith.constant 0 : i32
    %c0_i32_0 = arith.constant 0 : i32
    return %arg0, %arg1, %c0_i32 : i32, i32, i32
  }
  func.func @transform_2(%arg0: i32, %arg1: i32) -> (i32, i32, i32) {
    %c0_i32 = arith.constant 0 : i32
    %c0_i32_0 = arith.constant 0 : i32
    %c0_i32_1 = arith.constant 0 : i32
    return %arg0, %c0_i32, %c0_i32_0 : i32, i32, i32
  }
}

module attributes {stable_mosaic.version = 11 : i64} {
  func.func @_conv_fused_kernel(%arg0: i32, %arg1: i32, %arg2: memref<16x256xbf16, #tpu.memory_space<vmem>>, %arg3: memref<1x256x128xbf16, #tpu.memory_space<vmem>>, %arg4: memref<1x16x128xf32, #tpu.memory_space<vmem>>, %arg5: memref<16x128xf32, #tpu.memory_space<vmem>>) attributes {dimension_semantics = [#tpu.dimension_semantics<parallel>, #tpu.dimension_semantics<arbitrary>], iteration_bounds = array<i64: 2, 1>, scalar_prefetch = 0 : i64, scratch_operands = 1 : i64, tpu.core_type = #tpu.core_type<tc>, window_params = [{transform_indices = @transform_0, window_bounds = array<i64: 16, 256>}, {transform_indices = @transform_1, window_bounds = array<i64: 1, 256, 128>}, {transform_indices = @transform_2, window_bounds = array<i64: 1, 16, 128>}]} {
    %c0_i32 = arith.constant 0 : i32
    %0 = arith.cmpi eq, %arg1, %c0_i32 : i32
    %1 = arith.extui %0 : i1 to i32
    %c0_i32_0 = arith.constant 0 : i32
    %2 = arith.cmpi ne, %1, %c0_i32_0 : i32
    scf.if %2 {
      %cst_11 = arith.constant 0.000000e+00 : f32
      %13 = vector.broadcast %cst_11 : f32 to vector<16x128xf32>
      %c0_12 = arith.constant 0 : index
      %c0_13 = arith.constant 0 : index
      %14 = vector.load %arg5[%c0_12, %c0_13] : memref<16x128xf32, #tpu.memory_space<vmem>>, vector<16x128xf32>
      tpu.vector_store %arg5[%c0_12, %c0_13], %13 {strides = array<i32>} : memref<16x128xf32, #tpu.memory_space<vmem>>, vector<16x128xf32>,
    } else {
    }
    %c0 = arith.constant 0 : index
    %c0_1 = arith.constant 0 : index
    %3 = vector.load %arg5[%c0, %c0_1] : memref<16x128xf32, #tpu.memory_space<vmem>>, vector<16x128xf32>
    %c0_2 = arith.constant 0 : index
    %c0_3 = arith.constant 0 : index
    %4 = vector.load %arg2[%c0_2, %c0_3] : memref<16x256xbf16, #tpu.memory_space<vmem>>, vector<16x256xbf16>
    %c0_4 = arith.constant 0 : index
    %c0_5 = arith.constant 0 : index
    %c0_6 = arith.constant 0 : index
    %5 = vector.load %arg3[%c0_4, %c0_5, %c0_6] : memref<1x256x128xbf16, #tpu.memory_space<vmem>>, vector<1x256x128xbf16>
    %6 = vector.shape_cast %5 : vector<1x256x128xbf16> to vector<256x128xbf16>
    %cst = arith.constant dense<0.000000e+00> : vector<16x128xf32>
    %7 = tpu.matmul %4, %6, %cst {dimension_numbers = #tpu.dot_dimension_numbers<[1], [0], [0], [1], [0, 0, 1, 1], [], []>} : vector<16x256xbf16>, vector<256x128xbf16>, vector<16x128xf32> -> vector<16x128xf32>
    %8 = arith.addf %3, %7 : vector<16x128xf32>
    %c0_7 = arith.constant 0 : index
    %c0_8 = arith.constant 0 : index
    %9 = vector.load %arg5[%c0_7, %c0_8] : memref<16x128xf32, #tpu.memory_space<vmem>>, vector<16x128xf32>
    tpu.vector_store %arg5[%c0_7, %c0_8], %8 {strides = array<i32>} : memref<16x128xf32, #tpu.memory_space<vmem>>, vector<16x128xf32>,
    %c0_i32_9 = arith.constant 0 : i32
    %10 = arith.cmpi eq, %arg1, %c0_i32_9 : i32
    %11 = arith.extui %10 : i1 to i32
    %c0_i32_10 = arith.constant 0 : i32
    %12 = arith.cmpi ne, %11, %c0_i32_10 : i32
    scf.if %12 {
      %c0_11 = arith.constant 0 : index
      %c0_12 = arith.constant 0 : index
      %13 = vector.load %arg5[%c0_11, %c0_12] : memref<16x128xf32, #tpu.memory_space<vmem>>, vector<16x128xf32>
      %cst_13 = arith.constant 0.000000e+00 : f32
      %14 = vector.broadcast %cst_13 : f32 to vector<16x128xf32>
      %15 = arith.maximumf %13, %14 : vector<16x128xf32>
      %c0_14 = arith.constant 0 : index
      %c0_15 = arith.constant 0 : index
      %c0_16 = arith.constant 0 : index
      %16 = vector.load %arg4[%c0_14, %c0_15, %c0_16] : memref<1x16x128xf32, #tpu.memory_space<vmem>>, vector<1x16x128xf32>
      %17 = vector.shape_cast %16 : vector<1x16x128xf32> to vector<16x128xf32>
      %18 = vector.shape_cast %15 : vector<16x128xf32> to vector<1x16x128xf32>
      tpu.vector_store %arg4[%c0_14, %c0_15, %c0_16], %18 {strides = array<i32>} : memref<1x16x128xf32, #tpu.memory_space<vmem>>, vector<1x16x128xf32>,
    } else {
    }
    return
  }
  func.func @transform_0(%arg0: i32, %arg1: i32) -> (i32, i32) {
    %c0_i32 = arith.constant 0 : i32
    %c0_i32_0 = arith.constant 0 : i32
    return %c0_i32, %arg1 : i32, i32
  }
  func.func @transform_1(%arg0: i32, %arg1: i32) -> (i32, i32, i32) {
    %c0_i32 = arith.constant 0 : i32
    %c0_i32_0 = arith.constant 0 : i32
    return %arg0, %arg1, %c0_i32 : i32, i32, i32
  }
  func.func @transform_2(%arg0: i32, %arg1: i32) -> (i32, i32, i32) {
    %c0_i32 = arith.constant 0 : i32
    %c0_i32_0 = arith.constant 0 : i32
    %c0_i32_1 = arith.constant 0 : i32
    return %arg0, %c0_i32, %c0_i32_0 : i32, i32, i32
  }
}

module attributes {stable_mosaic.version = 11 : i64} {
  func.func @_conv_fused_kernel(%arg0: i32, %arg1: i32, %arg2: memref<32x384xbf16, #tpu.memory_space<vmem>>, %arg3: memref<1x384x128xbf16, #tpu.memory_space<vmem>>, %arg4: memref<1x32x128xf32, #tpu.memory_space<vmem>>, %arg5: memref<32x128xf32, #tpu.memory_space<vmem>>) attributes {dimension_semantics = [#tpu.dimension_semantics<parallel>, #tpu.dimension_semantics<arbitrary>], iteration_bounds = array<i64: 2, 1>, scalar_prefetch = 0 : i64, scratch_operands = 1 : i64, tpu.core_type = #tpu.core_type<tc>, window_params = [{transform_indices = @transform_0, window_bounds = array<i64: 32, 384>}, {transform_indices = @transform_1, window_bounds = array<i64: 1, 384, 128>}, {transform_indices = @transform_2, window_bounds = array<i64: 1, 32, 128>}]} {
    %c0_i32 = arith.constant 0 : i32
    %0 = arith.cmpi eq, %arg1, %c0_i32 : i32
    %1 = arith.extui %0 : i1 to i32
    %c0_i32_0 = arith.constant 0 : i32
    %2 = arith.cmpi ne, %1, %c0_i32_0 : i32
    scf.if %2 {
      %cst_11 = arith.constant 0.000000e+00 : f32
      %13 = vector.broadcast %cst_11 : f32 to vector<32x128xf32>
      %c0_12 = arith.constant 0 : index
      %c0_13 = arith.constant 0 : index
      %14 = vector.load %arg5[%c0_12, %c0_13] : memref<32x128xf32, #tpu.memory_space<vmem>>, vector<32x128xf32>
      tpu.vector_store %arg5[%c0_12, %c0_13], %13 {strides = array<i32>} : memref<32x128xf32, #tpu.memory_space<vmem>>, vector<32x128xf32>,
    } else {
    }
    %c0 = arith.constant 0 : index
    %c0_1 = arith.constant 0 : index
    %3 = vector.load %arg5[%c0, %c0_1] : memref<32x128xf32, #tpu.memory_space<vmem>>, vector<32x128xf32>
    %c0_2 = arith.constant 0 : index
    %c0_3 = arith.constant 0 : index
    %4 = vector.load %arg2[%c0_2, %c0_3] : memref<32x384xbf16, #tpu.memory_space<vmem>>, vector<32x384xbf16>
    %c0_4 = arith.constant 0 : index
    %c0_5 = arith.constant 0 : index
    %c0_6 = arith.constant 0 : index
    %5 = vector.load %arg3[%c0_4, %c0_5, %c0_6] : memref<1x384x128xbf16, #tpu.memory_space<vmem>>, vector<1x384x128xbf16>
    %6 = vector.shape_cast %5 : vector<1x384x128xbf16> to vector<384x128xbf16>
    %cst = arith.constant dense<0.000000e+00> : vector<32x128xf32>
    %7 = tpu.matmul %4, %6, %cst {dimension_numbers = #tpu.dot_dimension_numbers<[1], [0], [0], [1], [0, 0, 1, 1], [], []>} : vector<32x384xbf16>, vector<384x128xbf16>, vector<32x128xf32> -> vector<32x128xf32>
    %8 = arith.addf %3, %7 : vector<32x128xf32>
    %c0_7 = arith.constant 0 : index
    %c0_8 = arith.constant 0 : index
    %9 = vector.load %arg5[%c0_7, %c0_8] : memref<32x128xf32, #tpu.memory_space<vmem>>, vector<32x128xf32>
    tpu.vector_store %arg5[%c0_7, %c0_8], %8 {strides = array<i32>} : memref<32x128xf32, #tpu.memory_space<vmem>>, vector<32x128xf32>,
    %c0_i32_9 = arith.constant 0 : i32
    %10 = arith.cmpi eq, %arg1, %c0_i32_9 : i32
    %11 = arith.extui %10 : i1 to i32
    %c0_i32_10 = arith.constant 0 : i32
    %12 = arith.cmpi ne, %11, %c0_i32_10 : i32
    scf.if %12 {
      %c0_11 = arith.constant 0 : index
      %c0_12 = arith.constant 0 : index
      %13 = vector.load %arg5[%c0_11, %c0_12] : memref<32x128xf32, #tpu.memory_space<vmem>>, vector<32x128xf32>
      %cst_13 = arith.constant 0.000000e+00 : f32
      %14 = vector.broadcast %cst_13 : f32 to vector<32x128xf32>
      %15 = arith.maximumf %13, %14 : vector<32x128xf32>
      %c0_14 = arith.constant 0 : index
      %c0_15 = arith.constant 0 : index
      %c0_16 = arith.constant 0 : index
      %16 = vector.load %arg4[%c0_14, %c0_15, %c0_16] : memref<1x32x128xf32, #tpu.memory_space<vmem>>, vector<1x32x128xf32>
      %17 = vector.shape_cast %16 : vector<1x32x128xf32> to vector<32x128xf32>
      %18 = vector.shape_cast %15 : vector<32x128xf32> to vector<1x32x128xf32>
      tpu.vector_store %arg4[%c0_14, %c0_15, %c0_16], %18 {strides = array<i32>} : memref<1x32x128xf32, #tpu.memory_space<vmem>>, vector<1x32x128xf32>,
    } else {
    }
    return
  }
  func.func @transform_0(%arg0: i32, %arg1: i32) -> (i32, i32) {
    %c0_i32 = arith.constant 0 : i32
    %c0_i32_0 = arith.constant 0 : i32
    return %c0_i32, %arg1 : i32, i32
  }
  func.func @transform_1(%arg0: i32, %arg1: i32) -> (i32, i32, i32) {
    %c0_i32 = arith.constant 0 : i32
    %c0_i32_0 = arith.constant 0 : i32
    return %arg0, %arg1, %c0_i32 : i32, i32, i32
  }
  func.func @transform_2(%arg0: i32, %arg1: i32) -> (i32, i32, i32) {
    %c0_i32 = arith.constant 0 : i32
    %c0_i32_0 = arith.constant 0 : i32
    %c0_i32_1 = arith.constant 0 : i32
    return %arg0, %c0_i32, %c0_i32_0 : i32, i32, i32
  }
}

module attributes {stable_mosaic.version = 11 : i64} {
  func.func @_conv_fused_kernel(%arg0: i32, %arg1: i32, %arg2: memref<32x640xbf16, #tpu.memory_space<vmem>>, %arg3: memref<1x640x128xbf16, #tpu.memory_space<vmem>>, %arg4: memref<1x32x128xf32, #tpu.memory_space<vmem>>, %arg5: memref<32x128xf32, #tpu.memory_space<vmem>>) attributes {dimension_semantics = [#tpu.dimension_semantics<parallel>, #tpu.dimension_semantics<arbitrary>], iteration_bounds = array<i64: 2, 1>, scalar_prefetch = 0 : i64, scratch_operands = 1 : i64, tpu.core_type = #tpu.core_type<tc>, window_params = [{transform_indices = @transform_0, window_bounds = array<i64: 32, 640>}, {transform_indices = @transform_1, window_bounds = array<i64: 1, 640, 128>}, {transform_indices = @transform_2, window_bounds = array<i64: 1, 32, 128>}]} {
    %c0_i32 = arith.constant 0 : i32
    %0 = arith.cmpi eq, %arg1, %c0_i32 : i32
    %1 = arith.extui %0 : i1 to i32
    %c0_i32_0 = arith.constant 0 : i32
    %2 = arith.cmpi ne, %1, %c0_i32_0 : i32
    scf.if %2 {
      %cst_11 = arith.constant 0.000000e+00 : f32
      %13 = vector.broadcast %cst_11 : f32 to vector<32x128xf32>
      %c0_12 = arith.constant 0 : index
      %c0_13 = arith.constant 0 : index
      %14 = vector.load %arg5[%c0_12, %c0_13] : memref<32x128xf32, #tpu.memory_space<vmem>>, vector<32x128xf32>
      tpu.vector_store %arg5[%c0_12, %c0_13], %13 {strides = array<i32>} : memref<32x128xf32, #tpu.memory_space<vmem>>, vector<32x128xf32>,
    } else {
    }
    %c0 = arith.constant 0 : index
    %c0_1 = arith.constant 0 : index
    %3 = vector.load %arg5[%c0, %c0_1] : memref<32x128xf32, #tpu.memory_space<vmem>>, vector<32x128xf32>
    %c0_2 = arith.constant 0 : index
    %c0_3 = arith.constant 0 : index
    %4 = vector.load %arg2[%c0_2, %c0_3] : memref<32x640xbf16, #tpu.memory_space<vmem>>, vector<32x640xbf16>
    %c0_4 = arith.constant 0 : index
    %c0_5 = arith.constant 0 : index
    %c0_6 = arith.constant 0 : index
    %5 = vector.load %arg3[%c0_4, %c0_5, %c0_6] : memref<1x640x128xbf16, #tpu.memory_space<vmem>>, vector<1x640x128xbf16>
    %6 = vector.shape_cast %5 : vector<1x640x128xbf16> to vector<640x128xbf16>
    %cst = arith.constant dense<0.000000e+00> : vector<32x128xf32>
    %7 = tpu.matmul %4, %6, %cst {dimension_numbers = #tpu.dot_dimension_numbers<[1], [0], [0], [1], [0, 0, 1, 1], [], []>} : vector<32x640xbf16>, vector<640x128xbf16>, vector<32x128xf32> -> vector<32x128xf32>
    %8 = arith.addf %3, %7 : vector<32x128xf32>
    %c0_7 = arith.constant 0 : index
    %c0_8 = arith.constant 0 : index
    %9 = vector.load %arg5[%c0_7, %c0_8] : memref<32x128xf32, #tpu.memory_space<vmem>>, vector<32x128xf32>
    tpu.vector_store %arg5[%c0_7, %c0_8], %8 {strides = array<i32>} : memref<32x128xf32, #tpu.memory_space<vmem>>, vector<32x128xf32>,
    %c0_i32_9 = arith.constant 0 : i32
    %10 = arith.cmpi eq, %arg1, %c0_i32_9 : i32
    %11 = arith.extui %10 : i1 to i32
    %c0_i32_10 = arith.constant 0 : i32
    %12 = arith.cmpi ne, %11, %c0_i32_10 : i32
    scf.if %12 {
      %c0_11 = arith.constant 0 : index
      %c0_12 = arith.constant 0 : index
      %13 = vector.load %arg5[%c0_11, %c0_12] : memref<32x128xf32, #tpu.memory_space<vmem>>, vector<32x128xf32>
      %cst_13 = arith.constant 0.000000e+00 : f32
      %14 = vector.broadcast %cst_13 : f32 to vector<32x128xf32>
      %15 = arith.maximumf %13, %14 : vector<32x128xf32>
      %c0_14 = arith.constant 0 : index
      %c0_15 = arith.constant 0 : index
      %c0_16 = arith.constant 0 : index
      %16 = vector.load %arg4[%c0_14, %c0_15, %c0_16] : memref<1x32x128xf32, #tpu.memory_space<vmem>>, vector<1x32x128xf32>
      %17 = vector.shape_cast %16 : vector<1x32x128xf32> to vector<32x128xf32>
      %18 = vector.shape_cast %15 : vector<32x128xf32> to vector<1x32x128xf32>
      tpu.vector_store %arg4[%c0_14, %c0_15, %c0_16], %18 {strides = array<i32>} : memref<1x32x128xf32, #tpu.memory_space<vmem>>, vector<1x32x128xf32>,
    } else {
    }
    return
  }
  func.func @transform_0(%arg0: i32, %arg1: i32) -> (i32, i32) {
    %c0_i32 = arith.constant 0 : i32
    %c0_i32_0 = arith.constant 0 : i32
    return %c0_i32, %arg1 : i32, i32
  }
  func.func @transform_1(%arg0: i32, %arg1: i32) -> (i32, i32, i32) {
    %c0_i32 = arith.constant 0 : i32
    %c0_i32_0 = arith.constant 0 : i32
    return %arg0, %arg1, %c0_i32 : i32, i32, i32
  }
  func.func @transform_2(%arg0: i32, %arg1: i32) -> (i32, i32, i32) {
    %c0_i32 = arith.constant 0 : i32
    %c0_i32_0 = arith.constant 0 : i32
    %c0_i32_1 = arith.constant 0 : i32
    return %arg0, %c0_i32, %c0_i32_0 : i32, i32, i32
  }
}

module attributes {stable_mosaic.version = 11 : i64} {
  func.func @_style_head_kernel(%arg0: memref<2x32x128xf32, #tpu.memory_space<vmem>>, %arg1: memref<32x8xf32, #tpu.memory_space<vmem>>, %arg2: memref<1x8xf32, #tpu.memory_space<vmem>>, %arg3: memref<2x8xf32, #tpu.memory_space<vmem>>) attributes {dimension_semantics = [], scalar_prefetch = 0 : i64, scratch_operands = 0 : i64, tpu.core_type = #tpu.core_type<tc>} {
    %c0 = arith.constant 0 : index
    %c0_0 = arith.constant 0 : index
    %c0_1 = arith.constant 0 : index
    %0 = vector.load %arg0[%c0, %c0_0, %c0_1] : memref<2x32x128xf32, #tpu.memory_space<vmem>>, vector<2x32x128xf32>
    %cst = arith.constant dense<0.000000e+00> : vector<2x32xf32>
    %1 = vector.multi_reduction <add>, %0, %cst [2] : vector<2x32x128xf32> to vector<2x32xf32>
    %cst_2 = arith.constant 1.000000e+00 : f32
    %2 = vector.broadcast %cst_2 : f32 to vector<2x32xf32>
    %3 = arith.mulf %1, %2 : vector<2x32xf32>
    %c0_3 = arith.constant 0 : index
    %c0_4 = arith.constant 0 : index
    %4 = vector.load %arg1[%c0_3, %c0_4] : memref<32x8xf32, #tpu.memory_space<vmem>>, vector<32x8xf32>
    %cst_5 = arith.constant dense<0.000000e+00> : vector<2x8xf32>
    %5 = tpu.matmul %3, %4, %cst_5 {dimension_numbers = #tpu.dot_dimension_numbers<[1], [0], [0], [1], [0, 0, 1, 1], [], []>} : vector<2x32xf32>, vector<32x8xf32>, vector<2x8xf32> -> vector<2x8xf32>
    %c0_6 = arith.constant 0 : index
    %c0_7 = arith.constant 0 : index
    %6 = vector.load %arg2[%c0_6, %c0_7] : memref<1x8xf32, #tpu.memory_space<vmem>>, vector<1x8xf32>
    %7 = vector.broadcast %6 : vector<1x8xf32> to vector<2x8xf32>
    %8 = arith.addf %5, %7 : vector<2x8xf32>
    %c0_8 = arith.constant 0 : index
    %c0_9 = arith.constant 0 : index
    %9 = vector.load %arg3[%c0_8, %c0_9] : memref<2x8xf32, #tpu.memory_space<vmem>>, vector<2x8xf32>
    tpu.vector_store %arg3[%c0_8, %c0_9], %8 {strides = array<i32>} : memref<2x8xf32, #tpu.memory_space<vmem>>, vector<2x8xf32>,
    return
  }
}

module attributes {stable_mosaic.version = 11 : i64} {
  func.func @_mlp_kernel(%arg0: memref<2x8xf32, #tpu.memory_space<vmem>>, %arg1: memref<8x16xf32, #tpu.memory_space<vmem>>, %arg2: memref<1x16xf32, #tpu.memory_space<vmem>>, %arg3: memref<16x16xf32, #tpu.memory_space<vmem>>, %arg4: memref<1x16xf32, #tpu.memory_space<vmem>>, %arg5: memref<16x128xf32, #tpu.memory_space<vmem>>, %arg6: memref<1x128xf32, #tpu.memory_space<vmem>>, %arg7: memref<2x128xf32, #tpu.memory_space<vmem>>) attributes {dimension_semantics = [], scalar_prefetch = 0 : i64, scratch_operands = 0 : i64, tpu.core_type = #tpu.core_type<tc>} {
    %c0 = arith.constant 0 : index
    %c0_0 = arith.constant 0 : index
    %0 = vector.load %arg0[%c0, %c0_0] : memref<2x8xf32, #tpu.memory_space<vmem>>, vector<2x8xf32>
    %c0_1 = arith.constant 0 : index
    %c0_2 = arith.constant 0 : index
    %1 = vector.load %arg1[%c0_1, %c0_2] : memref<8x16xf32, #tpu.memory_space<vmem>>, vector<8x16xf32>
    %cst = arith.constant dense<0.000000e+00> : vector<2x16xf32>
    %2 = tpu.matmul %0, %1, %cst {dimension_numbers = #tpu.dot_dimension_numbers<[1], [0], [0], [1], [0, 0, 1, 1], [], []>} : vector<2x8xf32>, vector<8x16xf32>, vector<2x16xf32> -> vector<2x16xf32>
    %c0_3 = arith.constant 0 : index
    %c0_4 = arith.constant 0 : index
    %3 = vector.load %arg2[%c0_3, %c0_4] : memref<1x16xf32, #tpu.memory_space<vmem>>, vector<1x16xf32>
    %4 = vector.broadcast %3 : vector<1x16xf32> to vector<2x16xf32>
    %5 = arith.addf %2, %4 : vector<2x16xf32>
    %cst_5 = arith.constant 0.000000e+00 : f32
    %6 = vector.broadcast %cst_5 : f32 to vector<2x16xf32>
    %7 = arith.maximumf %5, %6 : vector<2x16xf32>
    %c0_6 = arith.constant 0 : index
    %c0_7 = arith.constant 0 : index
    %8 = vector.load %arg3[%c0_6, %c0_7] : memref<16x16xf32, #tpu.memory_space<vmem>>, vector<16x16xf32>
    %cst_8 = arith.constant dense<0.000000e+00> : vector<2x16xf32>
    %9 = tpu.matmul %7, %8, %cst_8 {dimension_numbers = #tpu.dot_dimension_numbers<[1], [0], [0], [1], [0, 0, 1, 1], [], []>} : vector<2x16xf32>, vector<16x16xf32>, vector<2x16xf32> -> vector<2x16xf32>
    %c0_9 = arith.constant 0 : index
    %c0_10 = arith.constant 0 : index
    %10 = vector.load %arg4[%c0_9, %c0_10] : memref<1x16xf32, #tpu.memory_space<vmem>>, vector<1x16xf32>
    %11 = vector.broadcast %10 : vector<1x16xf32> to vector<2x16xf32>
    %12 = arith.addf %9, %11 : vector<2x16xf32>
    %cst_11 = arith.constant 0.000000e+00 : f32
    %13 = vector.broadcast %cst_11 : f32 to vector<2x16xf32>
    %14 = arith.maximumf %12, %13 : vector<2x16xf32>
    %c0_12 = arith.constant 0 : index
    %c0_13 = arith.constant 0 : index
    %15 = vector.load %arg5[%c0_12, %c0_13] : memref<16x128xf32, #tpu.memory_space<vmem>>, vector<16x128xf32>
    %cst_14 = arith.constant dense<0.000000e+00> : vector<2x128xf32>
    %16 = tpu.matmul %14, %15, %cst_14 {dimension_numbers = #tpu.dot_dimension_numbers<[1], [0], [0], [1], [0, 0, 1, 1], [], []>} : vector<2x16xf32>, vector<16x128xf32>, vector<2x128xf32> -> vector<2x128xf32>
    %c0_15 = arith.constant 0 : index
    %c0_16 = arith.constant 0 : index
    %17 = vector.load %arg6[%c0_15, %c0_16] : memref<1x128xf32, #tpu.memory_space<vmem>>, vector<1x128xf32>
    %18 = vector.broadcast %17 : vector<1x128xf32> to vector<2x128xf32>
    %19 = arith.addf %16, %18 : vector<2x128xf32>
    %c0_17 = arith.constant 0 : index
    %c0_18 = arith.constant 0 : index
    %20 = vector.load %arg7[%c0_17, %c0_18] : memref<2x128xf32, #tpu.memory_space<vmem>>, vector<2x128xf32>
    tpu.vector_store %arg7[%c0_17, %c0_18], %19 {strides = array<i32>} : memref<2x128xf32, #tpu.memory_space<vmem>>, vector<2x128xf32>,
    return
  }
}

module attributes {stable_mosaic.version = 11 : i64} {
  func.func @_conv_fused_kernel(%arg0: i32, %arg1: i32, %arg2: memref<16x256xbf16, #tpu.memory_space<vmem>>, %arg3: memref<1x256x128xbf16, #tpu.memory_space<vmem>>, %arg4: memref<1x16x128xf32, #tpu.memory_space<vmem>>, %arg5: memref<16x128xf32, #tpu.memory_space<vmem>>) attributes {dimension_semantics = [#tpu.dimension_semantics<parallel>, #tpu.dimension_semantics<arbitrary>], iteration_bounds = array<i64: 2, 1>, scalar_prefetch = 0 : i64, scratch_operands = 1 : i64, tpu.core_type = #tpu.core_type<tc>, window_params = [{transform_indices = @transform_0, window_bounds = array<i64: 16, 256>}, {transform_indices = @transform_1, window_bounds = array<i64: 1, 256, 128>}, {transform_indices = @transform_2, window_bounds = array<i64: 1, 16, 128>}]} {
    %c0_i32 = arith.constant 0 : i32
    %0 = arith.cmpi eq, %arg1, %c0_i32 : i32
    %1 = arith.extui %0 : i1 to i32
    %c0_i32_0 = arith.constant 0 : i32
    %2 = arith.cmpi ne, %1, %c0_i32_0 : i32
    scf.if %2 {
      %cst_11 = arith.constant 0.000000e+00 : f32
      %13 = vector.broadcast %cst_11 : f32 to vector<16x128xf32>
      %c0_12 = arith.constant 0 : index
      %c0_13 = arith.constant 0 : index
      %14 = vector.load %arg5[%c0_12, %c0_13] : memref<16x128xf32, #tpu.memory_space<vmem>>, vector<16x128xf32>
      tpu.vector_store %arg5[%c0_12, %c0_13], %13 {strides = array<i32>} : memref<16x128xf32, #tpu.memory_space<vmem>>, vector<16x128xf32>,
    } else {
    }
    %c0 = arith.constant 0 : index
    %c0_1 = arith.constant 0 : index
    %3 = vector.load %arg5[%c0, %c0_1] : memref<16x128xf32, #tpu.memory_space<vmem>>, vector<16x128xf32>
    %c0_2 = arith.constant 0 : index
    %c0_3 = arith.constant 0 : index
    %4 = vector.load %arg2[%c0_2, %c0_3] : memref<16x256xbf16, #tpu.memory_space<vmem>>, vector<16x256xbf16>
    %c0_4 = arith.constant 0 : index
    %c0_5 = arith.constant 0 : index
    %c0_6 = arith.constant 0 : index
    %5 = vector.load %arg3[%c0_4, %c0_5, %c0_6] : memref<1x256x128xbf16, #tpu.memory_space<vmem>>, vector<1x256x128xbf16>
    %6 = vector.shape_cast %5 : vector<1x256x128xbf16> to vector<256x128xbf16>
    %cst = arith.constant dense<0.000000e+00> : vector<16x128xf32>
    %7 = tpu.matmul %4, %6, %cst {dimension_numbers = #tpu.dot_dimension_numbers<[1], [0], [0], [1], [0, 0, 1, 1], [], []>} : vector<16x256xbf16>, vector<256x128xbf16>, vector<16x128xf32> -> vector<16x128xf32>
    %8 = arith.addf %3, %7 : vector<16x128xf32>
    %c0_7 = arith.constant 0 : index
    %c0_8 = arith.constant 0 : index
    %9 = vector.load %arg5[%c0_7, %c0_8] : memref<16x128xf32, #tpu.memory_space<vmem>>, vector<16x128xf32>
    tpu.vector_store %arg5[%c0_7, %c0_8], %8 {strides = array<i32>} : memref<16x128xf32, #tpu.memory_space<vmem>>, vector<16x128xf32>,
    %c0_i32_9 = arith.constant 0 : i32
    %10 = arith.cmpi eq, %arg1, %c0_i32_9 : i32
    %11 = arith.extui %10 : i1 to i32
    %c0_i32_10 = arith.constant 0 : i32
    %12 = arith.cmpi ne, %11, %c0_i32_10 : i32
    scf.if %12 {
      %c0_11 = arith.constant 0 : index
      %c0_12 = arith.constant 0 : index
      %13 = vector.load %arg5[%c0_11, %c0_12] : memref<16x128xf32, #tpu.memory_space<vmem>>, vector<16x128xf32>
      %cst_13 = arith.constant dense<0.000000e+00> : vector<16xf32>
      %14 = vector.multi_reduction <add>, %13, %cst_13 [1] : vector<16x128xf32> to vector<16xf32>
      %15 = vector.shape_cast %14 : vector<16xf32> to vector<16x1xf32>
      %cst_14 = arith.constant 1.562500e-02 : f32
      %16 = vector.broadcast %cst_14 : f32 to vector<16x1xf32>
      %17 = arith.mulf %15, %16 : vector<16x1xf32>
      %18 = arith.mulf %13, %13 : vector<16x128xf32>
      %cst_15 = arith.constant dense<0.000000e+00> : vector<16xf32>
      %19 = vector.multi_reduction <add>, %18, %cst_15 [1] : vector<16x128xf32> to vector<16xf32>
      %20 = vector.shape_cast %19 : vector<16xf32> to vector<16x1xf32>
      %cst_16 = arith.constant 1.562500e-02 : f32
      %21 = vector.broadcast %cst_16 : f32 to vector<16x1xf32>
      %22 = arith.mulf %20, %21 : vector<16x1xf32>
      %23 = arith.mulf %17, %17 : vector<16x1xf32>
      %24 = arith.subf %22, %23 : vector<16x1xf32>
      %cst_17 = arith.constant 0.000000e+00 : f32
      %25 = vector.broadcast %cst_17 : f32 to vector<16x1xf32>
      %26 = arith.maximumf %24, %25 : vector<16x1xf32>
      %27 = vector.broadcast %17 : vector<16x1xf32> to vector<16x128xf32>
      %28 = arith.subf %13, %27 : vector<16x128xf32>
      %cst_18 = arith.constant 9.99999974E-6 : f32
      %29 = vector.broadcast %cst_18 : f32 to vector<16x1xf32>
      %30 = arith.addf %26, %29 : vector<16x1xf32>
      %31 = math.rsqrt %30 : vector<16x1xf32>
      %32 = vector.broadcast %31 : vector<16x1xf32> to vector<16x128xf32>
      %33 = arith.mulf %28, %32 : vector<16x128xf32>
      %cst_19 = arith.constant 0.000000e+00 : f32
      %34 = vector.broadcast %cst_19 : f32 to vector<16x128xf32>
      %35 = arith.maximumf %33, %34 : vector<16x128xf32>
      %c0_20 = arith.constant 0 : index
      %c0_21 = arith.constant 0 : index
      %c0_22 = arith.constant 0 : index
      %36 = vector.load %arg4[%c0_20, %c0_21, %c0_22] : memref<1x16x128xf32, #tpu.memory_space<vmem>>, vector<1x16x128xf32>
      %37 = vector.shape_cast %36 : vector<1x16x128xf32> to vector<16x128xf32>
      %38 = vector.shape_cast %35 : vector<16x128xf32> to vector<1x16x128xf32>
      tpu.vector_store %arg4[%c0_20, %c0_21, %c0_22], %38 {strides = array<i32>} : memref<1x16x128xf32, #tpu.memory_space<vmem>>, vector<1x16x128xf32>,
    } else {
    }
    return
  }
  func.func @transform_0(%arg0: i32, %arg1: i32) -> (i32, i32) {
    %c0_i32 = arith.constant 0 : i32
    %c0_i32_0 = arith.constant 0 : i32
    return %c0_i32, %arg1 : i32, i32
  }
  func.func @transform_1(%arg0: i32, %arg1: i32) -> (i32, i32, i32) {
    %c0_i32 = arith.constant 0 : i32
    %c0_i32_0 = arith.constant 0 : i32
    return %arg0, %arg1, %c0_i32 : i32, i32, i32
  }
  func.func @transform_2(%arg0: i32, %arg1: i32) -> (i32, i32, i32) {
    %c0_i32 = arith.constant 0 : i32
    %c0_i32_0 = arith.constant 0 : i32
    %c0_i32_1 = arith.constant 0 : i32
    return %arg0, %c0_i32, %c0_i32_0 : i32, i32, i32
  }
}

module attributes {stable_mosaic.version = 11 : i64} {
  func.func @_conv_fused_kernel(%arg0: i32, %arg1: i32, %arg2: memref<16x256xbf16, #tpu.memory_space<vmem>>, %arg3: memref<1x256x256xbf16, #tpu.memory_space<vmem>>, %arg4: memref<1x16x256xf32, #tpu.memory_space<vmem>>, %arg5: memref<16x256xf32, #tpu.memory_space<vmem>>) attributes {dimension_semantics = [#tpu.dimension_semantics<parallel>, #tpu.dimension_semantics<arbitrary>], iteration_bounds = array<i64: 2, 1>, scalar_prefetch = 0 : i64, scratch_operands = 1 : i64, tpu.core_type = #tpu.core_type<tc>, window_params = [{transform_indices = @transform_0, window_bounds = array<i64: 16, 256>}, {transform_indices = @transform_1, window_bounds = array<i64: 1, 256, 256>}, {transform_indices = @transform_2, window_bounds = array<i64: 1, 16, 256>}]} {
    %c0_i32 = arith.constant 0 : i32
    %0 = arith.cmpi eq, %arg1, %c0_i32 : i32
    %1 = arith.extui %0 : i1 to i32
    %c0_i32_0 = arith.constant 0 : i32
    %2 = arith.cmpi ne, %1, %c0_i32_0 : i32
    scf.if %2 {
      %cst_11 = arith.constant 0.000000e+00 : f32
      %13 = vector.broadcast %cst_11 : f32 to vector<16x256xf32>
      %c0_12 = arith.constant 0 : index
      %c0_13 = arith.constant 0 : index
      %14 = vector.load %arg5[%c0_12, %c0_13] : memref<16x256xf32, #tpu.memory_space<vmem>>, vector<16x256xf32>
      tpu.vector_store %arg5[%c0_12, %c0_13], %13 {strides = array<i32>} : memref<16x256xf32, #tpu.memory_space<vmem>>, vector<16x256xf32>,
    } else {
    }
    %c0 = arith.constant 0 : index
    %c0_1 = arith.constant 0 : index
    %3 = vector.load %arg5[%c0, %c0_1] : memref<16x256xf32, #tpu.memory_space<vmem>>, vector<16x256xf32>
    %c0_2 = arith.constant 0 : index
    %c0_3 = arith.constant 0 : index
    %4 = vector.load %arg2[%c0_2, %c0_3] : memref<16x256xbf16, #tpu.memory_space<vmem>>, vector<16x256xbf16>
    %c0_4 = arith.constant 0 : index
    %c0_5 = arith.constant 0 : index
    %c0_6 = arith.constant 0 : index
    %5 = vector.load %arg3[%c0_4, %c0_5, %c0_6] : memref<1x256x256xbf16, #tpu.memory_space<vmem>>, vector<1x256x256xbf16>
    %6 = vector.shape_cast %5 : vector<1x256x256xbf16> to vector<256x256xbf16>
    %cst = arith.constant dense<0.000000e+00> : vector<16x256xf32>
    %7 = tpu.matmul %4, %6, %cst {dimension_numbers = #tpu.dot_dimension_numbers<[1], [0], [0], [1], [0, 0, 1, 1], [], []>} : vector<16x256xbf16>, vector<256x256xbf16>, vector<16x256xf32> -> vector<16x256xf32>
    %8 = arith.addf %3, %7 : vector<16x256xf32>
    %c0_7 = arith.constant 0 : index
    %c0_8 = arith.constant 0 : index
    %9 = vector.load %arg5[%c0_7, %c0_8] : memref<16x256xf32, #tpu.memory_space<vmem>>, vector<16x256xf32>
    tpu.vector_store %arg5[%c0_7, %c0_8], %8 {strides = array<i32>} : memref<16x256xf32, #tpu.memory_space<vmem>>, vector<16x256xf32>,
    %c0_i32_9 = arith.constant 0 : i32
    %10 = arith.cmpi eq, %arg1, %c0_i32_9 : i32
    %11 = arith.extui %10 : i1 to i32
    %c0_i32_10 = arith.constant 0 : i32
    %12 = arith.cmpi ne, %11, %c0_i32_10 : i32
    scf.if %12 {
      %c0_11 = arith.constant 0 : index
      %c0_12 = arith.constant 0 : index
      %13 = vector.load %arg5[%c0_11, %c0_12] : memref<16x256xf32, #tpu.memory_space<vmem>>, vector<16x256xf32>
      %cst_13 = arith.constant dense<0.000000e+00> : vector<16xf32>
      %14 = vector.multi_reduction <add>, %13, %cst_13 [1] : vector<16x256xf32> to vector<16xf32>
      %15 = vector.shape_cast %14 : vector<16xf32> to vector<16x1xf32>
      %cst_14 = arith.constant 3.906250e-03 : f32
      %16 = vector.broadcast %cst_14 : f32 to vector<16x1xf32>
      %17 = arith.mulf %15, %16 : vector<16x1xf32>
      %18 = arith.mulf %13, %13 : vector<16x256xf32>
      %cst_15 = arith.constant dense<0.000000e+00> : vector<16xf32>
      %19 = vector.multi_reduction <add>, %18, %cst_15 [1] : vector<16x256xf32> to vector<16xf32>
      %20 = vector.shape_cast %19 : vector<16xf32> to vector<16x1xf32>
      %cst_16 = arith.constant 3.906250e-03 : f32
      %21 = vector.broadcast %cst_16 : f32 to vector<16x1xf32>
      %22 = arith.mulf %20, %21 : vector<16x1xf32>
      %23 = arith.mulf %17, %17 : vector<16x1xf32>
      %24 = arith.subf %22, %23 : vector<16x1xf32>
      %cst_17 = arith.constant 0.000000e+00 : f32
      %25 = vector.broadcast %cst_17 : f32 to vector<16x1xf32>
      %26 = arith.maximumf %24, %25 : vector<16x1xf32>
      %27 = vector.broadcast %17 : vector<16x1xf32> to vector<16x256xf32>
      %28 = arith.subf %13, %27 : vector<16x256xf32>
      %cst_18 = arith.constant 9.99999974E-6 : f32
      %29 = vector.broadcast %cst_18 : f32 to vector<16x1xf32>
      %30 = arith.addf %26, %29 : vector<16x1xf32>
      %31 = math.rsqrt %30 : vector<16x1xf32>
      %32 = vector.broadcast %31 : vector<16x1xf32> to vector<16x256xf32>
      %33 = arith.mulf %28, %32 : vector<16x256xf32>
      %cst_19 = arith.constant 0.000000e+00 : f32
      %34 = vector.broadcast %cst_19 : f32 to vector<16x256xf32>
      %35 = arith.maximumf %33, %34 : vector<16x256xf32>
      %c0_20 = arith.constant 0 : index
      %c0_21 = arith.constant 0 : index
      %c0_22 = arith.constant 0 : index
      %36 = vector.load %arg4[%c0_20, %c0_21, %c0_22] : memref<1x16x256xf32, #tpu.memory_space<vmem>>, vector<1x16x256xf32>
      %37 = vector.shape_cast %36 : vector<1x16x256xf32> to vector<16x256xf32>
      %38 = vector.shape_cast %35 : vector<16x256xf32> to vector<1x16x256xf32>
      tpu.vector_store %arg4[%c0_20, %c0_21, %c0_22], %38 {strides = array<i32>} : memref<1x16x256xf32, #tpu.memory_space<vmem>>, vector<1x16x256xf32>,
    } else {
    }
    return
  }
  func.func @transform_0(%arg0: i32, %arg1: i32) -> (i32, i32) {
    %c0_i32 = arith.constant 0 : i32
    %c0_i32_0 = arith.constant 0 : i32
    return %c0_i32, %arg1 : i32, i32
  }
  func.func @transform_1(%arg0: i32, %arg1: i32) -> (i32, i32, i32) {
    %c0_i32 = arith.constant 0 : i32
    %c0_i32_0 = arith.constant 0 : i32
    return %arg0, %arg1, %c0_i32 : i32, i32, i32
  }
  func.func @transform_2(%arg0: i32, %arg1: i32) -> (i32, i32, i32) {
    %c0_i32 = arith.constant 0 : i32
    %c0_i32_0 = arith.constant 0 : i32
    %c0_i32_1 = arith.constant 0 : i32
    return %arg0, %c0_i32, %c0_i32_0 : i32, i32, i32
  }
}

module attributes {stable_mosaic.version = 11 : i64} {
  func.func @_conv_fused_kernel(%arg0: i32, %arg1: i32, %arg2: memref<32x384xbf16, #tpu.memory_space<vmem>>, %arg3: memref<1x384x128xbf16, #tpu.memory_space<vmem>>, %arg4: memref<1x32x128xf32, #tpu.memory_space<vmem>>, %arg5: memref<32x128xf32, #tpu.memory_space<vmem>>) attributes {dimension_semantics = [#tpu.dimension_semantics<parallel>, #tpu.dimension_semantics<arbitrary>], iteration_bounds = array<i64: 2, 1>, scalar_prefetch = 0 : i64, scratch_operands = 1 : i64, tpu.core_type = #tpu.core_type<tc>, window_params = [{transform_indices = @transform_0, window_bounds = array<i64: 32, 384>}, {transform_indices = @transform_1, window_bounds = array<i64: 1, 384, 128>}, {transform_indices = @transform_2, window_bounds = array<i64: 1, 32, 128>}]} {
    %c0_i32 = arith.constant 0 : i32
    %0 = arith.cmpi eq, %arg1, %c0_i32 : i32
    %1 = arith.extui %0 : i1 to i32
    %c0_i32_0 = arith.constant 0 : i32
    %2 = arith.cmpi ne, %1, %c0_i32_0 : i32
    scf.if %2 {
      %cst_11 = arith.constant 0.000000e+00 : f32
      %13 = vector.broadcast %cst_11 : f32 to vector<32x128xf32>
      %c0_12 = arith.constant 0 : index
      %c0_13 = arith.constant 0 : index
      %14 = vector.load %arg5[%c0_12, %c0_13] : memref<32x128xf32, #tpu.memory_space<vmem>>, vector<32x128xf32>
      tpu.vector_store %arg5[%c0_12, %c0_13], %13 {strides = array<i32>} : memref<32x128xf32, #tpu.memory_space<vmem>>, vector<32x128xf32>,
    } else {
    }
    %c0 = arith.constant 0 : index
    %c0_1 = arith.constant 0 : index
    %3 = vector.load %arg5[%c0, %c0_1] : memref<32x128xf32, #tpu.memory_space<vmem>>, vector<32x128xf32>
    %c0_2 = arith.constant 0 : index
    %c0_3 = arith.constant 0 : index
    %4 = vector.load %arg2[%c0_2, %c0_3] : memref<32x384xbf16, #tpu.memory_space<vmem>>, vector<32x384xbf16>
    %c0_4 = arith.constant 0 : index
    %c0_5 = arith.constant 0 : index
    %c0_6 = arith.constant 0 : index
    %5 = vector.load %arg3[%c0_4, %c0_5, %c0_6] : memref<1x384x128xbf16, #tpu.memory_space<vmem>>, vector<1x384x128xbf16>
    %6 = vector.shape_cast %5 : vector<1x384x128xbf16> to vector<384x128xbf16>
    %cst = arith.constant dense<0.000000e+00> : vector<32x128xf32>
    %7 = tpu.matmul %4, %6, %cst {dimension_numbers = #tpu.dot_dimension_numbers<[1], [0], [0], [1], [0, 0, 1, 1], [], []>} : vector<32x384xbf16>, vector<384x128xbf16>, vector<32x128xf32> -> vector<32x128xf32>
    %8 = arith.addf %3, %7 : vector<32x128xf32>
    %c0_7 = arith.constant 0 : index
    %c0_8 = arith.constant 0 : index
    %9 = vector.load %arg5[%c0_7, %c0_8] : memref<32x128xf32, #tpu.memory_space<vmem>>, vector<32x128xf32>
    tpu.vector_store %arg5[%c0_7, %c0_8], %8 {strides = array<i32>} : memref<32x128xf32, #tpu.memory_space<vmem>>, vector<32x128xf32>,
    %c0_i32_9 = arith.constant 0 : i32
    %10 = arith.cmpi eq, %arg1, %c0_i32_9 : i32
    %11 = arith.extui %10 : i1 to i32
    %c0_i32_10 = arith.constant 0 : i32
    %12 = arith.cmpi ne, %11, %c0_i32_10 : i32
    scf.if %12 {
      %c0_11 = arith.constant 0 : index
      %c0_12 = arith.constant 0 : index
      %13 = vector.load %arg5[%c0_11, %c0_12] : memref<32x128xf32, #tpu.memory_space<vmem>>, vector<32x128xf32>
      %cst_13 = arith.constant dense<0.000000e+00> : vector<32xf32>
      %14 = vector.multi_reduction <add>, %13, %cst_13 [1] : vector<32x128xf32> to vector<32xf32>
      %15 = vector.shape_cast %14 : vector<32xf32> to vector<32x1xf32>
      %cst_14 = arith.constant 6.250000e-02 : f32
      %16 = vector.broadcast %cst_14 : f32 to vector<32x1xf32>
      %17 = arith.mulf %15, %16 : vector<32x1xf32>
      %18 = arith.mulf %13, %13 : vector<32x128xf32>
      %cst_15 = arith.constant dense<0.000000e+00> : vector<32xf32>
      %19 = vector.multi_reduction <add>, %18, %cst_15 [1] : vector<32x128xf32> to vector<32xf32>
      %20 = vector.shape_cast %19 : vector<32xf32> to vector<32x1xf32>
      %cst_16 = arith.constant 6.250000e-02 : f32
      %21 = vector.broadcast %cst_16 : f32 to vector<32x1xf32>
      %22 = arith.mulf %20, %21 : vector<32x1xf32>
      %23 = arith.mulf %17, %17 : vector<32x1xf32>
      %24 = arith.subf %22, %23 : vector<32x1xf32>
      %cst_17 = arith.constant 0.000000e+00 : f32
      %25 = vector.broadcast %cst_17 : f32 to vector<32x1xf32>
      %26 = arith.maximumf %24, %25 : vector<32x1xf32>
      %27 = vector.broadcast %17 : vector<32x1xf32> to vector<32x128xf32>
      %28 = arith.subf %13, %27 : vector<32x128xf32>
      %cst_18 = arith.constant 9.99999974E-6 : f32
      %29 = vector.broadcast %cst_18 : f32 to vector<32x1xf32>
      %30 = arith.addf %26, %29 : vector<32x1xf32>
      %31 = math.rsqrt %30 : vector<32x1xf32>
      %32 = vector.broadcast %31 : vector<32x1xf32> to vector<32x128xf32>
      %33 = arith.mulf %28, %32 : vector<32x128xf32>
      %cst_19 = arith.constant 0.000000e+00 : f32
      %34 = vector.broadcast %cst_19 : f32 to vector<32x128xf32>
      %35 = arith.maximumf %33, %34 : vector<32x128xf32>
      %c0_20 = arith.constant 0 : index
      %c0_21 = arith.constant 0 : index
      %c0_22 = arith.constant 0 : index
      %36 = vector.load %arg4[%c0_20, %c0_21, %c0_22] : memref<1x32x128xf32, #tpu.memory_space<vmem>>, vector<1x32x128xf32>
      %37 = vector.shape_cast %36 : vector<1x32x128xf32> to vector<32x128xf32>
      %38 = vector.shape_cast %35 : vector<32x128xf32> to vector<1x32x128xf32>
      tpu.vector_store %arg4[%c0_20, %c0_21, %c0_22], %38 {strides = array<i32>} : memref<1x32x128xf32, #tpu.memory_space<vmem>>, vector<1x32x128xf32>,
    } else {
    }
    return
  }
  func.func @transform_0(%arg0: i32, %arg1: i32) -> (i32, i32) {
    %c0_i32 = arith.constant 0 : i32
    %c0_i32_0 = arith.constant 0 : i32
    return %c0_i32, %arg1 : i32, i32
  }
  func.func @transform_1(%arg0: i32, %arg1: i32) -> (i32, i32, i32) {
    %c0_i32 = arith.constant 0 : i32
    %c0_i32_0 = arith.constant 0 : i32
    return %arg0, %arg1, %c0_i32 : i32, i32, i32
  }
  func.func @transform_2(%arg0: i32, %arg1: i32) -> (i32, i32, i32) {
    %c0_i32 = arith.constant 0 : i32
    %c0_i32_0 = arith.constant 0 : i32
    %c0_i32_1 = arith.constant 0 : i32
    return %arg0, %c0_i32, %c0_i32_0 : i32, i32, i32
  }
}

module attributes {stable_mosaic.version = 11 : i64} {
  func.func @_conv_fused_kernel(%arg0: i32, %arg1: i32, %arg2: memref<32x384xbf16, #tpu.memory_space<vmem>>, %arg3: memref<1x384x128xbf16, #tpu.memory_space<vmem>>, %arg4: memref<1x32x128xf32, #tpu.memory_space<vmem>>, %arg5: memref<32x128xf32, #tpu.memory_space<vmem>>) attributes {dimension_semantics = [#tpu.dimension_semantics<parallel>, #tpu.dimension_semantics<arbitrary>], iteration_bounds = array<i64: 2, 1>, scalar_prefetch = 0 : i64, scratch_operands = 1 : i64, tpu.core_type = #tpu.core_type<tc>, window_params = [{transform_indices = @transform_0, window_bounds = array<i64: 32, 384>}, {transform_indices = @transform_1, window_bounds = array<i64: 1, 384, 128>}, {transform_indices = @transform_2, window_bounds = array<i64: 1, 32, 128>}]} {
    %c0_i32 = arith.constant 0 : i32
    %0 = arith.cmpi eq, %arg1, %c0_i32 : i32
    %1 = arith.extui %0 : i1 to i32
    %c0_i32_0 = arith.constant 0 : i32
    %2 = arith.cmpi ne, %1, %c0_i32_0 : i32
    scf.if %2 {
      %cst_11 = arith.constant 0.000000e+00 : f32
      %13 = vector.broadcast %cst_11 : f32 to vector<32x128xf32>
      %c0_12 = arith.constant 0 : index
      %c0_13 = arith.constant 0 : index
      %14 = vector.load %arg5[%c0_12, %c0_13] : memref<32x128xf32, #tpu.memory_space<vmem>>, vector<32x128xf32>
      tpu.vector_store %arg5[%c0_12, %c0_13], %13 {strides = array<i32>} : memref<32x128xf32, #tpu.memory_space<vmem>>, vector<32x128xf32>,
    } else {
    }
    %c0 = arith.constant 0 : index
    %c0_1 = arith.constant 0 : index
    %3 = vector.load %arg5[%c0, %c0_1] : memref<32x128xf32, #tpu.memory_space<vmem>>, vector<32x128xf32>
    %c0_2 = arith.constant 0 : index
    %c0_3 = arith.constant 0 : index
    %4 = vector.load %arg2[%c0_2, %c0_3] : memref<32x384xbf16, #tpu.memory_space<vmem>>, vector<32x384xbf16>
    %c0_4 = arith.constant 0 : index
    %c0_5 = arith.constant 0 : index
    %c0_6 = arith.constant 0 : index
    %5 = vector.load %arg3[%c0_4, %c0_5, %c0_6] : memref<1x384x128xbf16, #tpu.memory_space<vmem>>, vector<1x384x128xbf16>
    %6 = vector.shape_cast %5 : vector<1x384x128xbf16> to vector<384x128xbf16>
    %cst = arith.constant dense<0.000000e+00> : vector<32x128xf32>
    %7 = tpu.matmul %4, %6, %cst {dimension_numbers = #tpu.dot_dimension_numbers<[1], [0], [0], [1], [0, 0, 1, 1], [], []>} : vector<32x384xbf16>, vector<384x128xbf16>, vector<32x128xf32> -> vector<32x128xf32>
    %8 = arith.addf %3, %7 : vector<32x128xf32>
    %c0_7 = arith.constant 0 : index
    %c0_8 = arith.constant 0 : index
    %9 = vector.load %arg5[%c0_7, %c0_8] : memref<32x128xf32, #tpu.memory_space<vmem>>, vector<32x128xf32>
    tpu.vector_store %arg5[%c0_7, %c0_8], %8 {strides = array<i32>} : memref<32x128xf32, #tpu.memory_space<vmem>>, vector<32x128xf32>,
    %c0_i32_9 = arith.constant 0 : i32
    %10 = arith.cmpi eq, %arg1, %c0_i32_9 : i32
    %11 = arith.extui %10 : i1 to i32
    %c0_i32_10 = arith.constant 0 : i32
    %12 = arith.cmpi ne, %11, %c0_i32_10 : i32
    scf.if %12 {
      %c0_11 = arith.constant 0 : index
      %c0_12 = arith.constant 0 : index
      %13 = vector.load %arg5[%c0_11, %c0_12] : memref<32x128xf32, #tpu.memory_space<vmem>>, vector<32x128xf32>
      %cst_13 = arith.constant dense<0.000000e+00> : vector<32xf32>
      %14 = vector.multi_reduction <add>, %13, %cst_13 [1] : vector<32x128xf32> to vector<32xf32>
      %15 = vector.shape_cast %14 : vector<32xf32> to vector<32x1xf32>
      %cst_14 = arith.constant 6.250000e-02 : f32
      %16 = vector.broadcast %cst_14 : f32 to vector<32x1xf32>
      %17 = arith.mulf %15, %16 : vector<32x1xf32>
      %18 = arith.mulf %13, %13 : vector<32x128xf32>
      %cst_15 = arith.constant dense<0.000000e+00> : vector<32xf32>
      %19 = vector.multi_reduction <add>, %18, %cst_15 [1] : vector<32x128xf32> to vector<32xf32>
      %20 = vector.shape_cast %19 : vector<32xf32> to vector<32x1xf32>
      %cst_16 = arith.constant 6.250000e-02 : f32
      %21 = vector.broadcast %cst_16 : f32 to vector<32x1xf32>
      %22 = arith.mulf %20, %21 : vector<32x1xf32>
      %23 = arith.mulf %17, %17 : vector<32x1xf32>
      %24 = arith.subf %22, %23 : vector<32x1xf32>
      %cst_17 = arith.constant 0.000000e+00 : f32
      %25 = vector.broadcast %cst_17 : f32 to vector<32x1xf32>
      %26 = arith.maximumf %24, %25 : vector<32x1xf32>
      %27 = vector.broadcast %17 : vector<32x1xf32> to vector<32x128xf32>
      %28 = arith.subf %13, %27 : vector<32x128xf32>
      %cst_18 = arith.constant 9.99999974E-6 : f32
      %29 = vector.broadcast %cst_18 : f32 to vector<32x1xf32>
      %30 = arith.addf %26, %29 : vector<32x1xf32>
      %31 = math.rsqrt %30 : vector<32x1xf32>
      %32 = vector.broadcast %31 : vector<32x1xf32> to vector<32x128xf32>
      %33 = arith.mulf %28, %32 : vector<32x128xf32>
      %c0_19 = arith.constant 0 : index
      %c0_20 = arith.constant 0 : index
      %c0_21 = arith.constant 0 : index
      %34 = vector.load %arg4[%c0_19, %c0_20, %c0_21] : memref<1x32x128xf32, #tpu.memory_space<vmem>>, vector<1x32x128xf32>
      %35 = vector.shape_cast %34 : vector<1x32x128xf32> to vector<32x128xf32>
      %36 = vector.shape_cast %33 : vector<32x128xf32> to vector<1x32x128xf32>
      tpu.vector_store %arg4[%c0_19, %c0_20, %c0_21], %36 {strides = array<i32>} : memref<1x32x128xf32, #tpu.memory_space<vmem>>, vector<1x32x128xf32>,
    } else {
    }
    return
  }
  func.func @transform_0(%arg0: i32, %arg1: i32) -> (i32, i32) {
    %c0_i32 = arith.constant 0 : i32
    %c0_i32_0 = arith.constant 0 : i32
    return %c0_i32, %arg1 : i32, i32
  }
  func.func @transform_1(%arg0: i32, %arg1: i32) -> (i32, i32, i32) {
    %c0_i32 = arith.constant 0 : i32
    %c0_i32_0 = arith.constant 0 : i32
    return %arg0, %arg1, %c0_i32 : i32, i32, i32
  }
  func.func @transform_2(%arg0: i32, %arg1: i32) -> (i32, i32, i32) {
    %c0_i32 = arith.constant 0 : i32
    %c0_i32_0 = arith.constant 0 : i32
    %c0_i32_1 = arith.constant 0 : i32
    return %arg0, %c0_i32, %c0_i32_0 : i32, i32, i32
  }
}

module attributes {stable_mosaic.version = 11 : i64} {
  func.func @_conv_fused_kernel(%arg0: i32, %arg1: i32, %arg2: memref<32x384xbf16, #tpu.memory_space<vmem>>, %arg3: memref<1x384x128xbf16, #tpu.memory_space<vmem>>, %arg4: memref<1x32x1xf32, #tpu.memory_space<vmem>>, %arg5: memref<1x32x1xf32, #tpu.memory_space<vmem>>, %arg6: memref<1x32x128xf32, #tpu.memory_space<vmem>>, %arg7: memref<32x128xf32, #tpu.memory_space<vmem>>) attributes {dimension_semantics = [#tpu.dimension_semantics<parallel>, #tpu.dimension_semantics<arbitrary>], iteration_bounds = array<i64: 2, 1>, scalar_prefetch = 0 : i64, scratch_operands = 1 : i64, tpu.core_type = #tpu.core_type<tc>, window_params = [{transform_indices = @transform_0, window_bounds = array<i64: 32, 384>}, {transform_indices = @transform_1, window_bounds = array<i64: 1, 384, 128>}, {transform_indices = @transform_2, window_bounds = array<i64: 1, 32, 1>}, {transform_indices = @transform_3, window_bounds = array<i64: 1, 32, 1>}, {transform_indices = @transform_4, window_bounds = array<i64: 1, 32, 128>}]} {
    %c0_i32 = arith.constant 0 : i32
    %0 = arith.cmpi eq, %arg1, %c0_i32 : i32
    %1 = arith.extui %0 : i1 to i32
    %c0_i32_0 = arith.constant 0 : i32
    %2 = arith.cmpi ne, %1, %c0_i32_0 : i32
    scf.if %2 {
      %cst_11 = arith.constant 0.000000e+00 : f32
      %13 = vector.broadcast %cst_11 : f32 to vector<32x128xf32>
      %c0_12 = arith.constant 0 : index
      %c0_13 = arith.constant 0 : index
      %14 = vector.load %arg7[%c0_12, %c0_13] : memref<32x128xf32, #tpu.memory_space<vmem>>, vector<32x128xf32>
      tpu.vector_store %arg7[%c0_12, %c0_13], %13 {strides = array<i32>} : memref<32x128xf32, #tpu.memory_space<vmem>>, vector<32x128xf32>,
    } else {
    }
    %c0 = arith.constant 0 : index
    %c0_1 = arith.constant 0 : index
    %3 = vector.load %arg7[%c0, %c0_1] : memref<32x128xf32, #tpu.memory_space<vmem>>, vector<32x128xf32>
    %c0_2 = arith.constant 0 : index
    %c0_3 = arith.constant 0 : index
    %4 = vector.load %arg2[%c0_2, %c0_3] : memref<32x384xbf16, #tpu.memory_space<vmem>>, vector<32x384xbf16>
    %c0_4 = arith.constant 0 : index
    %c0_5 = arith.constant 0 : index
    %c0_6 = arith.constant 0 : index
    %5 = vector.load %arg3[%c0_4, %c0_5, %c0_6] : memref<1x384x128xbf16, #tpu.memory_space<vmem>>, vector<1x384x128xbf16>
    %6 = vector.shape_cast %5 : vector<1x384x128xbf16> to vector<384x128xbf16>
    %cst = arith.constant dense<0.000000e+00> : vector<32x128xf32>
    %7 = tpu.matmul %4, %6, %cst {dimension_numbers = #tpu.dot_dimension_numbers<[1], [0], [0], [1], [0, 0, 1, 1], [], []>} : vector<32x384xbf16>, vector<384x128xbf16>, vector<32x128xf32> -> vector<32x128xf32>
    %8 = arith.addf %3, %7 : vector<32x128xf32>
    %c0_7 = arith.constant 0 : index
    %c0_8 = arith.constant 0 : index
    %9 = vector.load %arg7[%c0_7, %c0_8] : memref<32x128xf32, #tpu.memory_space<vmem>>, vector<32x128xf32>
    tpu.vector_store %arg7[%c0_7, %c0_8], %8 {strides = array<i32>} : memref<32x128xf32, #tpu.memory_space<vmem>>, vector<32x128xf32>,
    %c0_i32_9 = arith.constant 0 : i32
    %10 = arith.cmpi eq, %arg1, %c0_i32_9 : i32
    %11 = arith.extui %10 : i1 to i32
    %c0_i32_10 = arith.constant 0 : i32
    %12 = arith.cmpi ne, %11, %c0_i32_10 : i32
    scf.if %12 {
      %c0_11 = arith.constant 0 : index
      %c0_12 = arith.constant 0 : index
      %13 = vector.load %arg7[%c0_11, %c0_12] : memref<32x128xf32, #tpu.memory_space<vmem>>, vector<32x128xf32>
      %cst_13 = arith.constant dense<0.000000e+00> : vector<32xf32>
      %14 = vector.multi_reduction <add>, %13, %cst_13 [1] : vector<32x128xf32> to vector<32xf32>
      %15 = vector.shape_cast %14 : vector<32xf32> to vector<32x1xf32>
      %cst_14 = arith.constant 6.250000e-02 : f32
      %16 = vector.broadcast %cst_14 : f32 to vector<32x1xf32>
      %17 = arith.mulf %15, %16 : vector<32x1xf32>
      %18 = arith.mulf %13, %13 : vector<32x128xf32>
      %cst_15 = arith.constant dense<0.000000e+00> : vector<32xf32>
      %19 = vector.multi_reduction <add>, %18, %cst_15 [1] : vector<32x128xf32> to vector<32xf32>
      %20 = vector.shape_cast %19 : vector<32xf32> to vector<32x1xf32>
      %cst_16 = arith.constant 6.250000e-02 : f32
      %21 = vector.broadcast %cst_16 : f32 to vector<32x1xf32>
      %22 = arith.mulf %20, %21 : vector<32x1xf32>
      %23 = arith.mulf %17, %17 : vector<32x1xf32>
      %24 = arith.subf %22, %23 : vector<32x1xf32>
      %cst_17 = arith.constant 0.000000e+00 : f32
      %25 = vector.broadcast %cst_17 : f32 to vector<32x1xf32>
      %26 = arith.maximumf %24, %25 : vector<32x1xf32>
      %27 = vector.broadcast %17 : vector<32x1xf32> to vector<32x128xf32>
      %28 = arith.subf %13, %27 : vector<32x128xf32>
      %cst_18 = arith.constant 9.99999974E-6 : f32
      %29 = vector.broadcast %cst_18 : f32 to vector<32x1xf32>
      %30 = arith.addf %26, %29 : vector<32x1xf32>
      %31 = math.rsqrt %30 : vector<32x1xf32>
      %32 = vector.broadcast %31 : vector<32x1xf32> to vector<32x128xf32>
      %33 = arith.mulf %28, %32 : vector<32x128xf32>
      %c0_19 = arith.constant 0 : index
      %c0_20 = arith.constant 0 : index
      %c0_21 = arith.constant 0 : index
      %34 = vector.load %arg4[%c0_19, %c0_20, %c0_21] : memref<1x32x1xf32, #tpu.memory_space<vmem>>, vector<1x32x1xf32>
      %35 = vector.shape_cast %34 : vector<1x32x1xf32> to vector<32x1xf32>
      %36 = vector.broadcast %35 : vector<32x1xf32> to vector<32x128xf32>
      %37 = arith.mulf %33, %36 : vector<32x128xf32>
      %c0_22 = arith.constant 0 : index
      %c0_23 = arith.constant 0 : index
      %c0_24 = arith.constant 0 : index
      %38 = vector.load %arg5[%c0_22, %c0_23, %c0_24] : memref<1x32x1xf32, #tpu.memory_space<vmem>>, vector<1x32x1xf32>
      %39 = vector.shape_cast %38 : vector<1x32x1xf32> to vector<32x1xf32>
      %40 = vector.broadcast %39 : vector<32x1xf32> to vector<32x128xf32>
      %41 = arith.addf %37, %40 : vector<32x128xf32>
      %cst_25 = arith.constant 0.000000e+00 : f32
      %42 = vector.broadcast %cst_25 : f32 to vector<32x128xf32>
      %43 = arith.maximumf %41, %42 : vector<32x128xf32>
      %c0_26 = arith.constant 0 : index
      %c0_27 = arith.constant 0 : index
      %c0_28 = arith.constant 0 : index
      %44 = vector.load %arg6[%c0_26, %c0_27, %c0_28] : memref<1x32x128xf32, #tpu.memory_space<vmem>>, vector<1x32x128xf32>
      %45 = vector.shape_cast %44 : vector<1x32x128xf32> to vector<32x128xf32>
      %46 = vector.shape_cast %43 : vector<32x128xf32> to vector<1x32x128xf32>
      tpu.vector_store %arg6[%c0_26, %c0_27, %c0_28], %46 {strides = array<i32>} : memref<1x32x128xf32, #tpu.memory_space<vmem>>, vector<1x32x128xf32>,
    } else {
    }
    return
  }
  func.func @transform_0(%arg0: i32, %arg1: i32) -> (i32, i32) {
    %c0_i32 = arith.constant 0 : i32
    %c0_i32_0 = arith.constant 0 : i32
    return %c0_i32, %arg1 : i32, i32
  }
  func.func @transform_1(%arg0: i32, %arg1: i32) -> (i32, i32, i32) {
    %c0_i32 = arith.constant 0 : i32
    %c0_i32_0 = arith.constant 0 : i32
    return %arg0, %arg1, %c0_i32 : i32, i32, i32
  }
  func.func @transform_2(%arg0: i32, %arg1: i32) -> (i32, i32, i32) {
    %c0_i32 = arith.constant 0 : i32
    %c0_i32_0 = arith.constant 0 : i32
    %c0_i32_1 = arith.constant 0 : i32
    return %arg0, %c0_i32, %c0_i32_0 : i32, i32, i32
  }
  func.func @transform_3(%arg0: i32, %arg1: i32) -> (i32, i32, i32) {
    %c0_i32 = arith.constant 0 : i32
    %c0_i32_0 = arith.constant 0 : i32
    %c0_i32_1 = arith.constant 0 : i32
    return %arg0, %c0_i32, %c0_i32_0 : i32, i32, i32
  }
  func.func @transform_4(%arg0: i32, %arg1: i32) -> (i32, i32, i32) {
    %c0_i32 = arith.constant 0 : i32
    %c0_i32_0 = arith.constant 0 : i32
    %c0_i32_1 = arith.constant 0 : i32
    return %arg0, %c0_i32, %c0_i32_0 : i32, i32, i32
  }
}

module attributes {stable_mosaic.version = 11 : i64} {
  func.func @_conv_fused_kernel(%arg0: i32, %arg1: i32, %arg2: memref<32x384xbf16, #tpu.memory_space<vmem>>, %arg3: memref<1x384x128xbf16, #tpu.memory_space<vmem>>, %arg4: memref<1x32x1xf32, #tpu.memory_space<vmem>>, %arg5: memref<1x32x1xf32, #tpu.memory_space<vmem>>, %arg6: memref<1x32x128xf32, #tpu.memory_space<vmem>>, %arg7: memref<32x128xf32, #tpu.memory_space<vmem>>) attributes {dimension_semantics = [#tpu.dimension_semantics<parallel>, #tpu.dimension_semantics<arbitrary>], iteration_bounds = array<i64: 2, 1>, scalar_prefetch = 0 : i64, scratch_operands = 1 : i64, tpu.core_type = #tpu.core_type<tc>, window_params = [{transform_indices = @transform_0, window_bounds = array<i64: 32, 384>}, {transform_indices = @transform_1, window_bounds = array<i64: 1, 384, 128>}, {transform_indices = @transform_2, window_bounds = array<i64: 1, 32, 1>}, {transform_indices = @transform_3, window_bounds = array<i64: 1, 32, 1>}, {transform_indices = @transform_4, window_bounds = array<i64: 1, 32, 128>}]} {
    %c0_i32 = arith.constant 0 : i32
    %0 = arith.cmpi eq, %arg1, %c0_i32 : i32
    %1 = arith.extui %0 : i1 to i32
    %c0_i32_0 = arith.constant 0 : i32
    %2 = arith.cmpi ne, %1, %c0_i32_0 : i32
    scf.if %2 {
      %cst_11 = arith.constant 0.000000e+00 : f32
      %13 = vector.broadcast %cst_11 : f32 to vector<32x128xf32>
      %c0_12 = arith.constant 0 : index
      %c0_13 = arith.constant 0 : index
      %14 = vector.load %arg7[%c0_12, %c0_13] : memref<32x128xf32, #tpu.memory_space<vmem>>, vector<32x128xf32>
      tpu.vector_store %arg7[%c0_12, %c0_13], %13 {strides = array<i32>} : memref<32x128xf32, #tpu.memory_space<vmem>>, vector<32x128xf32>,
    } else {
    }
    %c0 = arith.constant 0 : index
    %c0_1 = arith.constant 0 : index
    %3 = vector.load %arg7[%c0, %c0_1] : memref<32x128xf32, #tpu.memory_space<vmem>>, vector<32x128xf32>
    %c0_2 = arith.constant 0 : index
    %c0_3 = arith.constant 0 : index
    %4 = vector.load %arg2[%c0_2, %c0_3] : memref<32x384xbf16, #tpu.memory_space<vmem>>, vector<32x384xbf16>
    %c0_4 = arith.constant 0 : index
    %c0_5 = arith.constant 0 : index
    %c0_6 = arith.constant 0 : index
    %5 = vector.load %arg3[%c0_4, %c0_5, %c0_6] : memref<1x384x128xbf16, #tpu.memory_space<vmem>>, vector<1x384x128xbf16>
    %6 = vector.shape_cast %5 : vector<1x384x128xbf16> to vector<384x128xbf16>
    %cst = arith.constant dense<0.000000e+00> : vector<32x128xf32>
    %7 = tpu.matmul %4, %6, %cst {dimension_numbers = #tpu.dot_dimension_numbers<[1], [0], [0], [1], [0, 0, 1, 1], [], []>} : vector<32x384xbf16>, vector<384x128xbf16>, vector<32x128xf32> -> vector<32x128xf32>
    %8 = arith.addf %3, %7 : vector<32x128xf32>
    %c0_7 = arith.constant 0 : index
    %c0_8 = arith.constant 0 : index
    %9 = vector.load %arg7[%c0_7, %c0_8] : memref<32x128xf32, #tpu.memory_space<vmem>>, vector<32x128xf32>
    tpu.vector_store %arg7[%c0_7, %c0_8], %8 {strides = array<i32>} : memref<32x128xf32, #tpu.memory_space<vmem>>, vector<32x128xf32>,
    %c0_i32_9 = arith.constant 0 : i32
    %10 = arith.cmpi eq, %arg1, %c0_i32_9 : i32
    %11 = arith.extui %10 : i1 to i32
    %c0_i32_10 = arith.constant 0 : i32
    %12 = arith.cmpi ne, %11, %c0_i32_10 : i32
    scf.if %12 {
      %c0_11 = arith.constant 0 : index
      %c0_12 = arith.constant 0 : index
      %13 = vector.load %arg7[%c0_11, %c0_12] : memref<32x128xf32, #tpu.memory_space<vmem>>, vector<32x128xf32>
      %cst_13 = arith.constant dense<0.000000e+00> : vector<32xf32>
      %14 = vector.multi_reduction <add>, %13, %cst_13 [1] : vector<32x128xf32> to vector<32xf32>
      %15 = vector.shape_cast %14 : vector<32xf32> to vector<32x1xf32>
      %cst_14 = arith.constant 6.250000e-02 : f32
      %16 = vector.broadcast %cst_14 : f32 to vector<32x1xf32>
      %17 = arith.mulf %15, %16 : vector<32x1xf32>
      %18 = arith.mulf %13, %13 : vector<32x128xf32>
      %cst_15 = arith.constant dense<0.000000e+00> : vector<32xf32>
      %19 = vector.multi_reduction <add>, %18, %cst_15 [1] : vector<32x128xf32> to vector<32xf32>
      %20 = vector.shape_cast %19 : vector<32xf32> to vector<32x1xf32>
      %cst_16 = arith.constant 6.250000e-02 : f32
      %21 = vector.broadcast %cst_16 : f32 to vector<32x1xf32>
      %22 = arith.mulf %20, %21 : vector<32x1xf32>
      %23 = arith.mulf %17, %17 : vector<32x1xf32>
      %24 = arith.subf %22, %23 : vector<32x1xf32>
      %cst_17 = arith.constant 0.000000e+00 : f32
      %25 = vector.broadcast %cst_17 : f32 to vector<32x1xf32>
      %26 = arith.maximumf %24, %25 : vector<32x1xf32>
      %27 = vector.broadcast %17 : vector<32x1xf32> to vector<32x128xf32>
      %28 = arith.subf %13, %27 : vector<32x128xf32>
      %cst_18 = arith.constant 9.99999974E-6 : f32
      %29 = vector.broadcast %cst_18 : f32 to vector<32x1xf32>
      %30 = arith.addf %26, %29 : vector<32x1xf32>
      %31 = math.rsqrt %30 : vector<32x1xf32>
      %32 = vector.broadcast %31 : vector<32x1xf32> to vector<32x128xf32>
      %33 = arith.mulf %28, %32 : vector<32x128xf32>
      %c0_19 = arith.constant 0 : index
      %c0_20 = arith.constant 0 : index
      %c0_21 = arith.constant 0 : index
      %34 = vector.load %arg4[%c0_19, %c0_20, %c0_21] : memref<1x32x1xf32, #tpu.memory_space<vmem>>, vector<1x32x1xf32>
      %35 = vector.shape_cast %34 : vector<1x32x1xf32> to vector<32x1xf32>
      %36 = vector.broadcast %35 : vector<32x1xf32> to vector<32x128xf32>
      %37 = arith.mulf %33, %36 : vector<32x128xf32>
      %c0_22 = arith.constant 0 : index
      %c0_23 = arith.constant 0 : index
      %c0_24 = arith.constant 0 : index
      %38 = vector.load %arg5[%c0_22, %c0_23, %c0_24] : memref<1x32x1xf32, #tpu.memory_space<vmem>>, vector<1x32x1xf32>
      %39 = vector.shape_cast %38 : vector<1x32x1xf32> to vector<32x1xf32>
      %40 = vector.broadcast %39 : vector<32x1xf32> to vector<32x128xf32>
      %41 = arith.addf %37, %40 : vector<32x128xf32>
      %c0_25 = arith.constant 0 : index
      %c0_26 = arith.constant 0 : index
      %c0_27 = arith.constant 0 : index
      %42 = vector.load %arg6[%c0_25, %c0_26, %c0_27] : memref<1x32x128xf32, #tpu.memory_space<vmem>>, vector<1x32x128xf32>
      %43 = vector.shape_cast %42 : vector<1x32x128xf32> to vector<32x128xf32>
      %44 = vector.shape_cast %41 : vector<32x128xf32> to vector<1x32x128xf32>
      tpu.vector_store %arg6[%c0_25, %c0_26, %c0_27], %44 {strides = array<i32>} : memref<1x32x128xf32, #tpu.memory_space<vmem>>, vector<1x32x128xf32>,
    } else {
    }
    return
  }
  func.func @transform_0(%arg0: i32, %arg1: i32) -> (i32, i32) {
    %c0_i32 = arith.constant 0 : i32
    %c0_i32_0 = arith.constant 0 : i32
    return %c0_i32, %arg1 : i32, i32
  }
  func.func @transform_1(%arg0: i32, %arg1: i32) -> (i32, i32, i32) {
    %c0_i32 = arith.constant 0 : i32
    %c0_i32_0 = arith.constant 0 : i32
    return %arg0, %arg1, %c0_i32 : i32, i32, i32
  }
  func.func @transform_2(%arg0: i32, %arg1: i32) -> (i32, i32, i32) {
    %c0_i32 = arith.constant 0 : i32
    %c0_i32_0 = arith.constant 0 : i32
    %c0_i32_1 = arith.constant 0 : i32
    return %arg0, %c0_i32, %c0_i32_0 : i32, i32, i32
  }
  func.func @transform_3(%arg0: i32, %arg1: i32) -> (i32, i32, i32) {
    %c0_i32 = arith.constant 0 : i32
    %c0_i32_0 = arith.constant 0 : i32
    %c0_i32_1 = arith.constant 0 : i32
    return %arg0, %c0_i32, %c0_i32_0 : i32, i32, i32
  }
  func.func @transform_4(%arg0: i32, %arg1: i32) -> (i32, i32, i32) {
    %c0_i32 = arith.constant 0 : i32
    %c0_i32_0 = arith.constant 0 : i32
    %c0_i32_1 = arith.constant 0 : i32
    return %arg0, %c0_i32, %c0_i32_0 : i32, i32, i32
  }
}

module attributes {stable_mosaic.version = 11 : i64} {
  func.func @_conv_fused_kernel(%arg0: i32, %arg1: i32, %arg2: memref<16x896xbf16, #tpu.memory_space<vmem>>, %arg3: memref<1x896x128xbf16, #tpu.memory_space<vmem>>, %arg4: memref<16x1xf32, #tpu.memory_space<vmem>>, %arg5: memref<16x1xf32, #tpu.memory_space<vmem>>, %arg6: memref<1x16x128xf32, #tpu.memory_space<vmem>>, %arg7: memref<16x128xf32, #tpu.memory_space<vmem>>) attributes {dimension_semantics = [#tpu.dimension_semantics<parallel>, #tpu.dimension_semantics<arbitrary>], iteration_bounds = array<i64: 2, 1>, scalar_prefetch = 0 : i64, scratch_operands = 1 : i64, tpu.core_type = #tpu.core_type<tc>, window_params = [{transform_indices = @transform_0, window_bounds = array<i64: 16, 896>}, {transform_indices = @transform_1, window_bounds = array<i64: 1, 896, 128>}, {pipeline_mode = #tpu.pipeline_mode<synchronous>, transform_indices = @transform_2, window_bounds = array<i64: 16, 1>}, {pipeline_mode = #tpu.pipeline_mode<synchronous>, transform_indices = @transform_3, window_bounds = array<i64: 16, 1>}, {transform_indices = @transform_4, window_bounds = array<i64: 1, 16, 128>}]} {
    %c0_i32 = arith.constant 0 : i32
    %0 = arith.cmpi eq, %arg1, %c0_i32 : i32
    %1 = arith.extui %0 : i1 to i32
    %c0_i32_0 = arith.constant 0 : i32
    %2 = arith.cmpi ne, %1, %c0_i32_0 : i32
    scf.if %2 {
      %cst_11 = arith.constant 0.000000e+00 : f32
      %13 = vector.broadcast %cst_11 : f32 to vector<16x128xf32>
      %c0_12 = arith.constant 0 : index
      %c0_13 = arith.constant 0 : index
      %14 = vector.load %arg7[%c0_12, %c0_13] : memref<16x128xf32, #tpu.memory_space<vmem>>, vector<16x128xf32>
      tpu.vector_store %arg7[%c0_12, %c0_13], %13 {strides = array<i32>} : memref<16x128xf32, #tpu.memory_space<vmem>>, vector<16x128xf32>,
    } else {
    }
    %c0 = arith.constant 0 : index
    %c0_1 = arith.constant 0 : index
    %3 = vector.load %arg7[%c0, %c0_1] : memref<16x128xf32, #tpu.memory_space<vmem>>, vector<16x128xf32>
    %c0_2 = arith.constant 0 : index
    %c0_3 = arith.constant 0 : index
    %4 = vector.load %arg2[%c0_2, %c0_3] : memref<16x896xbf16, #tpu.memory_space<vmem>>, vector<16x896xbf16>
    %c0_4 = arith.constant 0 : index
    %c0_5 = arith.constant 0 : index
    %c0_6 = arith.constant 0 : index
    %5 = vector.load %arg3[%c0_4, %c0_5, %c0_6] : memref<1x896x128xbf16, #tpu.memory_space<vmem>>, vector<1x896x128xbf16>
    %6 = vector.shape_cast %5 : vector<1x896x128xbf16> to vector<896x128xbf16>
    %cst = arith.constant dense<0.000000e+00> : vector<16x128xf32>
    %7 = tpu.matmul %4, %6, %cst {dimension_numbers = #tpu.dot_dimension_numbers<[1], [0], [0], [1], [0, 0, 1, 1], [], []>} : vector<16x896xbf16>, vector<896x128xbf16>, vector<16x128xf32> -> vector<16x128xf32>
    %8 = arith.addf %3, %7 : vector<16x128xf32>
    %c0_7 = arith.constant 0 : index
    %c0_8 = arith.constant 0 : index
    %9 = vector.load %arg7[%c0_7, %c0_8] : memref<16x128xf32, #tpu.memory_space<vmem>>, vector<16x128xf32>
    tpu.vector_store %arg7[%c0_7, %c0_8], %8 {strides = array<i32>} : memref<16x128xf32, #tpu.memory_space<vmem>>, vector<16x128xf32>,
    %c0_i32_9 = arith.constant 0 : i32
    %10 = arith.cmpi eq, %arg1, %c0_i32_9 : i32
    %11 = arith.extui %10 : i1 to i32
    %c0_i32_10 = arith.constant 0 : i32
    %12 = arith.cmpi ne, %11, %c0_i32_10 : i32
    scf.if %12 {
      %c0_11 = arith.constant 0 : index
      %c0_12 = arith.constant 0 : index
      %13 = vector.load %arg7[%c0_11, %c0_12] : memref<16x128xf32, #tpu.memory_space<vmem>>, vector<16x128xf32>
      %cst_13 = arith.constant dense<0.000000e+00> : vector<16xf32>
      %14 = vector.multi_reduction <add>, %13, %cst_13 [1] : vector<16x128xf32> to vector<16xf32>
      %15 = vector.shape_cast %14 : vector<16xf32> to vector<16x1xf32>
      %16 = arith.mulf %13, %13 : vector<16x128xf32>
      %cst_14 = arith.constant dense<0.000000e+00> : vector<16xf32>
      %17 = vector.multi_reduction <add>, %16, %cst_14 [1] : vector<16x128xf32> to vector<16xf32>
      %18 = vector.shape_cast %17 : vector<16xf32> to vector<16x1xf32>
      %cst_15 = arith.constant dense<0.000000e+00> : vector<1xf32>
      %19 = vector.multi_reduction <add>, %15, %cst_15 [0] : vector<16x1xf32> to vector<1xf32>
      %20 = vector.shape_cast %19 : vector<1xf32> to vector<1x1xf32>
      %cst_16 = arith.constant 9.765625E-4 : f32
      %21 = vector.broadcast %cst_16 : f32 to vector<1x1xf32>
      %22 = arith.mulf %20, %21 : vector<1x1xf32>
      %cst_17 = arith.constant dense<0.000000e+00> : vector<1xf32>
      %23 = vector.multi_reduction <add>, %18, %cst_17 [0] : vector<16x1xf32> to vector<1xf32>
      %24 = vector.shape_cast %23 : vector<1xf32> to vector<1x1xf32>
      %cst_18 = arith.constant 9.765625E-4 : f32
      %25 = vector.broadcast %cst_18 : f32 to vector<1x1xf32>
      %26 = arith.mulf %24, %25 : vector<1x1xf32>
      %27 = arith.mulf %22, %22 : vector<1x1xf32>
      %28 = arith.subf %26, %27 : vector<1x1xf32>
      %cst_19 = arith.constant 0.000000e+00 : f32
      %29 = vector.broadcast %cst_19 : f32 to vector<1x1xf32>
      %30 = arith.maximumf %28, %29 : vector<1x1xf32>
      %cst_20 = arith.constant 1.00097752 : f32
      %31 = vector.broadcast %cst_20 : f32 to vector<1x1xf32>
      %32 = arith.mulf %30, %31 : vector<1x1xf32>
      %33 = math.sqrt %32 : vector<1x1xf32>
      %34 = vector.broadcast %22 : vector<1x1xf32> to vector<16x128xf32>
      %35 = arith.subf %13, %34 : vector<16x128xf32>
      %cst_21 = arith.constant 9.99999974E-6 : f32
      %36 = vector.broadcast %cst_21 : f32 to vector<1x1xf32>
      %37 = arith.addf %33, %36 : vector<1x1xf32>
      %38 = vector.broadcast %37 : vector<1x1xf32> to vector<16x128xf32>
      %39 = arith.divf %35, %38 : vector<16x128xf32>
      %c0_22 = arith.constant 0 : index
      %c0_23 = arith.constant 0 : index
      %40 = vector.load %arg4[%c0_22, %c0_23] : memref<16x1xf32, #tpu.memory_space<vmem>>, vector<16x1xf32>
      %41 = vector.broadcast %40 : vector<16x1xf32> to vector<16x128xf32>
      %42 = arith.mulf %39, %41 : vector<16x128xf32>
      %c0_24 = arith.constant 0 : index
      %c0_25 = arith.constant 0 : index
      %43 = vector.load %arg5[%c0_24, %c0_25] : memref<16x1xf32, #tpu.memory_space<vmem>>, vector<16x1xf32>
      %44 = vector.broadcast %43 : vector<16x1xf32> to vector<16x128xf32>
      %45 = arith.addf %42, %44 : vector<16x128xf32>
      %cst_26 = arith.constant 0.000000e+00 : f32
      %46 = vector.broadcast %cst_26 : f32 to vector<16x128xf32>
      %47 = arith.maximumf %45, %46 : vector<16x128xf32>
      %c0_27 = arith.constant 0 : index
      %c0_28 = arith.constant 0 : index
      %c0_29 = arith.constant 0 : index
      %48 = vector.load %arg6[%c0_27, %c0_28, %c0_29] : memref<1x16x128xf32, #tpu.memory_space<vmem>>, vector<1x16x128xf32>
      %49 = vector.shape_cast %48 : vector<1x16x128xf32> to vector<16x128xf32>
      %50 = vector.shape_cast %47 : vector<16x128xf32> to vector<1x16x128xf32>
      tpu.vector_store %arg6[%c0_27, %c0_28, %c0_29], %50 {strides = array<i32>} : memref<1x16x128xf32, #tpu.memory_space<vmem>>, vector<1x16x128xf32>,
    } else {
    }
    return
  }
  func.func @transform_0(%arg0: i32, %arg1: i32) -> (i32, i32) {
    %c0_i32 = arith.constant 0 : i32
    %c0_i32_0 = arith.constant 0 : i32
    return %c0_i32, %arg1 : i32, i32
  }
  func.func @transform_1(%arg0: i32, %arg1: i32) -> (i32, i32, i32) {
    %c0_i32 = arith.constant 0 : i32
    %c0_i32_0 = arith.constant 0 : i32
    return %arg0, %arg1, %c0_i32 : i32, i32, i32
  }
  func.func @transform_2(%arg0: i32, %arg1: i32) -> (i32, i32) {
    %c0_i32 = arith.constant 0 : i32
    %c0_i32_0 = arith.constant 0 : i32
    %c0_i32_1 = arith.constant 0 : i32
    return %c0_i32, %c0_i32_0 : i32, i32
  }
  func.func @transform_3(%arg0: i32, %arg1: i32) -> (i32, i32) {
    %c0_i32 = arith.constant 0 : i32
    %c0_i32_0 = arith.constant 0 : i32
    %c0_i32_1 = arith.constant 0 : i32
    return %c0_i32, %c0_i32_0 : i32, i32
  }
  func.func @transform_4(%arg0: i32, %arg1: i32) -> (i32, i32, i32) {
    %c0_i32 = arith.constant 0 : i32
    %c0_i32_0 = arith.constant 0 : i32
    %c0_i32_1 = arith.constant 0 : i32
    return %arg0, %c0_i32, %c0_i32_0 : i32, i32, i32
  }
}

module attributes {stable_mosaic.version = 11 : i64} {
  func.func @_conv_fused_kernel(%arg0: i32, %arg1: i32, %arg2: memref<16x512xbf16, #tpu.memory_space<vmem>>, %arg3: memref<1x512x256xbf16, #tpu.memory_space<vmem>>, %arg4: memref<16x1xf32, #tpu.memory_space<vmem>>, %arg5: memref<16x1xf32, #tpu.memory_space<vmem>>, %arg6: memref<1x16x256xf32, #tpu.memory_space<vmem>>, %arg7: memref<16x256xf32, #tpu.memory_space<vmem>>) attributes {dimension_semantics = [#tpu.dimension_semantics<parallel>, #tpu.dimension_semantics<arbitrary>], iteration_bounds = array<i64: 2, 1>, scalar_prefetch = 0 : i64, scratch_operands = 1 : i64, tpu.core_type = #tpu.core_type<tc>, window_params = [{transform_indices = @transform_0, window_bounds = array<i64: 16, 512>}, {transform_indices = @transform_1, window_bounds = array<i64: 1, 512, 256>}, {pipeline_mode = #tpu.pipeline_mode<synchronous>, transform_indices = @transform_2, window_bounds = array<i64: 16, 1>}, {pipeline_mode = #tpu.pipeline_mode<synchronous>, transform_indices = @transform_3, window_bounds = array<i64: 16, 1>}, {transform_indices = @transform_4, window_bounds = array<i64: 1, 16, 256>}]} {
    %c0_i32 = arith.constant 0 : i32
    %0 = arith.cmpi eq, %arg1, %c0_i32 : i32
    %1 = arith.extui %0 : i1 to i32
    %c0_i32_0 = arith.constant 0 : i32
    %2 = arith.cmpi ne, %1, %c0_i32_0 : i32
    scf.if %2 {
      %cst_11 = arith.constant 0.000000e+00 : f32
      %13 = vector.broadcast %cst_11 : f32 to vector<16x256xf32>
      %c0_12 = arith.constant 0 : index
      %c0_13 = arith.constant 0 : index
      %14 = vector.load %arg7[%c0_12, %c0_13] : memref<16x256xf32, #tpu.memory_space<vmem>>, vector<16x256xf32>
      tpu.vector_store %arg7[%c0_12, %c0_13], %13 {strides = array<i32>} : memref<16x256xf32, #tpu.memory_space<vmem>>, vector<16x256xf32>,
    } else {
    }
    %c0 = arith.constant 0 : index
    %c0_1 = arith.constant 0 : index
    %3 = vector.load %arg7[%c0, %c0_1] : memref<16x256xf32, #tpu.memory_space<vmem>>, vector<16x256xf32>
    %c0_2 = arith.constant 0 : index
    %c0_3 = arith.constant 0 : index
    %4 = vector.load %arg2[%c0_2, %c0_3] : memref<16x512xbf16, #tpu.memory_space<vmem>>, vector<16x512xbf16>
    %c0_4 = arith.constant 0 : index
    %c0_5 = arith.constant 0 : index
    %c0_6 = arith.constant 0 : index
    %5 = vector.load %arg3[%c0_4, %c0_5, %c0_6] : memref<1x512x256xbf16, #tpu.memory_space<vmem>>, vector<1x512x256xbf16>
    %6 = vector.shape_cast %5 : vector<1x512x256xbf16> to vector<512x256xbf16>
    %cst = arith.constant dense<0.000000e+00> : vector<16x256xf32>
    %7 = tpu.matmul %4, %6, %cst {dimension_numbers = #tpu.dot_dimension_numbers<[1], [0], [0], [1], [0, 0, 1, 1], [], []>} : vector<16x512xbf16>, vector<512x256xbf16>, vector<16x256xf32> -> vector<16x256xf32>
    %8 = arith.addf %3, %7 : vector<16x256xf32>
    %c0_7 = arith.constant 0 : index
    %c0_8 = arith.constant 0 : index
    %9 = vector.load %arg7[%c0_7, %c0_8] : memref<16x256xf32, #tpu.memory_space<vmem>>, vector<16x256xf32>
    tpu.vector_store %arg7[%c0_7, %c0_8], %8 {strides = array<i32>} : memref<16x256xf32, #tpu.memory_space<vmem>>, vector<16x256xf32>,
    %c0_i32_9 = arith.constant 0 : i32
    %10 = arith.cmpi eq, %arg1, %c0_i32_9 : i32
    %11 = arith.extui %10 : i1 to i32
    %c0_i32_10 = arith.constant 0 : i32
    %12 = arith.cmpi ne, %11, %c0_i32_10 : i32
    scf.if %12 {
      %c0_11 = arith.constant 0 : index
      %c0_12 = arith.constant 0 : index
      %13 = vector.load %arg7[%c0_11, %c0_12] : memref<16x256xf32, #tpu.memory_space<vmem>>, vector<16x256xf32>
      %cst_13 = arith.constant dense<0.000000e+00> : vector<16xf32>
      %14 = vector.multi_reduction <add>, %13, %cst_13 [1] : vector<16x256xf32> to vector<16xf32>
      %15 = vector.shape_cast %14 : vector<16xf32> to vector<16x1xf32>
      %16 = arith.mulf %13, %13 : vector<16x256xf32>
      %cst_14 = arith.constant dense<0.000000e+00> : vector<16xf32>
      %17 = vector.multi_reduction <add>, %16, %cst_14 [1] : vector<16x256xf32> to vector<16xf32>
      %18 = vector.shape_cast %17 : vector<16xf32> to vector<16x1xf32>
      %cst_15 = arith.constant dense<0.000000e+00> : vector<1xf32>
      %19 = vector.multi_reduction <add>, %15, %cst_15 [0] : vector<16x1xf32> to vector<1xf32>
      %20 = vector.shape_cast %19 : vector<1xf32> to vector<1x1xf32>
      %cst_16 = arith.constant 4.8828125E-4 : f32
      %21 = vector.broadcast %cst_16 : f32 to vector<1x1xf32>
      %22 = arith.mulf %20, %21 : vector<1x1xf32>
      %cst_17 = arith.constant dense<0.000000e+00> : vector<1xf32>
      %23 = vector.multi_reduction <add>, %18, %cst_17 [0] : vector<16x1xf32> to vector<1xf32>
      %24 = vector.shape_cast %23 : vector<1xf32> to vector<1x1xf32>
      %cst_18 = arith.constant 4.8828125E-4 : f32
      %25 = vector.broadcast %cst_18 : f32 to vector<1x1xf32>
      %26 = arith.mulf %24, %25 : vector<1x1xf32>
      %27 = arith.mulf %22, %22 : vector<1x1xf32>
      %28 = arith.subf %26, %27 : vector<1x1xf32>
      %cst_19 = arith.constant 0.000000e+00 : f32
      %29 = vector.broadcast %cst_19 : f32 to vector<1x1xf32>
      %30 = arith.maximumf %28, %29 : vector<1x1xf32>
      %cst_20 = arith.constant 1.00048852 : f32
      %31 = vector.broadcast %cst_20 : f32 to vector<1x1xf32>
      %32 = arith.mulf %30, %31 : vector<1x1xf32>
      %33 = math.sqrt %32 : vector<1x1xf32>
      %34 = vector.broadcast %22 : vector<1x1xf32> to vector<16x256xf32>
      %35 = arith.subf %13, %34 : vector<16x256xf32>
      %cst_21 = arith.constant 9.99999974E-6 : f32
      %36 = vector.broadcast %cst_21 : f32 to vector<1x1xf32>
      %37 = arith.addf %33, %36 : vector<1x1xf32>
      %38 = vector.broadcast %37 : vector<1x1xf32> to vector<16x256xf32>
      %39 = arith.divf %35, %38 : vector<16x256xf32>
      %c0_22 = arith.constant 0 : index
      %c0_23 = arith.constant 0 : index
      %40 = vector.load %arg4[%c0_22, %c0_23] : memref<16x1xf32, #tpu.memory_space<vmem>>, vector<16x1xf32>
      %41 = vector.broadcast %40 : vector<16x1xf32> to vector<16x256xf32>
      %42 = arith.mulf %39, %41 : vector<16x256xf32>
      %c0_24 = arith.constant 0 : index
      %c0_25 = arith.constant 0 : index
      %43 = vector.load %arg5[%c0_24, %c0_25] : memref<16x1xf32, #tpu.memory_space<vmem>>, vector<16x1xf32>
      %44 = vector.broadcast %43 : vector<16x1xf32> to vector<16x256xf32>
      %45 = arith.addf %42, %44 : vector<16x256xf32>
      %cst_26 = arith.constant 0.000000e+00 : f32
      %46 = vector.broadcast %cst_26 : f32 to vector<16x256xf32>
      %47 = arith.maximumf %45, %46 : vector<16x256xf32>
      %c0_27 = arith.constant 0 : index
      %c0_28 = arith.constant 0 : index
      %c0_29 = arith.constant 0 : index
      %48 = vector.load %arg6[%c0_27, %c0_28, %c0_29] : memref<1x16x256xf32, #tpu.memory_space<vmem>>, vector<1x16x256xf32>
      %49 = vector.shape_cast %48 : vector<1x16x256xf32> to vector<16x256xf32>
      %50 = vector.shape_cast %47 : vector<16x256xf32> to vector<1x16x256xf32>
      tpu.vector_store %arg6[%c0_27, %c0_28, %c0_29], %50 {strides = array<i32>} : memref<1x16x256xf32, #tpu.memory_space<vmem>>, vector<1x16x256xf32>,
    } else {
    }
    return
  }
  func.func @transform_0(%arg0: i32, %arg1: i32) -> (i32, i32) {
    %c0_i32 = arith.constant 0 : i32
    %c0_i32_0 = arith.constant 0 : i32
    return %c0_i32, %arg1 : i32, i32
  }
  func.func @transform_1(%arg0: i32, %arg1: i32) -> (i32, i32, i32) {
    %c0_i32 = arith.constant 0 : i32
    %c0_i32_0 = arith.constant 0 : i32
    return %arg0, %arg1, %c0_i32 : i32, i32, i32
  }
  func.func @transform_2(%arg0: i32, %arg1: i32) -> (i32, i32) {
    %c0_i32 = arith.constant 0 : i32
    %c0_i32_0 = arith.constant 0 : i32
    %c0_i32_1 = arith.constant 0 : i32
    return %c0_i32, %c0_i32_0 : i32, i32
  }
  func.func @transform_3(%arg0: i32, %arg1: i32) -> (i32, i32) {
    %c0_i32 = arith.constant 0 : i32
    %c0_i32_0 = arith.constant 0 : i32
    %c0_i32_1 = arith.constant 0 : i32
    return %c0_i32, %c0_i32_0 : i32, i32
  }
  func.func @transform_4(%arg0: i32, %arg1: i32) -> (i32, i32, i32) {
    %c0_i32 = arith.constant 0 : i32
    %c0_i32_0 = arith.constant 0 : i32
    %c0_i32_1 = arith.constant 0 : i32
    return %arg0, %c0_i32, %c0_i32_0 : i32, i32, i32
  }
}

module attributes {stable_mosaic.version = 11 : i64} {
  func.func @_conv_fused_kernel(%arg0: i32, %arg1: i32, %arg2: memref<16x512xbf16, #tpu.memory_space<vmem>>, %arg3: memref<1x512x256xbf16, #tpu.memory_space<vmem>>, %arg4: memref<1x16x256xf32, #tpu.memory_space<vmem>>, %arg5: memref<16x256xf32, #tpu.memory_space<vmem>>) attributes {dimension_semantics = [#tpu.dimension_semantics<parallel>, #tpu.dimension_semantics<arbitrary>], iteration_bounds = array<i64: 2, 1>, scalar_prefetch = 0 : i64, scratch_operands = 1 : i64, tpu.core_type = #tpu.core_type<tc>, window_params = [{transform_indices = @transform_0, window_bounds = array<i64: 16, 512>}, {transform_indices = @transform_1, window_bounds = array<i64: 1, 512, 256>}, {transform_indices = @transform_2, window_bounds = array<i64: 1, 16, 256>}]} {
    %c0_i32 = arith.constant 0 : i32
    %0 = arith.cmpi eq, %arg1, %c0_i32 : i32
    %1 = arith.extui %0 : i1 to i32
    %c0_i32_0 = arith.constant 0 : i32
    %2 = arith.cmpi ne, %1, %c0_i32_0 : i32
    scf.if %2 {
      %cst_11 = arith.constant 0.000000e+00 : f32
      %13 = vector.broadcast %cst_11 : f32 to vector<16x256xf32>
      %c0_12 = arith.constant 0 : index
      %c0_13 = arith.constant 0 : index
      %14 = vector.load %arg5[%c0_12, %c0_13] : memref<16x256xf32, #tpu.memory_space<vmem>>, vector<16x256xf32>
      tpu.vector_store %arg5[%c0_12, %c0_13], %13 {strides = array<i32>} : memref<16x256xf32, #tpu.memory_space<vmem>>, vector<16x256xf32>,
    } else {
    }
    %c0 = arith.constant 0 : index
    %c0_1 = arith.constant 0 : index
    %3 = vector.load %arg5[%c0, %c0_1] : memref<16x256xf32, #tpu.memory_space<vmem>>, vector<16x256xf32>
    %c0_2 = arith.constant 0 : index
    %c0_3 = arith.constant 0 : index
    %4 = vector.load %arg2[%c0_2, %c0_3] : memref<16x512xbf16, #tpu.memory_space<vmem>>, vector<16x512xbf16>
    %c0_4 = arith.constant 0 : index
    %c0_5 = arith.constant 0 : index
    %c0_6 = arith.constant 0 : index
    %5 = vector.load %arg3[%c0_4, %c0_5, %c0_6] : memref<1x512x256xbf16, #tpu.memory_space<vmem>>, vector<1x512x256xbf16>
    %6 = vector.shape_cast %5 : vector<1x512x256xbf16> to vector<512x256xbf16>
    %cst = arith.constant dense<0.000000e+00> : vector<16x256xf32>
    %7 = tpu.matmul %4, %6, %cst {dimension_numbers = #tpu.dot_dimension_numbers<[1], [0], [0], [1], [0, 0, 1, 1], [], []>} : vector<16x512xbf16>, vector<512x256xbf16>, vector<16x256xf32> -> vector<16x256xf32>
    %8 = arith.addf %3, %7 : vector<16x256xf32>
    %c0_7 = arith.constant 0 : index
    %c0_8 = arith.constant 0 : index
    %9 = vector.load %arg5[%c0_7, %c0_8] : memref<16x256xf32, #tpu.memory_space<vmem>>, vector<16x256xf32>
    tpu.vector_store %arg5[%c0_7, %c0_8], %8 {strides = array<i32>} : memref<16x256xf32, #tpu.memory_space<vmem>>, vector<16x256xf32>,
    %c0_i32_9 = arith.constant 0 : i32
    %10 = arith.cmpi eq, %arg1, %c0_i32_9 : i32
    %11 = arith.extui %10 : i1 to i32
    %c0_i32_10 = arith.constant 0 : i32
    %12 = arith.cmpi ne, %11, %c0_i32_10 : i32
    scf.if %12 {
      %c0_11 = arith.constant 0 : index
      %c0_12 = arith.constant 0 : index
      %13 = vector.load %arg5[%c0_11, %c0_12] : memref<16x256xf32, #tpu.memory_space<vmem>>, vector<16x256xf32>
      %14 = math.tanh %13 : vector<16x256xf32>
      %c0_13 = arith.constant 0 : index
      %c0_14 = arith.constant 0 : index
      %c0_15 = arith.constant 0 : index
      %15 = vector.load %arg4[%c0_13, %c0_14, %c0_15] : memref<1x16x256xf32, #tpu.memory_space<vmem>>, vector<1x16x256xf32>
      %16 = vector.shape_cast %15 : vector<1x16x256xf32> to vector<16x256xf32>
      %17 = vector.shape_cast %14 : vector<16x256xf32> to vector<1x16x256xf32>
      tpu.vector_store %arg4[%c0_13, %c0_14, %c0_15], %17 {strides = array<i32>} : memref<1x16x256xf32, #tpu.memory_space<vmem>>, vector<1x16x256xf32>,
    } else {
    }
    return
  }
  func.func @transform_0(%arg0: i32, %arg1: i32) -> (i32, i32) {
    %c0_i32 = arith.constant 0 : i32
    %c0_i32_0 = arith.constant 0 : i32
    return %c0_i32, %arg1 : i32, i32
  }
  func.func @transform_1(%arg0: i32, %arg1: i32) -> (i32, i32, i32) {
    %c0_i32 = arith.constant 0 : i32
    %c0_i32_0 = arith.constant 0 : i32
    return %arg0, %arg1, %c0_i32 : i32, i32, i32
  }
  func.func @transform_2(%arg0: i32, %arg1: i32) -> (i32, i32, i32) {
    %c0_i32 = arith.constant 0 : i32
    %c0_i32_0 = arith.constant 0 : i32
    %c0_i32_1 = arith.constant 0 : i32
    return %arg0, %c0_i32, %c0_i32_0 : i32, i32, i32
  }
}

</mosaic_0001>

<bundles_post_ra>
// kernel: munit_forward.17
= control target key start
LH: loop header
LB: loop body
LE: loop exit
PB: predicated region body
PF: predicated region fallthrough
CT: control target
= control target key end

     0   :  { %s729_s9 = smov 0   ;;  %s731_s10 = smov 0   ;;  %s806_s0 = inlined_call_operand.vmem [shape: bf16[16,256], index: 0, kind: input, shape index: {}]   ;;  %s807_s1 = inlined_call_operand.vmem [shape: bf16[2,256,256], index: 1, kind: input, shape index: {}]   ;;  %s808_s2 = inlined_call_operand.vmem [shape: f32[2,16,256], index: 2, kind: output, shape index: {}]  }
   0x1   :  { %s733_s11 = smov 0  }
   0x2 LB: > { %s24_s12 = sadd.s32 1, %s708_s10  ;;  %p572_p0 = scmp.ge.s32.totalorder %s712_s11, 1  ;;  %s712_s11 = sphi %s733_s11, %s12_s11   ;;  %s708_s10 = sphi %s731_s10, %s810_s10   ;;  %s704_s9 = sphi %s729_s9, %s809_s9  }
   0x3   : > { %p26_p1 = scmp.ge.s32.totalorder %s24_s12, 2  ;;  %p143_p2 = scmp.lt.s32.totalorder %s712_s11, 3 }
   0x5   : > { %s812_s12 = smov (%p26_p1, %s24_s12), 0  ;;  %p144_p3 = pnand %p572_p0, %p143_p2 }
   0x6   : > { %p182_p4 = scmp.lt.s32.totalorder (!%p144_p3), %s704_s9, 1  ;;  %v689_v0 = vld [vmem:[%s806_s0 + $0x4] ss:$8 sps:$4 sm:$0xff] (!%p144_p3)   ;;  %v687_v33 = vld [vmem:[%s806_s0] ss:$8 sps:$4 sm:$0xff] (!%p144_p3)  }
   0x7   : > { %147 = sbr.rel (%p144_p3) target bundleno = 300 (0x12c), region = 28  ;;  %445 = vmatprep.mubr.bf16.mxu0 (!%p144_p3), %v689_v0 }
   0xe   : > { %s814_s9 = smov (!%p182_p4, %s704_s9), 1 }
   0xf   : > { %s613_s15 = sshll.u32 %s814_s9, 8  ;;  %s614_s21 = sshll.u32 %s814_s9, 5 }
  0x10   : > { %s756_s18 = scalar_lea.vmem %s807_s1, %s613_s15  ;;  %s196_s24 = scalar_lea.vmem %s808_s2, %s614_s21 }
  0x11   : > { %v639_v1 = vld [vmem:[%s756_s18 + $0x4] ss:$8 sps:$4 sm:$0xff]   ;;  %v641_v2 = vld [vmem:[%s756_s18] ss:$8 sps:$4 sm:$0xff]   ;;  %v642_v3 = vld [vmem:[%s756_s18 + $0x14] ss:$8 sps:$4 sm:$0xff]  }
  0x12   : > { %413 = vmatprep.subr.bf16.mxu0 %v639_v1  ;;  %v644_v4 = vld [vmem:[%s756_s18 + $0x10] ss:$8 sps:$4 sm:$0xff]   ;;  %v645_v5 = vld [vmem:[%s756_s18 + $0x24] ss:$8 sps:$4 sm:$0xff]   ;;  %v647_v6 = vld [vmem:[%s756_s18 + $0x20] ss:$8 sps:$4 sm:$0xff]  }
  0x13   : > { %414 = vmatpush1.bf16.msra.mxu0 %v641_v2  ;;  %v648_v7 = vld [vmem:[%s756_s18 + $0x34] ss:$8 sps:$4 sm:$0xff]   ;;  %v650_v8 = vld [vmem:[%s756_s18 + $0x30] ss:$8 sps:$4 sm:$0xff]   ;;  %v651_v9 = vld [vmem:[%s756_s18 + $0x44] ss:$8 sps:$4 sm:$0xff]  }
  0x14   : > { %415 = vmatprep.subr.bf16.mxu0 %v642_v3  ;;  %v653_v10 = vld [vmem:[%s756_s18 + $0x40] ss:$8 sps:$4 sm:$0xff]   ;;  %v654_v11 = vld [vmem:[%s756_s18 + $0x54] ss:$8 sps:$4 sm:$0xff]   ;;  %v656_v12 = vld [vmem:[%s756_s18 + $0x50] ss:$8 sps:$4 sm:$0xff]  }
  0x15   : > { %v657_v13 = vld [vmem:[%s756_s18 + $0x64] ss:$8 sps:$4 sm:$0xff]   ;;  %v659_v14 = vld [vmem:[%s756_s18 + $0x60] ss:$8 sps:$4 sm:$0xff]   ;;  %v660_v15 = vld [vmem:[%s756_s18 + $0x74] ss:$8 sps:$4 sm:$0xff]  }
  0x16   : > { %v662_v16 = vld [vmem:[%s756_s18 + $0x70] ss:$8 sps:$4 sm:$0xff]   ;;  %v663_v17 = vld [vmem:[%s756_s18 + $0x84] ss:$8 sps:$4 sm:$0xff]   ;;  %v665_v18 = vld [vmem:[%s756_s18 + $0x80] ss:$8 sps:$4 sm:$0xff]  }
  0x17   : > { %416 = vmatpush1.bf16.msra.mxu0 %v644_v4  ;;  %v666_v19 = vld [vmem:[%s756_s18 + $0x94] ss:$8 sps:$4 sm:$0xff]   ;;  %v668_v20 = vld [vmem:[%s756_s18 + $0x90] ss:$8 sps:$4 sm:$0xff]   ;;  %v669_v21 = vld [vmem:[%s756_s18 + $0xa4] ss:$8 sps:$4 sm:$0xff]  }
  0x18   : > { %417 = vmatprep.subr.bf16.mxu0 %v645_v5  ;;  %v671_v22 = vld [vmem:[%s756_s18 + $0xa0] ss:$8 sps:$4 sm:$0xff]   ;;  %v672_v23 = vld [vmem:[%s756_s18 + $0xb4] ss:$8 sps:$4 sm:$0xff]   ;;  %v674_v24 = vld [vmem:[%s756_s18 + $0xb0] ss:$8 sps:$4 sm:$0xff]  }
  0x19   : > { %v675_v25 = vld [vmem:[%s756_s18 + $0xc4] ss:$8 sps:$4 sm:$0xff]   ;;  %v677_v26 = vld [vmem:[%s756_s18 + $0xc0] ss:$8 sps:$4 sm:$0xff]   ;;  %v678_v27 = vld [vmem:[%s756_s18 + $0xd4] ss:$8 sps:$4 sm:$0xff]  }
  0x1a   : > { %v680_v28 = vld [vmem:[%s756_s18 + $0xd0] ss:$8 sps:$4 sm:$0xff]   ;;  %v681_v29 = vld [vmem:[%s756_s18 + $0xe4] ss:$8 sps:$4 sm:$0xff]   ;;  %v683_v30 = vld [vmem:[%s756_s18 + $0xe0] ss:$8 sps:$4 sm:$0xff]  }
  0x1b   : > { %418 = vmatpush1.bf16.msra.mxu0 %v647_v6  ;;  %v684_v31 = vld [vmem:[%s756_s18 + $0xf4] ss:$8 sps:$4 sm:$0xff]   ;;  %v686_v32 = vld [vmem:[%s756_s18 + $0xf0] ss:$8 sps:$4 sm:$0xff]  }
  0x1c   : > { %419 = vmatprep.subr.bf16.mxu0 %v648_v7 }
  0x1f   : > { %420 = vmatpush1.bf16.msra.mxu0 %v650_v8 }
  0x20   : > { %421 = vmatprep.subr.bf16.mxu0 %v651_v9 }
  0x23   : > { %422 = vmatpush1.bf16.msra.mxu0 %v653_v10 }
  0x24   : > { %423 = vmatprep.subr.bf16.mxu0 %v654_v11 }
  0x27   : > { %424 = vmatpush1.bf16.msra.mxu0 %v656_v12 }
  0x28   : > { %425 = vmatprep.subr.bf16.mxu0 %v657_v13 }
  0x2b   : > { %426 = vmatpush1.bf16.msra.mxu0 %v659_v14 }
  0x2c   : > { %427 = vmatprep.subr.bf16.mxu0 %v660_v15 }
  0x2f   : > { %428 = vmatpush1.bf16.msra.mxu0 %v662_v16 }
  0x30   : > { %429 = vmatprep.subr.bf16.mxu0 %v663_v17 }
  0x33   : > { %430 = vmatpush1.bf16.msra.mxu0 %v665_v18 }
  0x34   : > { %431 = vmatprep.subr.bf16.mxu0 %v666_v19 }
  0x37   : > { %432 = vmatpush1.bf16.msra.mxu0 %v668_v20 }
  0x38   : > { %433 = vmatprep.subr.bf16.mxu0 %v669_v21 }
  0x3b   : > { %434 = vmatpush1.bf16.msra.mxu0 %v671_v22 }
  0x3c   : > { %435 = vmatprep.subr.bf16.mxu0 %v672_v23 }
  0x3f   : > { %436 = vmatpush1.bf16.msra.mxu0 %v674_v24 }
  0x40   : > { %437 = vmatprep.subr.bf16.mxu0 %v675_v25 }
  0x43   : > { %438 = vmatpush1.bf16.msra.mxu0 %v677_v26 }
  0x44   : > { %439 = vmatprep.subr.bf16.mxu0 %v678_v27 }
  0x47   : > { %440 = vmatpush1.bf16.msra.mxu0 %v680_v28 }
  0x48   : > { %441 = vmatprep.subr.bf16.mxu0 %v681_v29 }
  0x4b   : > { %442 = vmatpush1.bf16.msra.mxu0 %v683_v30 }
  0x4c   : > { %443 = vmatprep.subr.bf16.mxu0 %v684_v31 }
  0x4f   : > { %444 = vmatpush1.bf16.msra.mxu0 %v686_v32 }
  0x52   : > { %446 = vmatmul.mubr.bf16.vlgmr.msra.gmra.mrb[0].mxu0 %v687_v33 }
 0x125   : > { %v447_v34 = vpop.f32.mrb[0].mxu0 }
 0x126   : > { %v471_v35 = vmax.f32 %v447_v34, 0.0  ;;  %v449_v36 = vpop.f32.mrb[1].mxu0 }
 0x127   : > { %v472_v37 = vmax.f32 %v449_v36, 0.0  ;;  %v451_v38 = vpop.f32.mrb[2].mxu0 }
 0x128   : > { %475 = vst [vmem:[%s196_s24] sm:$0xff] %v471_v35  ;;  %v473_v39 = vmax.f32 %v451_v38, 0.0  ;;  %v453_v40 = vpop.f32.mrb[3].mxu0 }
 0x129   : > { %476 = vst [vmem:[%s196_s24 + $0x8] sm:$0xff] %v472_v37  ;;  %v474_v41 = vmax.f32 %v453_v40, 0.0 }
 0x12a   : > { %477 = vst [vmem:[%s196_s24 + $0x10] sm:$0xff] %v473_v39 }
 0x12b   : > { %478 = vst [vmem:[%s196_s24 + $0x18] sm:$0xff] %v474_v41 }
 0x12c PF: > { %s12_s11 = sadd.s32 1, %s712_s11   ;;  %s809_s9 = smov %s708_s10 }
 0x12d   : > { %p9_p5 = scmp.ge.s32.totalorder %s12_s11, 4   ;;  %s810_s10 = smov %s812_s12 }
 0x12f   :  { %11 = sbr.rel (!%p9_p5) target bundleno = 2 (0x2), region = 69 }

// kernel: munit_forward.18
= control target key start
LH: loop header
LB: loop body
LE: loop exit
PB: predicated region body
PF: predicated region fallthrough
CT: control target
= control target key end

     0   :  { %s618_s9 = smov 0   ;;  %s620_s10 = smov 0   ;;  %s661_s0 = inlined_call_operand.vmem [shape: bf16[16,256], index: 0, kind: input, shape index: {}]   ;;  %s662_s1 = inlined_call_operand.vmem [shape: bf16[2,256,128], index: 1, kind: input, shape index: {}]   ;;  %s663_s2 = inlined_call_operand.vmem [shape: f32[2,16,128], index: 2, kind: output, shape index: {}]  }
   0x1   :  { %s622_s11 = smov 0  }
   0x2 LB: > { %s24_s12 = sadd.s32 1, %s597_s10  ;;  %p487_p0 = scmp.ge.s32.totalorder %s601_s11, 1  ;;  %s601_s11 = sphi %s622_s11, %s12_s11   ;;  %s597_s10 = sphi %s620_s10, %s665_s10   ;;  %s593_s9 = sphi %s618_s9, %s664_s9  }
   0x3   : > { %p26_p1 = scmp.ge.s32.totalorder %s24_s12, 2  ;;  %p142_p2 = scmp.lt.s32.totalorder %s601_s11, 3 }
   0x5   : > { %s667_s12 = smov (%p26_p1, %s24_s12), 0  ;;  %p143_p3 = pnand %p487_p0, %p142_p2 }
   0x6   : > { %p180_p4 = scmp.lt.s32.totalorder (!%p143_p3), %s593_s9, 1  ;;  %v578_v0 = vld [vmem:[%s661_s0 + $0x4] ss:$8 sps:$4 sm:$0xff] (!%p143_p3)   ;;  %v576_v17 = vld [vmem:[%s661_s0] ss:$8 sps:$4 sm:$0xff] (!%p143_p3)  }
   0x7   : > { %146 = sbr.rel (%p143_p3) target bundleno = 270 (0x10e), region = 28  ;;  %375 = vmatprep.mubr.bf16.mxu0 (!%p143_p3), %v578_v0 }
   0xe   : > { %s669_s9 = smov (!%p180_p4, %s593_s9), 1 }
   0xf   : > { %s512_s15 = sshll.u32 %s669_s9, 7  ;;  %s513_s21 = sshll.u32 %s669_s9, 4 }
  0x10   : > { %s187_s18 = scalar_lea.vmem %s662_s1, %s512_s15  ;;  %s193_s24 = scalar_lea.vmem %s663_s2, %s513_s21 }
  0x11   : > { %v560_v1 = vld [vmem:[%s187_s18 + $0x40] sm:$0xff]   ;;  %v562_v3 = vld [vmem:[%s187_s18 + $0x48] sm:$0xff]   ;;  %v564_v5 = vld [vmem:[%s187_s18 + $0x50] sm:$0xff]  }
  0x12   : > { %v561_v2 = vld [vmem:[%s187_s18] sm:$0xff]   ;;  %514 = vmatprep.subr.bf16.mxu0 %v560_v1  ;;  %v563_v4 = vld [vmem:[%s187_s18 + $0x8] sm:$0xff]   ;;  %v565_v6 = vld [vmem:[%s187_s18 + $0x10] sm:$0xff]  }
  0x13   : > { %515 = vmatpush3.bf16.msra.mxu0 %v561_v2  ;;  %v566_v7 = vld [vmem:[%s187_s18 + $0x58] sm:$0xff]   ;;  %v568_v9 = vld [vmem:[%s187_s18 + $0x60] sm:$0xff]   ;;  %v570_v11 = vld [vmem:[%s187_s18 + $0x68] sm:$0xff]  }
  0x14   : > { %516 = vmatprep.subr.bf16.mxu0 %v562_v3  ;;  %v567_v8 = vld [vmem:[%s187_s18 + $0x18] sm:$0xff]   ;;  %v569_v10 = vld [vmem:[%s187_s18 + $0x20] sm:$0xff]   ;;  %v571_v12 = vld [vmem:[%s187_s18 + $0x28] sm:$0xff]  }
  0x15   : > { %v572_v13 = vld [vmem:[%s187_s18 + $0x70] sm:$0xff]   ;;  %v574_v15 = vld [vmem:[%s187_s18 + $0x78] sm:$0xff]  }
  0x16   : > { %v573_v14 = vld [vmem:[%s187_s18 + $0x30] sm:$0xff]   ;;  %v575_v16 = vld [vmem:[%s187_s18 + $0x38] sm:$0xff]  }
  0x17   : > { %517 = vmatpush3.bf16.msra.mxu0 %v563_v4 }
  0x18   : > { %518 = vmatprep.subr.bf16.mxu0 %v564_v5 }
  0x1b   : > { %519 = vmatpush3.bf16.msra.mxu0 %v565_v6 }
  0x1c   : > { %520 = vmatprep.subr.bf16.mxu0 %v566_v7 }
  0x1f   : > { %521 = vmatpush3.bf16.msra.mxu0 %v567_v8 }
  0x20   : > { %522 = vmatprep.subr.bf16.mxu0 %v568_v9 }
  0x23   : > { %523 = vmatpush3.bf16.msra.mxu0 %v569_v10 }
  0x24   : > { %524 = vmatprep.subr.bf16.mxu0 %v570_v11 }
  0x27   : > { %525 = vmatpush3.bf16.msra.mxu0 %v571_v12 }
  0x28   : > { %526 = vmatprep.subr.bf16.mxu0 %v572_v13 }
  0x2b   : > { %527 = vmatpush3.bf16.msra.mxu0 %v573_v14 }
  0x2c   : > { %528 = vmatprep.subr.bf16.mxu0 %v574_v15 }
  0x2f   : > { %529 = vmatpush3.bf16.msra.mxu0 %v575_v16 }
  0x32   : > { %376 = vmatmul.mubr.bf16.vlgmr.msra.gmra.mrb[0].mxu0 %v576_v17 }
 0x105   : > { %v530_v18 = vpop.f32.mrb[0].mxu0 }
 0x106   : > { %v531_v19 = vpop.f32.mrb[1].mxu0 }
 0x107   : > { %v532_v20 = vadd.f32 %v531_v19, %v530_v18  ;;  %v533_v21 = vpop.f32.mrb[2].mxu0 }
 0x108   : > { %v534_v22 = vpop.f32.mrb[3].mxu0 }
 0x109   : > { %v393_v23 = vmax.f32 %v532_v20, 0.0  ;;  %v535_v24 = vadd.f32 %v534_v22, %v533_v21 }
 0x10b   : > { %395 = vst [vmem:[%s193_s24] sm:$0xff] %v393_v23  ;;  %v394_v25 = vmax.f32 %v535_v24, 0.0 }
 0x10d   : > { %396 = vst [vmem:[%s193_s24 + $0x8] sm:$0xff] %v394_v25 }
 0x10e PF: > { %s12_s11 = sadd.s32 1, %s601_s11   ;;  %s664_s9 = smov %s597_s10 }
 0x10f   : > { %p9_p5 = scmp.ge.s32.totalorder %s12_s11, 4   ;;  %s665_s10 = smov %s667_s12 }
 0x111   :  { %11 = sbr.rel (!%p9_p5) target bundleno = 2 (0x2), region = 69 }

// kernel: munit_forward.19
= control target key start
LH: loop header
LB: loop body
LE: loop exit
PB: predicated region body
PF: predicated region fallthrough
CT: control target
= control target key end

     0   :  { %s841_s9 = smov 0   ;;  %s843_s10 = smov 0   ;;  %s922_s0 = inlined_call_operand.vmem [shape: bf16[32,384], index: 0, kind: input, shape index: {}]   ;;  %s923_s1 = inlined_call_operand.vmem [shape: bf16[2,384,128], index: 1, kind: input, shape index: {}]   ;;  %s924_s2 = inlined_call_operand.vmem [shape: f32[2,32,128], index: 2, kind: output, shape index: {}]  }
   0x1   :  { %s845_s11 = smov 0  }
   0x2 LB: > { %s24_s12 = sadd.s32 1, %s820_s10  ;;  %p650_p0 = scmp.ge.s32.totalorder %s824_s11, 1  ;;  %s824_s11 = sphi %s845_s11, %s12_s11   ;;  %s820_s10 = sphi %s843_s10, %s926_s10   ;;  %s816_s9 = sphi %s841_s9, %s925_s9  }
   0x3   : > { %p26_p1 = scmp.ge.s32.totalorder %s24_s12, 2  ;;  %p142_p2 = scmp.lt.s32.totalorder %s824_s11, 3 }
   0x5   : > { %s928_s12 = smov (%p26_p1, %s24_s12), 0  ;;  %p143_p3 = pnand %p650_p0, %p142_p2 }
   0x6   : > { %p180_p4 = scmp.lt.s32.totalorder (!%p143_p3), %s816_s9, 1  ;;  %v796_v0 = vld [vmem:[%s922_s0 + $0x4] ss:$12 sps:$4 sm:$0xff] (!%p143_p3)   ;;  %v797_v1 = vld [vmem:[%s922_s0 + $0x8] ss:$12 sps:$4 sm:$0xff] (!%p143_p3)  }
   0x7   : > { %146 = sbr.rel (%p143_p3) target bundleno = 281 (0x119), region = 28  ;;  %471 = vmatprep.mubr.bf16.mxu0 (!%p143_p3), %v796_v0  ;;  %741 = vmatprep.mubr.bf16.mxu1 (!%p143_p3), %v797_v1  ;;  %v794_v26 = vld [vmem:[%s922_s0] ss:$12 sps:$4 sm:$0xff] (!%p143_p3)   ;;  %v799_v27 = vld [vmem:[%s922_s0 + $0x1c] ss:$12 sps:$4 sm:$0xff] (!%p143_p3)  }
   0x8   : > { %v798_v28 = vld [vmem:[%s922_s0 + $0x20] ss:$12 sps:$4 sm:$0xff] (!%p143_p3)   ;;  %v801_v29 = vld [vmem:[%s922_s0 + $0x18] ss:$12 sps:$4 sm:$0xff] (!%p143_p3)  }
   0xe   : > { %s930_s9 = smov (!%p180_p4, %s816_s9), 1 }
   0xf   : > { %s745_s17 = smul.u32 192, %s930_s9  ;;  %s686_s29 = sshll.u32 %s930_s9, 5 }
  0x10   : > { %s193_s4 = scalar_lea.vmem %s924_s2, %s686_s29 }
  0x11   : > { %s871_s20 = scalar_lea.vmem %s923_s1, %s745_s17 }
  0x12   : > { %v770_v2 = vld [vmem:[%s871_s20 + $0x40] sm:$0xff]   ;;  %v773_v5 = vld [vmem:[%s871_s20 + $0x48] sm:$0xff]   ;;  %v776_v8 = vld [vmem:[%s871_s20 + $0x50] sm:$0xff]  }
  0x13   : > { %v771_v3 = vld [vmem:[%s871_s20] sm:$0xff]   ;;  %687 = vmatprep.subr.bf16.mxu0 %v770_v2  ;;  %v774_v6 = vld [vmem:[%s871_s20 + $0x8] sm:$0xff]   ;;  %v777_v9 = vld [vmem:[%s871_s20 + $0x10] sm:$0xff]  }
  0x14   : > { %v772_v4 = vld [vmem:[%s871_s20 + $0x80] sm:$0xff]   ;;  %688 = vmatpush3.bf16.msra.mxu0 %v771_v3  ;;  %v775_v7 = vld [vmem:[%s871_s20 + $0x88] sm:$0xff]   ;;  %v778_v10 = vld [vmem:[%s871_s20 + $0x90] sm:$0xff]  }
  0x15   : > { %725 = vmatprep.subr.bf16.mxu1 %v772_v4  ;;  %689 = vmatprep.subr.bf16.mxu0 %v773_v5  ;;  %v779_v11 = vld [vmem:[%s871_s20 + $0x58] sm:$0xff]   ;;  %v782_v14 = vld [vmem:[%s871_s20 + $0x60] sm:$0xff]   ;;  %v785_v17 = vld [vmem:[%s871_s20 + $0x68] sm:$0xff]  }
  0x16   : > { %726 = vmatpush3.bf16.msra.mxu1 %v772_v4  ;;  %v780_v12 = vld [vmem:[%s871_s20 + $0x18] sm:$0xff]   ;;  %v784_v15 = vld [vmem:[%s871_s20 + $0xa0] sm:$0xff]   ;;  %v787_v18 = vld [vmem:[%s871_s20 + $0xa8] sm:$0xff]  }
  0x17   : > { %727 = vmatprep.subr.bf16.mxu1 %v775_v7  ;;  %v781_v13 = vld [vmem:[%s871_s20 + $0x98] sm:$0xff]   ;;  %v783_v16 = vld [vmem:[%s871_s20 + $0x20] sm:$0xff]   ;;  %v786_v19 = vld [vmem:[%s871_s20 + $0x28] sm:$0xff]  }
  0x18   : > { %690 = vmatpush3.bf16.msra.mxu0 %v774_v6  ;;  %v788_v20 = vld [vmem:[%s871_s20 + $0x70] sm:$0xff]   ;;  %v791_v23 = vld [vmem:[%s871_s20 + $0x78] sm:$0xff]  }
  0x19   : > { %691 = vmatprep.subr.bf16.mxu0 %v776_v8  ;;  %v790_v21 = vld [vmem:[%s871_s20 + $0xb0] sm:$0xff]   ;;  %v793_v24 = vld [vmem:[%s871_s20 + $0xb8] sm:$0xff]  }
  0x1a   : > { %728 = vmatpush3.bf16.msra.mxu1 %v775_v7  ;;  %v789_v22 = vld [vmem:[%s871_s20 + $0x30] sm:$0xff]   ;;  %v792_v25 = vld [vmem:[%s871_s20 + $0x38] sm:$0xff]  }
  0x1b   : > { %729 = vmatprep.subr.bf16.mxu1 %v778_v10 }
  0x1c   : > { %692 = vmatpush3.bf16.msra.mxu0 %v777_v9 }
  0x1d   : > { %693 = vmatprep.subr.bf16.mxu0 %v779_v11 }
  0x1e   : > { %730 = vmatpush3.bf16.msra.mxu1 %v778_v10 }
  0x1f   : > { %731 = vmatprep.subr.bf16.mxu1 %v781_v13 }
  0x20   : > { %694 = vmatpush3.bf16.msra.mxu0 %v780_v12 }
  0x21   : > { %695 = vmatprep.subr.bf16.mxu0 %v782_v14 }
  0x22   : > { %732 = vmatpush3.bf16.msra.mxu1 %v781_v13 }
  0x23   : > { %733 = vmatprep.subr.bf16.mxu1 %v784_v15 }
  0x24   : > { %696 = vmatpush3.bf16.msra.mxu0 %v783_v16 }
  0x25   : > { %697 = vmatprep.subr.bf16.mxu0 %v785_v17 }
  0x26   : > { %734 = vmatpush3.bf16.msra.mxu1 %v784_v15 }
  0x27   : > { %735 = vmatprep.subr.bf16.mxu1 %v787_v18 }
  0x28   : > { %698 = vmatpush3.bf16.msra.mxu0 %v786_v19 }
  0x29   : > { %699 = vmatprep.subr.bf16.mxu0 %v788_v20 }
  0x2a   : > { %736 = vmatpush3.bf16.msra.mxu1 %v787_v18 }
  0x2b   : > { %737 = vmatprep.subr.bf16.mxu1 %v790_v21 }
  0x2c   : > { %700 = vmatpush3.bf16.msra.mxu0 %v789_v22 }
  0x2d   : > { %701 = vmatprep.subr.bf16.mxu0 %v791_v23 }
  0x2e   : > { %738 = vmatpush3.bf16.msra.mxu1 %v790_v21 }
  0x2f   : > { %739 = vmatprep.subr.bf16.mxu1 %v793_v24 }
  0x30   : > { %702 = vmatpush3.bf16.msra.mxu0 %v792_v25 }
  0x32   : > { %740 = vmatpush3.bf16.msra.mxu1 %v793_v24 }
  0x33   : > { %472 = vmatmul.mubr.bf16.vlgmr.msra.gmra.mrb[0].mxu0 %v794_v26 }
  0x34   : > { %479 = vmatprep.mubr.bf16.mxu0 %v799_v27 }
  0x35   : > { %742 = vmatmul.mubr.bf16.vlgmr.msra.gmra.mrb[0].mxu1 %v798_v28 }
  0x3b   : > { %480 = vmatmul.mubr.bf16.gmra.mrb[4].mxu0 %v801_v29 }
 0x106   : > { %v703_v30 = vpop.f32.mrb[0].mxu0 }
 0x107   : > { %v704_v31 = vpop.f32.mrb[1].mxu0 }
 0x108   : > { %v705_v32 = vadd.f32 %v704_v31, %v703_v30  ;;  %v706_v33 = vpop.f32.mrb[2].mxu0  ;;  %v743_v34 = vpop.f32.mrb[0].mxu1 }
 0x109   : > { %v707_v35 = vpop.f32.mrb[3].mxu0  ;;  %v522_v36 = vpop.f32.mrb[1].mxu1 }
 0x10a   : > { %v708_v37 = vadd.f32 %v707_v35, %v706_v33  ;;  %v523_v38 = vadd.f32 %v705_v32, %v522_v36  ;;  %v744_v39 = vpop.f32.mrb[2].mxu1 }
 0x10b   : > { %v525_v40 = vpop.f32.mrb[3].mxu1 }
 0x10c   : > { %v552_v41 = vmax.f32 %v523_v38, 0.0  ;;  %v526_v42 = vadd.f32 %v708_v37, %v525_v40 }
 0x10e   : > { %556 = vst [vmem:[%s193_s4] sm:$0xff] %v552_v41  ;;  %v553_v43 = vmax.f32 %v526_v42, 0.0  ;;  %v709_v44 = vpop.f32.mrb[4].mxu0 }
 0x10f   : > { %v710_v45 = vpop.f32.mrb[5].mxu0 }
 0x110   : > { %557 = vst [vmem:[%s193_s4 + $0x8] sm:$0xff] %v553_v43  ;;  %v711_v46 = vadd.f32 %v710_v45, %v709_v44  ;;  %v712_v47 = vpop.f32.mrb[6].mxu0 }
 0x111   : > { %v713_v48 = vpop.f32.mrb[7].mxu0 }
 0x112   : > { %v531_v49 = vadd.f32 %v743_v34, %v711_v46  ;;  %v714_v50 = vadd.f32 %v713_v48, %v712_v47 }
 0x114   : > { %v554_v51 = vmax.f32 %v531_v49, 0.0  ;;  %v534_v52 = vadd.f32 %v744_v39, %v714_v50 }
 0x116   : > { %558 = vst [vmem:[%s193_s4 + $0x10] sm:$0xff] %v554_v51  ;;  %v555_v53 = vmax.f32 %v534_v52, 0.0 }
 0x118   : > { %559 = vst [vmem:[%s193_s4 + $0x18] sm:$0xff] %v555_v53 }
 0x119 PF: > { %s12_s11 = sadd.s32 1, %s824_s11   ;;  %s925_s9 = smov %s820_s10 }
 0x11a   : > { %p9_p5 = scmp.ge.s32.totalorder %s12_s11, 4   ;;  %s926_s10 = smov %s928_s12 }
 0x11c   :  { %11 = sbr.rel (!%p9_p5) target bundleno = 2 (0x2), region = 69 }

// kernel: munit_forward.20
= control target key start
LH: loop header
LB: loop body
LE: loop exit
PB: predicated region body
PF: predicated region fallthrough
CT: control target
= control target key end

     0   :  { %s1112_s9 = smov 0   ;;  %s1114_s10 = smov 0   ;;  %s1221_s0 = inlined_call_operand.vmem [shape: bf16[32,640], index: 0, kind: input, shape index: {}]   ;;  %s1222_s1 = inlined_call_operand.vmem [shape: bf16[2,640,128], index: 1, kind: input, shape index: {}]   ;;  %s1223_s2 = inlined_call_operand.vmem [shape: f32[2,32,128], index: 2, kind: output, shape index: {}]  }
   0x1   :  { %s1116_s11 = smov 0  }
   0x2 LB: > { %s24_s12 = sadd.s32 1, %s1091_s10  ;;  %p851_p0 = scmp.ge.s32.totalorder %s1095_s11, 1  ;;  %s1095_s11 = sphi %s1116_s11, %s12_s11   ;;  %s1091_s10 = sphi %s1114_s10, %s1225_s10   ;;  %s1087_s9 = sphi %s1112_s9, %s1224_s9  }
   0x3   : > { %p26_p1 = scmp.ge.s32.totalorder %s24_s12, 2  ;;  %p142_p2 = scmp.lt.s32.totalorder %s1095_s11, 3 }
   0x5   : > { %s1227_s12 = smov (%p26_p1, %s24_s12), 0  ;;  %p143_p3 = pnand %p851_p0, %p142_p2 }
   0x6   : > { %p180_p4 = scmp.lt.s32.totalorder (!%p143_p3), %s1087_s9, 1  ;;  %v1053_v0 = vld [vmem:[%s1221_s0 + $0x4] ss:$20 sps:$4 sm:$0xff] (!%p143_p3)   ;;  %v1056_v1 = vld [vmem:[%s1221_s0 + $0xc] ss:$20 sps:$4 sm:$0xff] (!%p143_p3)  }
   0x7   : > { %146 = sbr.rel (%p143_p3) target bundleno = 304 (0x130), region = 28  ;;  %623 = vmatprep.mubr.bf16.mxu0 (!%p143_p3), %v1053_v0  ;;  %672 = vmatprep.mubr.bf16.mxu1 (!%p143_p3), %v1056_v1  ;;  %v1051_v32 = vld [vmem:[%s1221_s0] ss:$20 sps:$4 sm:$0xff] (!%p143_p3)   ;;  %v1054_v34 = vld [vmem:[%s1221_s0 + $0x8] ss:$20 sps:$4 sm:$0xff] (!%p143_p3)  }
   0x8   : > { %v1062_v36 = vld [vmem:[%s1221_s0 + $0x2c] ss:$20 sps:$4 sm:$0xff] (!%p143_p3)   ;;  %v1064_v39 = vld [vmem:[%s1221_s0 + $0x34] ss:$20 sps:$4 sm:$0xff] (!%p143_p3)   ;;  %v1068_v42 = vld [vmem:[%s1221_s0 + $0x30] ss:$20 sps:$4 sm:$0xff] (!%p143_p3)  }
   0x9   : > { %v1067_v41 = vld [vmem:[%s1221_s0 + $0x28] ss:$20 sps:$4 sm:$0xff] (!%p143_p3)   ;;  %v1071_v44 = vld [vmem:[%s1221_s0 + $0x10] ss:$20 sps:$4 sm:$0xff] (!%p143_p3)   ;;  %v1072_v49 = vld [vmem:[%s1221_s0 + $0x38] ss:$20 sps:$4 sm:$0xff] (!%p143_p3)  }
   0xe   : > { %s1229_s9 = smov (!%p180_p4, %s1087_s9), 1 }
   0xf   : > { %s994_s17 = smul.u32 320, %s1229_s9  ;;  %s907_s13 = sshll.u32 %s1229_s9, 5 }
  0x10   : > { %s193_s16 = scalar_lea.vmem %s1223_s2, %s907_s13 }
  0x11   : > { %s1142_s20 = scalar_lea.vmem %s1222_s1, %s994_s17 }
  0x12   : > { %v1019_v2 = vld [vmem:[%s1142_s20 + $0x40] sm:$0xff]   ;;  %v1023_v6 = vld [vmem:[%s1142_s20 + $0x48] sm:$0xff]   ;;  %v1027_v10 = vld [vmem:[%s1142_s20 + $0x50] sm:$0xff]  }
  0x13   : > { %v1020_v3 = vld [vmem:[%s1142_s20 + $0xc0] sm:$0xff]   ;;  %908 = vmatprep.subr.bf16.mxu0 %v1019_v2  ;;  %v1024_v7 = vld [vmem:[%s1142_s20 + $0xc8] sm:$0xff]   ;;  %v1028_v11 = vld [vmem:[%s1142_s20 + $0xd0] sm:$0xff]  }
  0x14   : > { %v1021_v4 = vld [vmem:[%s1142_s20] sm:$0xff]   ;;  %936 = vmatprep.subr.bf16.mxu1 %v1020_v3  ;;  %v1025_v8 = vld [vmem:[%s1142_s20 + $0x8] sm:$0xff]   ;;  %v1029_v12 = vld [vmem:[%s1142_s20 + $0x10] sm:$0xff]  }
  0x15   : > { %v1022_v5 = vld [vmem:[%s1142_s20 + $0x80] sm:$0xff]   ;;  %909 = vmatpush3.bf16.msra.mxu0 %v1021_v4  ;;  %v1026_v9 = vld [vmem:[%s1142_s20 + $0x88] sm:$0xff]   ;;  %v1030_v13 = vld [vmem:[%s1142_s20 + $0x90] sm:$0xff]  }
  0x16   : > { %937 = vmatpush3.bf16.msra.mxu1 %v1022_v5  ;;  %910 = vmatprep.subr.bf16.mxu0 %v1023_v6  ;;  %v1031_v14 = vld [vmem:[%s1142_s20 + $0x58] sm:$0xff]   ;;  %v1035_v18 = vld [vmem:[%s1142_s20 + $0x60] sm:$0xff]   ;;  %v1039_v22 = vld [vmem:[%s1142_s20 + $0x68] sm:$0xff]  }
  0x17   : > { %938 = vmatprep.subr.bf16.mxu1 %v1024_v7  ;;  %v1032_v15 = vld [vmem:[%s1142_s20 + $0xd8] sm:$0xff]   ;;  %v1036_v19 = vld [vmem:[%s1142_s20 + $0xe0] sm:$0xff]   ;;  %v1040_v23 = vld [vmem:[%s1142_s20 + $0xe8] sm:$0xff]  }
  0x18   : > { %v1033_v16 = vld [vmem:[%s1142_s20 + $0x18] sm:$0xff]   ;;  %v1037_v20 = vld [vmem:[%s1142_s20 + $0x20] sm:$0xff]   ;;  %v1041_v24 = vld [vmem:[%s1142_s20 + $0x28] sm:$0xff]  }
  0x19   : > { %911 = vmatpush3.bf16.msra.mxu0 %v1025_v8  ;;  %v1034_v17 = vld [vmem:[%s1142_s20 + $0x98] sm:$0xff]   ;;  %v1038_v21 = vld [vmem:[%s1142_s20 + $0xa0] sm:$0xff]   ;;  %v1042_v25 = vld [vmem:[%s1142_s20 + $0xa8] sm:$0xff]  }
  0x1a   : > { %939 = vmatpush3.bf16.msra.mxu1 %v1026_v9  ;;  %912 = vmatprep.subr.bf16.mxu0 %v1027_v10  ;;  %v1043_v26 = vld [vmem:[%s1142_s20 + $0x70] sm:$0xff]   ;;  %v1047_v30 = vld [vmem:[%s1142_s20 + $0x78] sm:$0xff]   ;;  %v1057_v37 = vld [vmem:[%s1142_s20 + $0x100] sm:$0xff]  }
  0x1b   : > { %940 = vmatprep.subr.bf16.mxu1 %v1028_v11  ;;  %v1044_v27 = vld [vmem:[%s1142_s20 + $0xf0] sm:$0xff]   ;;  %v1048_v31 = vld [vmem:[%s1142_s20 + $0xf8] sm:$0xff]   ;;  %v1058_v38 = vld [vmem:[%s1142_s20 + $0x108] sm:$0xff]  }
  0x1c   : > { %v1045_v28 = vld [vmem:[%s1142_s20 + $0x30] sm:$0xff]   ;;  %v1049_v33 = vld [vmem:[%s1142_s20 + $0x38] sm:$0xff]   ;;  %v1061_v45 = vld [vmem:[%s1142_s20 + $0x120] sm:$0xff]  }
  0x1d   : > { %913 = vmatpush3.bf16.msra.mxu0 %v1029_v12  ;;  %v1046_v29 = vld [vmem:[%s1142_s20 + $0xb0] sm:$0xff]   ;;  %v1050_v35 = vld [vmem:[%s1142_s20 + $0xb8] sm:$0xff]   ;;  %v1066_v46 = vld [vmem:[%s1142_s20 + $0x128] sm:$0xff]  }
  0x1e   : > { %941 = vmatpush3.bf16.msra.mxu1 %v1030_v13  ;;  %914 = vmatprep.subr.bf16.mxu0 %v1031_v14  ;;  %v1059_v40 = vld [vmem:[%s1142_s20 + $0x110] sm:$0xff]   ;;  %v1060_v43 = vld [vmem:[%s1142_s20 + $0x118] sm:$0xff]  }
  0x1f   : > { %942 = vmatprep.subr.bf16.mxu1 %v1032_v15  ;;  %v1069_v47 = vld [vmem:[%s1142_s20 + $0x130] sm:$0xff]   ;;  %v1070_v48 = vld [vmem:[%s1142_s20 + $0x138] sm:$0xff]  }
  0x21   : > { %915 = vmatpush3.bf16.msra.mxu0 %v1033_v16 }
  0x22   : > { %943 = vmatpush3.bf16.msra.mxu1 %v1034_v17  ;;  %916 = vmatprep.subr.bf16.mxu0 %v1035_v18 }
  0x23   : > { %944 = vmatprep.subr.bf16.mxu1 %v1036_v19 }
  0x25   : > { %917 = vmatpush3.bf16.msra.mxu0 %v1037_v20 }
  0x26   : > { %945 = vmatpush3.bf16.msra.mxu1 %v1038_v21  ;;  %918 = vmatprep.subr.bf16.mxu0 %v1039_v22 }
  0x27   : > { %946 = vmatprep.subr.bf16.mxu1 %v1040_v23 }
  0x29   : > { %919 = vmatpush3.bf16.msra.mxu0 %v1041_v24 }
  0x2a   : > { %947 = vmatpush3.bf16.msra.mxu1 %v1042_v25  ;;  %920 = vmatprep.subr.bf16.mxu0 %v1043_v26 }
  0x2b   : > { %948 = vmatprep.subr.bf16.mxu1 %v1044_v27 }
  0x2d   : > { %921 = vmatpush3.bf16.msra.mxu0 %v1045_v28 }
  0x2e   : > { %949 = vmatpush3.bf16.msra.mxu1 %v1046_v29  ;;  %922 = vmatprep.subr.bf16.mxu0 %v1047_v30 }
  0x2f   : > { %950 = vmatprep.subr.bf16.mxu1 %v1048_v31 }
  0x31   : > { %923 = vmatpush3.bf16.msra.mxu0 %v1049_v33 }
  0x32   : > { %951 = vmatpush3.bf16.msra.mxu1 %v1050_v35  ;;  %974 = vmatprep.subr.bf16.mxu0 %v1057_v37 }
  0x34   : > { %624 = vmatmul.mubr.bf16.vlgmr.msra.gmra.mrb[0].mxu0 %v1051_v32 }
  0x35   : > { %673 = vmatmul.mubr.bf16.vlgmr.msra.gmra.mrb[0].mxu1 %v1054_v34  ;;  %975 = vmatpush3.bf16.msra.mxu0 %v1057_v37 }
  0x36   : > { %976 = vmatprep.subr.bf16.mxu0 %v1058_v38  ;;  %631 = vmatprep.mubr.bf16.mxu0 %v1062_v36 }
  0x37   : > { %680 = vmatprep.mubr.bf16.mxu1 %v1064_v39 }
  0x39   : > { %977 = vmatpush3.bf16.msra.mxu0 %v1058_v38 }
  0x3a   : > { %978 = vmatprep.subr.bf16.mxu0 %v1059_v40 }
  0x3c   : > { %632 = vmatmul.mubr.bf16.gmra.mrb[4].mxu0 %v1067_v41 }
  0x3d   : > { %979 = vmatpush3.bf16.msra.mxu0 %v1059_v40  ;;  %681 = vmatmul.mubr.bf16.gmra.mrb[4].mxu1 %v1068_v42 }
  0x3e   : > { %980 = vmatprep.subr.bf16.mxu0 %v1060_v43  ;;  %990 = vmatprep.mubr.bf16.mxu0 %v1071_v44 }
  0x41   : > { %981 = vmatpush3.bf16.msra.mxu0 %v1060_v43 }
  0x42   : > { %982 = vmatprep.subr.bf16.mxu0 %v1061_v45 }
  0x45   : > { %983 = vmatpush3.bf16.msra.mxu0 %v1061_v45 }
  0x46   : > { %984 = vmatprep.subr.bf16.mxu0 %v1066_v46 }
  0x49   : > { %985 = vmatpush3.bf16.msra.mxu0 %v1066_v46 }
  0x4a   : > { %986 = vmatprep.subr.bf16.mxu0 %v1069_v47 }
  0x4d   : > { %987 = vmatpush3.bf16.msra.mxu0 %v1069_v47 }
  0x4e   : > { %988 = vmatprep.subr.bf16.mxu0 %v1070_v48 }
  0x51   : > { %989 = vmatpush3.bf16.msra.mxu0 %v1070_v48 }
  0x54   : > { %991 = vmatmul.mubr.bf16.vlgmr.msra.gmra.mrb[8].mxu0 %v1072_v49 }
 0x107   : > { %v924_v50 = vpop.f32.mrb[0].mxu0 }
 0x108   : > { %v952_v51 = vpop.f32.mrb[0].mxu1  ;;  %v925_v52 = vpop.f32.mrb[1].mxu0 }
 0x109   : > { %v926_v53 = vadd.f32 %v925_v52, %v924_v50  ;;  %v953_v54 = vpop.f32.mrb[1].mxu1  ;;  %v927_v55 = vpop.f32.mrb[2].mxu0 }
 0x10a   : > { %v954_v56 = vadd.f32 %v953_v54, %v952_v51  ;;  %v955_v57 = vpop.f32.mrb[2].mxu1  ;;  %v928_v58 = vpop.f32.mrb[3].mxu0 }
 0x10b   : > { %v929_v59 = vadd.f32 %v928_v58, %v927_v55  ;;  %v956_v60 = vpop.f32.mrb[3].mxu1 }
 0x10c   : > { %v957_v61 = vadd.f32 %v956_v60, %v955_v57  ;;  %v675_v62 = vadd.f32 %v954_v56, %v926_v53 }
 0x10e   : > { %v678_v63 = vadd.f32 %v957_v61, %v929_v59 }
 0x10f   : > { %v930_v0 = vpop.f32.mrb[4].mxu0 }
 0x110   : > { %v958_v1 = vpop.f32.mrb[4].mxu1  ;;  %v931_v2 = vpop.f32.mrb[5].mxu0 }
 0x111   : > { %v932_v3 = vadd.f32 %v931_v2, %v930_v0  ;;  %v959_v4 = vpop.f32.mrb[5].mxu1  ;;  %v933_v5 = vpop.f32.mrb[6].mxu0 }
 0x112   : > { %v960_v6 = vadd.f32 %v959_v4, %v958_v1  ;;  %v961_v7 = vpop.f32.mrb[6].mxu1  ;;  %v934_v8 = vpop.f32.mrb[7].mxu0 }
 0x113   : > { %v935_v9 = vadd.f32 %v934_v8, %v933_v5  ;;  %v962_v10 = vpop.f32.mrb[7].mxu1 }
 0x114   : > { %v963_v11 = vadd.f32 %v962_v10, %v961_v7  ;;  %v683_v12 = vadd.f32 %v960_v6, %v932_v3 }
 0x116   : > { %v686_v13 = vadd.f32 %v963_v11, %v935_v9 }
 0x127   : > { %v992_v14 = vpop.f32.mrb[8].mxu0 }
 0x128   : > { %v732_v15 = vadd.f32 %v992_v14, %v683_v12  ;;  %v723_v16 = vpop.f32.mrb[9].mxu0 }
 0x129   : > { %v724_v17 = vadd.f32 %v723_v16, %v675_v62  ;;  %v993_v18 = vpop.f32.mrb[10].mxu0 }
 0x12a   : > { %v755_v19 = vmax.f32 %v732_v15, 0.0  ;;  %v735_v20 = vadd.f32 %v993_v18, %v686_v13  ;;  %v726_v21 = vpop.f32.mrb[11].mxu0 }
 0x12b   : > { %v753_v22 = vmax.f32 %v724_v17, 0.0  ;;  %v727_v23 = vadd.f32 %v726_v21, %v678_v63 }
 0x12c   : > { %759 = vst [vmem:[%s193_s16 + $0x10] sm:$0xff] %v755_v19  ;;  %v756_v24 = vmax.f32 %v735_v20, 0.0 }
 0x12d   : > { %757 = vst [vmem:[%s193_s16] sm:$0xff] %v753_v22  ;;  %v754_v25 = vmax.f32 %v727_v23, 0.0 }
 0x12e   : > { %760 = vst [vmem:[%s193_s16 + $0x18] sm:$0xff] %v756_v24 }
 0x12f   : > { %758 = vst [vmem:[%s193_s16 + $0x8] sm:$0xff] %v754_v25 }
 0x130 PF: > { %s12_s11 = sadd.s32 1, %s1095_s11   ;;  %s1224_s9 = smov %s1091_s10 }
 0x131   : > { %p9_p5 = scmp.ge.s32.totalorder %s12_s11, 4   ;;  %s1225_s10 = smov %s1227_s12 }
 0x133   :  { %11 = sbr.rel (!%p9_p5) target bundleno = 2 (0x2), region = 69 }

// kernel: munit_forward.22
= control target key start
LH: loop header
LB: loop body
LE: loop exit
PB: predicated region body
PF: predicated region fallthrough
CT: control target
= control target key end

     0   :  { %v211_v11 = vmov 0.0|0.0   ;;  %vm212_vm0 = vmmov 0   ;;  %v213_v15 = vmov 0.0   ;;  %v57_v16 = vlaneseq  ;;  %s276_s0 = inlined_call_operand.vmem [shape: f32[2,32,128], index: 0, kind: input, shape index: {}]   ;;  %s277_s1 = inlined_call_operand.vmem [shape: f32[32,8], index: 1, kind: input, shape index: {}]   ;;  %s278_s2 = inlined_call_operand.vmem [shape: f32[1,8], index: 2, kind: input, shape index: {}]   ;;  %s279_s3 = inlined_call_operand.vmem [shape: f32[2,8], index: 3, kind: output, shape index: {}]  }
   0x1   :  { %v18_v0 = vld [vmem:[%s276_s0 + $0x20] sm:$0xff]  ;;  %v19_v2 = vld [vmem:[%s276_s0 + $0x28] sm:$0xff]  ;;  %v20_v4 = vld [vmem:[%s276_s0 + $0x30] sm:$0xff]  ;;  %202 = vmatprep.subr.bf16.mxu0 %v211_v11  ;;  %199 = vmatprep.mubr.msk.f32.mxu0 %vm212_vm0, %v213_v15  ;;  %vm68_vm1 = vcmask 130112   ;;  %vm75_vm2 = vcmask 195712   ;;  %vm82_vm3 = vcmask 261312  }
   0x2   :  { %v14_v1 = vld [vmem:[%s276_s0] sm:$0xff]  ;;  %30 = vadd.xlane.f32.xlu1 %v18_v0  ;;  %v15_v3 = vld [vmem:[%s276_s0 + $0x8] sm:$0xff]  ;;  %v16_v5 = vld [vmem:[%s276_s0 + $0x10] sm:$0xff]  ;;  %v58_v17 = vand.u32 127, %v57_v16  ;;  %v60_v22 = vshrl.u32 %v57_v16, 7  ;;  %vm103_vm4 = vcmask 1041409  }
   0x3   :  { %22 = vadd.xlane.f32.xlu0 %v14_v1  ;;  %v21_v6 = vld [vmem:[%s276_s0 + $0x38] sm:$0xff]  ;;  %v38_v8 = vld [vmem:[%s277_s1] sm:$0xff]  ;;  %v39_v9 = vld [vmem:[%s277_s1 + $0x8] sm:$0xff]  ;;  %vm105_vm5 = vcmask 261120   ;;  %vm178_vm6 = vcmask 58368  }
   0x4   :  { %v17_v7 = vld [vmem:[%s276_s0 + $0x18] sm:$0xff]  ;;  %v203_v10 = vpack.c.bf16 %v39_v9, %v38_v8  ;;  %v40_v12 = vld [vmem:[%s277_s1 + $0x10] sm:$0xff]  ;;  %v63_v20 = vadd.s32 4294967288, %v58_v17  ;;  %v70_v21 = vadd.s32 4294967280, %v58_v17  ;;  %v77_v26 = vadd.s32 4294967272, %v58_v17 }
   0x5   :  { %v41_v13 = vld [vmem:[%s277_s1 + $0x18] sm:$0xff]  ;;  %v61_v28 = vsub.s32 %v58_v17, %v60_v22  ;;  %v184_v49 = vld [vmem:[%s278_s2] ss:$0 sm:$0xff] }
   0x6   :  { %32 = vadd.xlane.f32.xlu1 %v19_v2  ;;  %204 = vmatpush3.bf16.msra.mxu0 %v203_v10  ;;  %v206_v14 = vpack.c.bf16 %v41_v13, %v40_v12  ;;  %v66_v25 = vsub.s32 %v63_v20, %v60_v22  ;;  %v73_v27 = vsub.s32 %v70_v21, %v60_v22 }
   0x7   :  { %24 = vadd.xlane.f32.xlu0 %v15_v3  ;;  %205 = vmatprep.subr.bf16.mxu0 %v211_v11  ;;  %v80_v33 = vsub.s32 %v77_v26, %v60_v22 }
   0xa   :  { %34 = vadd.xlane.f32.xlu1 %v20_v4  ;;  %207 = vmatpush3.bf16.msra.mxu0 %v206_v14 }
   0xb   :  { %26 = vadd.xlane.f32.xlu0 %v16_v5 }
   0xe   :  { %36 = vadd.xlane.f32.xlu1 %v21_v6 }
   0xf   :  { %28 = vadd.xlane.f32.xlu0 %v17_v7 }
  0x8f   :  { %v31_v18 = vpop.xlane.xlu1 %30 }
  0x90   :  { %v23_v19 = vpop.xlane.xlu0 %22  ;;  %v87_v36 = vrot.slane %v31_v18, %v61_v28 }
  0x91   :  { %v62_v37 = vrot.slane %v23_v19, %v61_v28 }
  0x93   :  { %v33_v23 = vpop.xlane.xlu1 %32 }
  0x94   :  { %v25_v24 = vpop.xlane.xlu0 %24  ;;  %v91_v31 = vrot.slane %v33_v23, %v66_v25 }
  0x95   :  { %v67_v32 = vrot.slane %v25_v24, %v66_v25 }
  0x96   :  { %v92_v40 = vsel %vm68_vm1, %v91_v31, %v87_v36 }
  0x97   :  { %v35_v29 = vpop.xlane.xlu1 %34  ;;  %v69_v41 = vsel %vm68_vm1, %v67_v32, %v62_v37 }
  0x98   :  { %v27_v30 = vpop.xlane.xlu0 %26  ;;  %v96_v34 = vrot.slane %v35_v29, %v73_v27 }
  0x99   :  { %v74_v35 = vrot.slane %v27_v30, %v73_v27 }
  0x9a   :  { %v97_v44 = vsel %vm75_vm2, %v96_v34, %v92_v40 }
  0x9b   :  { %v37_v38 = vpop.xlane.xlu1 %36  ;;  %v76_v45 = vsel %vm75_vm2, %v74_v35, %v69_v41 }
  0x9c   :  { %v29_v39 = vpop.xlane.xlu0 %28  ;;  %v101_v42 = vrot.slane %v37_v38, %v80_v33 }
  0x9d   :  { %v81_v43 = vrot.slane %v29_v39, %v80_v33 }
  0x9e   :  { %v102_v46 = vsel %vm82_vm3, %v101_v42, %v97_v44 }
  0x9f   :  { %v83_v47 = vsel %vm82_vm3, %v81_v43, %v76_v45 }
  0xa0   :  { %v104_v48 = vsel %vm103_vm4, %v102_v46, %v83_v47 }
  0xa1   :  { %200 = vmatmul.mubr.msk.f32.vlgmr.msra.gmra.mrb[0].mxu0 %vm105_vm5, %v104_v48 }
 0x174   :  { %v174_v50 = vpop.f32.mrb[0].mxu0 }
 0x175   :  { %v175_v51 = vadd.f32 %v184_v49, %v174_v50  ;;  %v201_v52 = vpop.f32.mrb[1].mxu0 }
 0x177   :  { %179 = vst.msk [vmem:[%s279_s3] sm:$0x3] %vm178_vm6, %v175_v51 }

// kernel: munit_forward.28
= control target key start
LH: loop header
LB: loop body
LE: loop exit
PB: predicated region body
PF: predicated region fallthrough
CT: control target
= control target key end

     0   :  { %vm35_vm0 = vcmask 64512   ;;  %v323_v0 = vmov 0.0   ;;  %vm324_vm1 = vmmov 0   ;;  %v325_v6 = vmov 0.0|0.0   ;;  %s396_s1 = inlined_call_operand.vmem [shape: f32[8,16], index: 1, kind: input, shape index: {}]   ;;  %s397_s0 = inlined_call_operand.vmem [shape: f32[2,8], index: 0, kind: input, shape index: {}]   ;;  %s398_s3 = inlined_call_operand.vmem [shape: f32[16,16], index: 3, kind: input, shape index: {}]   ;;  %s399_s2 = inlined_call_operand.vmem [shape: f32[1,16], index: 2, kind: input, shape index: {}]   ;;  %s400_s5 = inlined_call_operand.vmem [shape: f32[16,128], index: 5, kind: input, shape index: {}]   ;;  %s401_s4 = inlined_call_operand.vmem [shape: f32[1,16], index: 4, kind: input, shape index: {}]   ;;  %s402_s6 = inlined_call_operand.vmem [shape: f32[1,128], index: 6, kind: input, shape index: {}]   ;;  %s403_s7 = inlined_call_operand.vmem [shape: f32[2,128], index: 7, kind: output, shape index: {}]  }
   0x1   :  { %295 = vmatprep.subr.mxu0 %v323_v0  ;;  %v27_v1 = vld [vmem:[%s396_s1] sm:$0xff]  ;;  %297 = vmatprep.mubr.msk.f32.mxu0 %vm324_vm1, %v323_v0  ;;  %v111_v4 = vld [vmem:[%s398_s3 + $0x8] sm:$0xff]  ;;  %vm119_vm2 = vcmask 130048  }
   0x2   :  { %v26_v2 = vld [vmem:[%s397_s0] sm:$0x3]  ;;  %296 = vmatpush3.msra.mxu0 %v27_v1  ;;  %304 = vmatprep.mubr.msk.f32.mxu1 %vm324_vm1, %v323_v0  ;;  %v195_v13 = vld [vmem:[%s400_s5 + $0x8] sm:$0xff] }
   0x3   :  { %298 = vmatmul.mubr.msk.f32.vlgmr.msra.gmra.mrb[0].mxu0 %vm35_vm0, %v26_v2  ;;  %v110_v3 = vld [vmem:[%s398_s3] sm:$0xff]  ;;  %314 = vmatprep.subr.bf16.mxu1 %v325_v6 }
   0x4   :  { %311 = vmatprep.mubr.msk.f32.mxu0 %vm324_vm1, %v323_v0  ;;  %v315_v5 = vpack.c.bf16 %v111_v4, %v110_v3  ;;  %317 = vmatprep.subr.bf16.mxu0 %v325_v6  ;;  %v281_v7 = vld [vmem:[%s399_s2] ss:$0 sm:$0xff] }
   0x5   :  { %v194_v12 = vld [vmem:[%s400_s5] sm:$0xff] }
   0x6   :  { %316 = vmatpush3.bf16.msra.mxu1 %v315_v5  ;;  %v318_v14 = vpack.c.bf16 %v195_v13, %v194_v12  ;;  %v283_v15 = vld [vmem:[%s401_s4] ss:$0 sm:$0xff] }
   0x7   :  { %v285_v20 = vld [vmem:[%s402_s6] ss:$0 sm:$0xff] }
   0x8   :  { %319 = vmatpush3.bf16.msra.mxu0 %v318_v14 }
  0xd6   :  { %v105_v8 = vpop.f32.mrb[0].mxu0 }
  0xd7   :  { %v106_v9 = vadd.f32 %v281_v7, %v105_v8  ;;  %v299_v10 = vpop.f32.mrb[1].mxu0 }
  0xd9   :  { %v109_v11 = vmax.f32 %v106_v9, 0.0 }
  0xdb   :  { %305 = vmatmul.mubr.msk.f32.vlgmr.msra.gmra.mrb[0].mxu1 %vm119_vm2, %v109_v11 }
 0x1ae   :  { %v189_v16 = vpop.f32.mrb[0].mxu1 }
 0x1af   :  { %v190_v17 = vadd.f32 %v283_v15, %v189_v16  ;;  %v306_v18 = vpop.f32.mrb[1].mxu1 }
 0x1b1   :  { %v193_v19 = vmax.f32 %v190_v17, 0.0 }
 0x1b3   :  { %312 = vmatmul.mubr.msk.f32.vlgmr.msra.gmra.mrb[2].mxu0 %vm119_vm2, %v193_v19 }
 0x286   :  { %v272_v21 = vpop.f32.mrb[2].mxu0 }
 0x287   :  { %v273_v22 = vadd.f32 %v285_v20, %v272_v21  ;;  %v313_v23 = vpop.f32.mrb[3].mxu0 }
 0x289   :  { %276 = vst [vmem:[%s403_s7] sm:$0x3] %v273_v22 }

// kernel: munit_forward.24
= control target key start
LH: loop header
LB: loop body
LE: loop exit
PB: predicated region body
PF: predicated region fallthrough
CT: control target
= control target key end

     0   :  { %s650_s9 = smov 0   ;;  %s652_s10 = smov 0   ;;  %s693_s0 = inlined_call_operand.vmem [shape: bf16[16,256], index: 0, kind: input, shape index: {}]   ;;  %s694_s1 = inlined_call_operand.vmem [shape: bf16[2,256,128], index: 1, kind: input, shape index: {}]   ;;  %s695_s2 = inlined_call_operand.vmem [shape: f32[2,16,128], index: 2, kind: output, shape index: {}]  }
   0x1   :  { %s654_s11 = smov 0  }
   0x2 LB: > { %s24_s12 = sadd.s32 1, %s629_s10  ;;  %p515_p0 = scmp.ge.s32.totalorder %s633_s11, 1  ;;  %s633_s11 = sphi %s654_s11, %s12_s11   ;;  %s629_s10 = sphi %s652_s10, %s697_s10   ;;  %s625_s9 = sphi %s650_s9, %s696_s9  }
   0x3   : > { %p26_p1 = scmp.ge.s32.totalorder %s24_s12, 2  ;;  %p142_p2 = scmp.lt.s32.totalorder %s633_s11, 3 }
   0x5   : > { %s699_s12 = smov (%p26_p1, %s24_s12), 0  ;;  %p143_p3 = pnand %p515_p0, %p142_p2 }
   0x6   : > { %p180_p4 = scmp.lt.s32.totalorder (!%p143_p3), %s625_s9, 1  ;;  %v606_v0 = vld [vmem:[%s693_s0 + $0x4] ss:$8 sps:$4 sm:$0xff] (!%p143_p3)   ;;  %v604_v17 = vld [vmem:[%s693_s0] ss:$8 sps:$4 sm:$0xff] (!%p143_p3)  }
   0x7   : > { %146 = sbr.rel (%p143_p3) target bundleno = 437 (0x1b5), region = 28  ;;  %375 = vmatprep.mubr.bf16.mxu0 (!%p143_p3), %v606_v0 }
   0xe   : > { %s701_s9 = smov (!%p180_p4, %s625_s9), 1 }
   0xf   : > { %s540_s15 = sshll.u32 %s701_s9, 7  ;;  %s541_s21 = sshll.u32 %s701_s9, 4 }
  0x10   : > { %s187_s18 = scalar_lea.vmem %s694_s1, %s540_s15  ;;  %s193_s24 = scalar_lea.vmem %s695_s2, %s541_s21 }
  0x11   : > { %v588_v1 = vld [vmem:[%s187_s18 + $0x40] sm:$0xff]   ;;  %v590_v3 = vld [vmem:[%s187_s18 + $0x48] sm:$0xff]   ;;  %v592_v5 = vld [vmem:[%s187_s18 + $0x50] sm:$0xff]  }
  0x12   : > { %v589_v2 = vld [vmem:[%s187_s18] sm:$0xff]   ;;  %542 = vmatprep.subr.bf16.mxu0 %v588_v1  ;;  %v591_v4 = vld [vmem:[%s187_s18 + $0x8] sm:$0xff]   ;;  %v593_v6 = vld [vmem:[%s187_s18 + $0x10] sm:$0xff]  }
  0x13   : > { %543 = vmatpush3.bf16.msra.mxu0 %v589_v2  ;;  %v594_v7 = vld [vmem:[%s187_s18 + $0x58] sm:$0xff]   ;;  %v596_v9 = vld [vmem:[%s187_s18 + $0x60] sm:$0xff]   ;;  %v598_v11 = vld [vmem:[%s187_s18 + $0x68] sm:$0xff]  }
  0x14   : > { %544 = vmatprep.subr.bf16.mxu0 %v590_v3  ;;  %v595_v8 = vld [vmem:[%s187_s18 + $0x18] sm:$0xff]   ;;  %v597_v10 = vld [vmem:[%s187_s18 + $0x20] sm:$0xff]   ;;  %v599_v12 = vld [vmem:[%s187_s18 + $0x28] sm:$0xff]  }
  0x15   : > { %v600_v13 = vld [vmem:[%s187_s18 + $0x70] sm:$0xff]   ;;  %v602_v15 = vld [vmem:[%s187_s18 + $0x78] sm:$0xff]  }
  0x16   : > { %v601_v14 = vld [vmem:[%s187_s18 + $0x30] sm:$0xff]   ;;  %v603_v16 = vld [vmem:[%s187_s18 + $0x38] sm:$0xff]  }
  0x17   : > { %545 = vmatpush3.bf16.msra.mxu0 %v591_v4 }
  0x18   : > { %546 = vmatprep.subr.bf16.mxu0 %v592_v5 }
  0x1b   : > { %547 = vmatpush3.bf16.msra.mxu0 %v593_v6 }
  0x1c   : > { %548 = vmatprep.subr.bf16.mxu0 %v594_v7 }
  0x1f   : > { %549 = vmatpush3.bf16.msra.mxu0 %v595_v8 }
  0x20   : > { %550 = vmatprep.subr.bf16.mxu0 %v596_v9 }
  0x23   : > { %551 = vmatpush3.bf16.msra.mxu0 %v597_v10 }
  0x24   : > { %552 = vmatprep.subr.bf16.mxu0 %v598_v11 }
  0x27   : > { %553 = vmatpush3.bf16.msra.mxu0 %v599_v12 }
  0x28   : > { %554 = vmatprep.subr.bf16.mxu0 %v600_v13 }
  0x2b   : > { %555 = vmatpush3.bf16.msra.mxu0 %v601_v14 }
  0x2c   : > { %556 = vmatprep.subr.bf16.mxu0 %v602_v15 }
  0x2f   : > { %557 = vmatpush3.bf16.msra.mxu0 %v603_v16 }
  0x32   : > { %376 = vmatmul.mubr.bf16.vlgmr.msra.gmra.mrb[0].mxu0 %v604_v17 }
 0x105   : > { %v558_v18 = vpop.f32.mrb[0].mxu0 }
 0x106   : > { %v559_v19 = vpop.f32.mrb[1].mxu0 }
 0x107   : > { %v560_v20 = vadd.f32 %v559_v19, %v558_v18  ;;  %v561_v21 = vpop.f32.mrb[2].mxu0 }
 0x108   : > { %v562_v22 = vpop.f32.mrb[3].mxu0 }
 0x109   : > { %v563_v23 = vadd.f32 %v562_v22, %v561_v21  ;;  %393 = vadd.xlane.f32.xlu0 %v560_v20  ;;  %v399_v24 = vmul.f32 %v560_v20, %v560_v20 }
 0x10b   : > { %401 = vadd.xlane.f32.xlu1 %v399_v24  ;;  %v400_v25 = vmul.f32 %v563_v23, %v563_v23 }
 0x10d   : > { %395 = vadd.xlane.f32.xlu0 %v563_v23 }
 0x10f   : > { %403 = vadd.xlane.f32.xlu1 %v400_v25 }
 0x196   : > { %v394_v26 = vpop.xlane.xlu0 %393 }
 0x197   : > { %v397_v27 = vmul.f32 0.015625, %v394_v26 }
 0x198   : > { %v402_v28 = vpop.xlane.xlu1 %401 }
 0x199   : > { %v407_v29 = vmul.f32 %v397_v27, %v397_v27  ;;  %v405_v30 = vmul.f32 0.015625, %v402_v28  ;;  %v413_v42 = vsub.f32 %v560_v20, %v397_v27 }
 0x19a   : > { %v396_v31 = vpop.xlane.xlu0 %395 }
 0x19b   : > { %v409_v32 = vsub.f32 %v405_v30, %v407_v29  ;;  %v398_v33 = vmul.f32 0.015625, %v396_v31 }
 0x19c   : > { %v404_v34 = vpop.xlane.xlu1 %403 }
 0x19d   : > { %v411_v35 = vmax.f32 %v409_v32, 0.0  ;;  %v408_v36 = vmul.f32 %v398_v33, %v398_v33  ;;  %v406_v37 = vmul.f32 0.015625, %v404_v34  ;;  %v414_v46 = vsub.f32 %v563_v23, %v398_v33 }
 0x19f   : > { %v415_v38 = vadd.f32 1e-05, %v411_v35  ;;  %v410_v39 = vsub.f32 %v406_v37, %v408_v36 }
 0x1a1   : > { %607 = vrsqrt.f32 %v415_v38  ;;  %v412_v40 = vmax.f32 %v410_v39, 0.0 }
 0x1a3   : > { %v416_v41 = vadd.f32 1e-05, %v412_v40 }
 0x1a5   : > { %609 = vrsqrt.f32 %v416_v41 }
 0x1ab   : > { %v608_v43 = vpop.eup %607 }
 0x1ac   : > { %v419_v44 = vmul.f32 %v608_v43, %v413_v42 }
 0x1ae   : > { %v421_v45 = vmax.f32 %v419_v44, 0.0 }
 0x1af   : > { %v610_v47 = vpop.eup %609 }
 0x1b0   : > { %423 = vst [vmem:[%s193_s24] sm:$0xff] %v421_v45  ;;  %v420_v48 = vmul.f32 %v610_v47, %v414_v46 }
 0x1b2   : > { %v422_v49 = vmax.f32 %v420_v48, 0.0 }
 0x1b4   : > { %424 = vst [vmem:[%s193_s24 + $0x8] sm:$0xff] %v422_v49 }
 0x1b5 PF: > { %s12_s11 = sadd.s32 1, %s633_s11   ;;  %s696_s9 = smov %s629_s10 }
 0x1b6   : > { %p9_p5 = scmp.ge.s32.totalorder %s12_s11, 4   ;;  %s697_s10 = smov %s699_s12 }
 0x1b8   :  { %11 = sbr.rel (!%p9_p5) target bundleno = 2 (0x2), region = 69 }

// kernel: munit_forward.23
= control target key start
LH: loop header
LB: loop body
LE: loop exit
PB: predicated region body
PF: predicated region fallthrough
CT: control target
= control target key end

     0   :  { %s771_s9 = smov 0   ;;  %s773_s10 = smov 0   ;;  %s848_s0 = inlined_call_operand.vmem [shape: bf16[16,256], index: 0, kind: input, shape index: {}]   ;;  %s849_s1 = inlined_call_operand.vmem [shape: bf16[2,256,256], index: 1, kind: input, shape index: {}]   ;;  %s850_s2 = inlined_call_operand.vmem [shape: f32[2,16,256], index: 2, kind: output, shape index: {}]  }
   0x1   :  { %s775_s11 = smov 0  }
   0x2 LB: > { %s24_s12 = sadd.s32 1, %s750_s10  ;;  %p610_p0 = scmp.ge.s32.totalorder %s754_s11, 1  ;;  %s754_s11 = sphi %s775_s11, %s12_s11   ;;  %s750_s10 = sphi %s773_s10, %s852_s10   ;;  %s746_s9 = sphi %s771_s9, %s851_s9  }
   0x3   : > { %p26_p1 = scmp.ge.s32.totalorder %s24_s12, 2  ;;  %p143_p2 = scmp.lt.s32.totalorder %s754_s11, 3 }
   0x5   : > { %s854_s12 = smov (%p26_p1, %s24_s12), 0  ;;  %p144_p3 = pnand %p610_p0, %p143_p2 }
   0x6   : > { %p182_p4 = scmp.lt.s32.totalorder (!%p144_p3), %s746_s9, 1  ;;  %v727_v0 = vld [vmem:[%s848_s0 + $0x4] ss:$8 sps:$4 sm:$0xff] (!%p144_p3)   ;;  %v725_v33 = vld [vmem:[%s848_s0] ss:$8 sps:$4 sm:$0xff] (!%p144_p3)  }
   0x7   : > { %147 = sbr.rel (%p144_p3) target bundleno = 469 (0x1d5), region = 28  ;;  %445 = vmatprep.mubr.bf16.mxu0 (!%p144_p3), %v727_v0 }
   0xe   : > { %s856_s9 = smov (!%p182_p4, %s746_s9), 1 }
   0xf   : > { %s651_s15 = sshll.u32 %s856_s9, 8  ;;  %s652_s21 = sshll.u32 %s856_s9, 5 }
  0x10   : > { %s798_s18 = scalar_lea.vmem %s849_s1, %s651_s15  ;;  %s196_s24 = scalar_lea.vmem %s850_s2, %s652_s21 }
  0x11   : > { %v677_v1 = vld [vmem:[%s798_s18 + $0x4] ss:$8 sps:$4 sm:$0xff]   ;;  %v679_v2 = vld [vmem:[%s798_s18] ss:$8 sps:$4 sm:$0xff]   ;;  %v680_v3 = vld [vmem:[%s798_s18 + $0x14] ss:$8 sps:$4 sm:$0xff]  }
  0x12   : > { %413 = vmatprep.subr.bf16.mxu0 %v677_v1  ;;  %v682_v4 = vld [vmem:[%s798_s18 + $0x10] ss:$8 sps:$4 sm:$0xff]   ;;  %v683_v5 = vld [vmem:[%s798_s18 + $0x24] ss:$8 sps:$4 sm:$0xff]   ;;  %v685_v6 = vld [vmem:[%s798_s18 + $0x20] ss:$8 sps:$4 sm:$0xff]  }
  0x13   : > { %414 = vmatpush1.bf16.msra.mxu0 %v679_v2  ;;  %v686_v7 = vld [vmem:[%s798_s18 + $0x34] ss:$8 sps:$4 sm:$0xff]   ;;  %v688_v8 = vld [vmem:[%s798_s18 + $0x30] ss:$8 sps:$4 sm:$0xff]   ;;  %v689_v9 = vld [vmem:[%s798_s18 + $0x44] ss:$8 sps:$4 sm:$0xff]  }
  0x14   : > { %415 = vmatprep.subr.bf16.mxu0 %v680_v3  ;;  %v691_v10 = vld [vmem:[%s798_s18 + $0x40] ss:$8 sps:$4 sm:$0xff]   ;;  %v692_v11 = vld [vmem:[%s798_s18 + $0x54] ss:$8 sps:$4 sm:$0xff]   ;;  %v694_v12 = vld [vmem:[%s798_s18 + $0x50] ss:$8 sps:$4 sm:$0xff]  }
  0x15   : > { %v695_v13 = vld [vmem:[%s798_s18 + $0x64] ss:$8 sps:$4 sm:$0xff]   ;;  %v697_v14 = vld [vmem:[%s798_s18 + $0x60] ss:$8 sps:$4 sm:$0xff]   ;;  %v698_v15 = vld [vmem:[%s798_s18 + $0x74] ss:$8 sps:$4 sm:$0xff]  }
  0x16   : > { %v700_v16 = vld [vmem:[%s798_s18 + $0x70] ss:$8 sps:$4 sm:$0xff]   ;;  %v701_v17 = vld [vmem:[%s798_s18 + $0x84] ss:$8 sps:$4 sm:$0xff]   ;;  %v703_v18 = vld [vmem:[%s798_s18 + $0x80] ss:$8 sps:$4 sm:$0xff]  }
  0x17   : > { %416 = vmatpush1.bf16.msra.mxu0 %v682_v4  ;;  %v704_v19 = vld [vmem:[%s798_s18 + $0x94] ss:$8 sps:$4 sm:$0xff]   ;;  %v706_v20 = vld [vmem:[%s798_s18 + $0x90] ss:$8 sps:$4 sm:$0xff]   ;;  %v707_v21 = vld [vmem:[%s798_s18 + $0xa4] ss:$8 sps:$4 sm:$0xff]  }
  0x18   : > { %417 = vmatprep.subr.bf16.mxu0 %v683_v5  ;;  %v709_v22 = vld [vmem:[%s798_s18 + $0xa0] ss:$8 sps:$4 sm:$0xff]   ;;  %v710_v23 = vld [vmem:[%s798_s18 + $0xb4] ss:$8 sps:$4 sm:$0xff]   ;;  %v712_v24 = vld [vmem:[%s798_s18 + $0xb0] ss:$8 sps:$4 sm:$0xff]  }
  0x19   : > { %v713_v25 = vld [vmem:[%s798_s18 + $0xc4] ss:$8 sps:$4 sm:$0xff]   ;;  %v715_v26 = vld [vmem:[%s798_s18 + $0xc0] ss:$8 sps:$4 sm:$0xff]   ;;  %v716_v27 = vld [vmem:[%s798_s18 + $0xd4] ss:$8 sps:$4 sm:$0xff]  }
  0x1a   : > { %v718_v28 = vld [vmem:[%s798_s18 + $0xd0] ss:$8 sps:$4 sm:$0xff]   ;;  %v719_v29 = vld [vmem:[%s798_s18 + $0xe4] ss:$8 sps:$4 sm:$0xff]   ;;  %v721_v30 = vld [vmem:[%s798_s18 + $0xe0] ss:$8 sps:$4 sm:$0xff]  }
  0x1b   : > { %418 = vmatpush1.bf16.msra.mxu0 %v685_v6  ;;  %v722_v31 = vld [vmem:[%s798_s18 + $0xf4] ss:$8 sps:$4 sm:$0xff]   ;;  %v724_v32 = vld [vmem:[%s798_s18 + $0xf0] ss:$8 sps:$4 sm:$0xff]  }
  0x1c   : > { %419 = vmatprep.subr.bf16.mxu0 %v686_v7 }
  0x1f   : > { %420 = vmatpush1.bf16.msra.mxu0 %v688_v8 }
  0x20   : > { %421 = vmatprep.subr.bf16.mxu0 %v689_v9 }
  0x23   : > { %422 = vmatpush1.bf16.msra.mxu0 %v691_v10 }
  0x24   : > { %423 = vmatprep.subr.bf16.mxu0 %v692_v11 }
  0x27   : > { %424 = vmatpush1.bf16.msra.mxu0 %v694_v12 }
  0x28   : > { %425 = vmatprep.subr.bf16.mxu0 %v695_v13 }
  0x2b   : > { %426 = vmatpush1.bf16.msra.mxu0 %v697_v14 }
  0x2c   : > { %427 = vmatprep.subr.bf16.mxu0 %v698_v15 }
  0x2f   : > { %428 = vmatpush1.bf16.msra.mxu0 %v700_v16 }
  0x30   : > { %429 = vmatprep.subr.bf16.mxu0 %v701_v17 }
  0x33   : > { %430 = vmatpush1.bf16.msra.mxu0 %v703_v18 }
  0x34   : > { %431 = vmatprep.subr.bf16.mxu0 %v704_v19 }
  0x37   : > { %432 = vmatpush1.bf16.msra.mxu0 %v706_v20 }
  0x38   : > { %433 = vmatprep.subr.bf16.mxu0 %v707_v21 }
  0x3b   : > { %434 = vmatpush1.bf16.msra.mxu0 %v709_v22 }
  0x3c   : > { %435 = vmatprep.subr.bf16.mxu0 %v710_v23 }
  0x3f   : > { %436 = vmatpush1.bf16.msra.mxu0 %v712_v24 }
  0x40   : > { %437 = vmatprep.subr.bf16.mxu0 %v713_v25 }
  0x43   : > { %438 = vmatpush1.bf16.msra.mxu0 %v715_v26 }
  0x44   : > { %439 = vmatprep.subr.bf16.mxu0 %v716_v27 }
  0x47   : > { %440 = vmatpush1.bf16.msra.mxu0 %v718_v28 }
  0x48   : > { %441 = vmatprep.subr.bf16.mxu0 %v719_v29 }
  0x4b   : > { %442 = vmatpush1.bf16.msra.mxu0 %v721_v30 }
  0x4c   : > { %443 = vmatprep.subr.bf16.mxu0 %v722_v31 }
  0x4f   : > { %444 = vmatpush1.bf16.msra.mxu0 %v724_v32 }
  0x52   : > { %446 = vmatmul.mubr.bf16.vlgmr.msra.gmra.mrb[0].mxu0 %v725_v33 }
 0x125   : > { %v447_v34 = vpop.f32.mrb[0].mxu0 }
 0x126   : > { %v449_v35 = vpop.f32.mrb[1].mxu0  ;;  %v479_v36 = vmul.f32 %v447_v34, %v447_v34 }
 0x127   : > { %v451_v37 = vpop.f32.mrb[2].mxu0  ;;  %v471_v38 = vadd.f32 %v449_v35, %v447_v34  ;;  %v480_v39 = vmul.f32 %v449_v35, %v449_v35 }
 0x128   : > { %v453_v40 = vpop.f32.mrb[3].mxu0  ;;  %v481_v41 = vmul.f32 %v451_v37, %v451_v37 }
 0x129   : > { %v482_v42 = vmul.f32 %v453_v40, %v453_v40  ;;  %472 = vadd.xlane.f32.xlu0 %v471_v38  ;;  %v483_v43 = vadd.f32 %v480_v39, %v479_v36  ;;  %v474_v44 = vadd.f32 %v453_v40, %v451_v37 }
 0x12b   : > { %484 = vadd.xlane.f32.xlu1 %v483_v43  ;;  %v486_v45 = vadd.f32 %v482_v42, %v481_v41 }
 0x12d   : > { %475 = vadd.xlane.f32.xlu0 %v474_v44 }
 0x12f   : > { %487 = vadd.xlane.f32.xlu1 %v486_v45 }
 0x1b6   : > { %v473_v46 = vpop.xlane.xlu0 %472 }
 0x1b7   : > { %v477_v47 = vmul.f32 0.00390625, %v473_v46 }
 0x1b8   : > { %v485_v48 = vpop.xlane.xlu1 %484 }
 0x1b9   : > { %v489_v49 = vmul.f32 0.00390625, %v485_v48  ;;  %v491_v50 = vmul.f32 %v477_v47, %v477_v47  ;;  %v497_v62 = vsub.f32 %v447_v34, %v477_v47  ;;  %v498_v63 = vsub.f32 %v449_v35, %v477_v47 }
 0x1ba   : > { %v476_v51 = vpop.xlane.xlu0 %475 }
 0x1bb   : > { %v493_v52 = vsub.f32 %v489_v49, %v491_v50  ;;  %v478_v53 = vmul.f32 0.00390625, %v476_v51 }
 0x1bc   : > { %v488_v54 = vpop.xlane.xlu1 %487 }
 0x1bd   : > { %v495_v55 = vmax.f32 %v493_v52, 0.0  ;;  %v490_v56 = vmul.f32 0.00390625, %v488_v54  ;;  %v492_v57 = vmul.f32 %v478_v53, %v478_v53  ;;  %v499_v5 = vsub.f32 %v451_v37, %v478_v53 }
 0x1be   : > { %v500_v6 = vsub.f32 %v453_v40, %v478_v53 }
 0x1bf   : > { %v501_v58 = vadd.f32 1e-05, %v495_v55  ;;  %v494_v59 = vsub.f32 %v490_v56, %v492_v57 }
 0x1c1   : > { %728 = vrsqrt.f32 %v501_v58  ;;  %v496_v60 = vmax.f32 %v494_v59, 0.0 }
 0x1c3   : > { %v502_v61 = vadd.f32 1e-05, %v496_v60 }
 0x1c5   : > { %730 = vrsqrt.f32 %v502_v61 }
 0x1cb   : > { %v729_v0 = vpop.eup %728 }
 0x1cc   : > { %v505_v1 = vmul.f32 %v729_v0, %v497_v62  ;;  %v506_v2 = vmul.f32 %v729_v0, %v498_v63 }
 0x1ce   : > { %v509_v3 = vmax.f32 %v505_v1, 0.0  ;;  %v510_v4 = vmax.f32 %v506_v2, 0.0 }
 0x1cf   : > { %v731_v7 = vpop.eup %730 }
 0x1d0   : > { %513 = vst [vmem:[%s196_s24] sm:$0xff] %v509_v3  ;;  %514 = vst [vmem:[%s196_s24 + $0x8] sm:$0xff] %v510_v4  ;;  %v507_v8 = vmul.f32 %v731_v7, %v499_v5  ;;  %v508_v9 = vmul.f32 %v731_v7, %v500_v6 }
 0x1d2   : > { %v511_v10 = vmax.f32 %v507_v8, 0.0  ;;  %v512_v11 = vmax.f32 %v508_v9, 0.0 }
 0x1d4   : > { %515 = vst [vmem:[%s196_s24 + $0x10] sm:$0xff] %v511_v10  ;;  %516 = vst [vmem:[%s196_s24 + $0x18] sm:$0xff] %v512_v11 }
 0x1d5 PF: > { %s12_s11 = sadd.s32 1, %s754_s11   ;;  %s851_s9 = smov %s750_s10 }
 0x1d6   : > { %p9_p5 = scmp.ge.s32.totalorder %s12_s11, 4   ;;  %s852_s10 = smov %s854_s12 }
 0x1d8   :  { %11 = sbr.rel (!%p9_p5) target bundleno = 2 (0x2), region = 69 }

// kernel: munit_forward.25
= control target key start
LH: loop header
LB: loop body
LE: loop exit
PB: predicated region body
PF: predicated region fallthrough
CT: control target
= control target key end

     0   :  { %s905_s9 = smov 0   ;;  %s907_s10 = smov 0   ;;  %s998_s0 = inlined_call_operand.vmem [shape: bf16[32,384], index: 0, kind: input, shape index: {}]   ;;  %s999_s1 = inlined_call_operand.vmem [shape: bf16[2,384,128], index: 1, kind: input, shape index: {}]   ;;  %s1000_s2 = inlined_call_operand.vmem [shape: f32[2,32,128], index: 2, kind: output, shape index: {}]  }
   0x1   :  { %s909_s11 = smov 0  }
   0x2 LB: > { %s24_s12 = sadd.s32 1, %s884_s10  ;;  %p706_p0 = scmp.ge.s32.totalorder %s888_s11, 1  ;;  %s888_s11 = sphi %s909_s11, %s12_s11   ;;  %s884_s10 = sphi %s907_s10, %s1002_s10   ;;  %s880_s9 = sphi %s905_s9, %s1001_s9  }
   0x3   : > { %p26_p1 = scmp.ge.s32.totalorder %s24_s12, 2  ;;  %p142_p2 = scmp.lt.s32.totalorder %s888_s11, 3 }
   0x5   : > { %s1004_s12 = smov (%p26_p1, %s24_s12), 0  ;;  %p143_p3 = pnand %p706_p0, %p142_p2 }
   0x6   : > { %p180_p4 = scmp.lt.s32.totalorder (!%p143_p3), %s880_s9, 1  ;;  %v852_v0 = vld [vmem:[%s998_s0 + $0x4] ss:$12 sps:$4 sm:$0xff] (!%p143_p3)   ;;  %v853_v1 = vld [vmem:[%s998_s0 + $0x8] ss:$12 sps:$4 sm:$0xff] (!%p143_p3)  }
   0x7   : > { %146 = sbr.rel (%p143_p3) target bundleno = 451 (0x1c3), region = 28  ;;  %471 = vmatprep.mubr.bf16.mxu0 (!%p143_p3), %v852_v0  ;;  %797 = vmatprep.mubr.bf16.mxu1 (!%p143_p3), %v853_v1  ;;  %v850_v26 = vld [vmem:[%s998_s0] ss:$12 sps:$4 sm:$0xff] (!%p143_p3)   ;;  %v855_v28 = vld [vmem:[%s998_s0 + $0x1c] ss:$12 sps:$4 sm:$0xff] (!%p143_p3)  }
   0x8   : > { %v854_v27 = vld [vmem:[%s998_s0 + $0x20] ss:$12 sps:$4 sm:$0xff] (!%p143_p3)   ;;  %v857_v29 = vld [vmem:[%s998_s0 + $0x18] ss:$12 sps:$4 sm:$0xff] (!%p143_p3)  }
   0xe   : > { %s1006_s9 = smov (!%p180_p4, %s880_s9), 1 }
   0xf   : > { %s801_s17 = smul.u32 192, %s1006_s9  ;;  %s742_s29 = sshll.u32 %s1006_s9, 5 }
  0x10   : > { %s193_s4 = scalar_lea.vmem %s1000_s2, %s742_s29 }
  0x11   : > { %s935_s20 = scalar_lea.vmem %s999_s1, %s801_s17 }
  0x12   : > { %v826_v2 = vld [vmem:[%s935_s20 + $0x40] sm:$0xff]   ;;  %v829_v5 = vld [vmem:[%s935_s20 + $0x48] sm:$0xff]   ;;  %v832_v8 = vld [vmem:[%s935_s20 + $0x50] sm:$0xff]  }
  0x13   : > { %v827_v3 = vld [vmem:[%s935_s20 + $0x80] sm:$0xff]   ;;  %743 = vmatprep.subr.bf16.mxu0 %v826_v2  ;;  %v830_v6 = vld [vmem:[%s935_s20 + $0x88] sm:$0xff]   ;;  %v833_v9 = vld [vmem:[%s935_s20 + $0x90] sm:$0xff]  }
  0x14   : > { %v828_v4 = vld [vmem:[%s935_s20] sm:$0xff]   ;;  %781 = vmatprep.subr.bf16.mxu1 %v827_v3  ;;  %v831_v7 = vld [vmem:[%s935_s20 + $0x8] sm:$0xff]   ;;  %v834_v10 = vld [vmem:[%s935_s20 + $0x10] sm:$0xff]  }
  0x15   : > { %744 = vmatpush3.bf16.msra.mxu0 %v828_v4  ;;  %782 = vmatpush3.bf16.msra.mxu1 %v827_v3  ;;  %v835_v11 = vld [vmem:[%s935_s20 + $0x58] sm:$0xff]   ;;  %v838_v14 = vld [vmem:[%s935_s20 + $0x60] sm:$0xff]   ;;  %v841_v17 = vld [vmem:[%s935_s20 + $0x68] sm:$0xff]  }
  0x16   : > { %745 = vmatprep.subr.bf16.mxu0 %v829_v5  ;;  %783 = vmatprep.subr.bf16.mxu1 %v830_v6  ;;  %v836_v12 = vld [vmem:[%s935_s20 + $0x98] sm:$0xff]   ;;  %v839_v15 = vld [vmem:[%s935_s20 + $0xa0] sm:$0xff]   ;;  %v842_v18 = vld [vmem:[%s935_s20 + $0xa8] sm:$0xff]  }
  0x17   : > { %v837_v13 = vld [vmem:[%s935_s20 + $0x18] sm:$0xff]   ;;  %v840_v16 = vld [vmem:[%s935_s20 + $0x20] sm:$0xff]   ;;  %v843_v19 = vld [vmem:[%s935_s20 + $0x28] sm:$0xff]  }
  0x18   : > { %v844_v20 = vld [vmem:[%s935_s20 + $0x70] sm:$0xff]   ;;  %v847_v23 = vld [vmem:[%s935_s20 + $0x78] sm:$0xff]  }
  0x19   : > { %746 = vmatpush3.bf16.msra.mxu0 %v831_v7  ;;  %784 = vmatpush3.bf16.msra.mxu1 %v830_v6  ;;  %v845_v21 = vld [vmem:[%s935_s20 + $0xb0] sm:$0xff]   ;;  %v848_v24 = vld [vmem:[%s935_s20 + $0xb8] sm:$0xff]  }
  0x1a   : > { %747 = vmatprep.subr.bf16.mxu0 %v832_v8  ;;  %785 = vmatprep.subr.bf16.mxu1 %v833_v9  ;;  %v846_v22 = vld [vmem:[%s935_s20 + $0x30] sm:$0xff]   ;;  %v849_v25 = vld [vmem:[%s935_s20 + $0x38] sm:$0xff]  }
  0x1d   : > { %748 = vmatpush3.bf16.msra.mxu0 %v834_v10  ;;  %786 = vmatpush3.bf16.msra.mxu1 %v833_v9 }
  0x1e   : > { %749 = vmatprep.subr.bf16.mxu0 %v835_v11  ;;  %787 = vmatprep.subr.bf16.mxu1 %v836_v12 }
  0x21   : > { %750 = vmatpush3.bf16.msra.mxu0 %v837_v13  ;;  %788 = vmatpush3.bf16.msra.mxu1 %v836_v12 }
  0x22   : > { %751 = vmatprep.subr.bf16.mxu0 %v838_v14  ;;  %789 = vmatprep.subr.bf16.mxu1 %v839_v15 }
  0x25   : > { %752 = vmatpush3.bf16.msra.mxu0 %v840_v16  ;;  %790 = vmatpush3.bf16.msra.mxu1 %v839_v15 }
  0x26   : > { %753 = vmatprep.subr.bf16.mxu0 %v841_v17  ;;  %791 = vmatprep.subr.bf16.mxu1 %v842_v18 }
  0x29   : > { %754 = vmatpush3.bf16.msra.mxu0 %v843_v19  ;;  %792 = vmatpush3.bf16.msra.mxu1 %v842_v18 }
  0x2a   : > { %755 = vmatprep.subr.bf16.mxu0 %v844_v20  ;;  %793 = vmatprep.subr.bf16.mxu1 %v845_v21 }
  0x2d   : > { %756 = vmatpush3.bf16.msra.mxu0 %v846_v22  ;;  %794 = vmatpush3.bf16.msra.mxu1 %v845_v21 }
  0x2e   : > { %757 = vmatprep.subr.bf16.mxu0 %v847_v23  ;;  %795 = vmatprep.subr.bf16.mxu1 %v848_v24 }
  0x31   : > { %758 = vmatpush3.bf16.msra.mxu0 %v849_v25  ;;  %796 = vmatpush3.bf16.msra.mxu1 %v848_v24 }
  0x34   : > { %472 = vmatmul.mubr.bf16.vlgmr.msra.gmra.mrb[0].mxu0 %v850_v26  ;;  %798 = vmatmul.mubr.bf16.vlgmr.msra.gmra.mrb[0].mxu1 %v854_v27 }
  0x35   : > { %479 = vmatprep.mubr.bf16.mxu0 %v855_v28 }
  0x3c   : > { %480 = vmatmul.mubr.bf16.gmra.mrb[4].mxu0 %v857_v29 }
 0x107   : > { %v759_v30 = vpop.f32.mrb[0].mxu0  ;;  %v799_v31 = vpop.f32.mrb[0].mxu1 }
 0x108   : > { %v760_v32 = vpop.f32.mrb[1].mxu0  ;;  %v522_v33 = vpop.f32.mrb[1].mxu1 }
 0x109   : > { %v761_v34 = vadd.f32 %v760_v32, %v759_v30  ;;  %v762_v35 = vpop.f32.mrb[2].mxu0  ;;  %v800_v36 = vpop.f32.mrb[2].mxu1 }
 0x10a   : > { %v763_v37 = vpop.f32.mrb[3].mxu0  ;;  %v525_v38 = vpop.f32.mrb[3].mxu1 }
 0x10b   : > { %v973_v39 = vadd.f32 %v761_v34, %v522_v33  ;;  %v764_v40 = vadd.f32 %v763_v37, %v762_v35 }
 0x10d   : > { %v526_v41 = vadd.f32 %v764_v40, %v525_v38  ;;  %552 = vadd.xlane.f32.xlu0 %v973_v39  ;;  %v564_v50 = vmul.f32 %v973_v39, %v973_v39 }
 0x10f   : > { %v765_v42 = vpop.f32.mrb[4].mxu0  ;;  %v565_v43 = vmul.f32 %v526_v41, %v526_v41 }
 0x110   : > { %v766_v44 = vpop.f32.mrb[5].mxu0 }
 0x111   : > { %v767_v45 = vadd.f32 %v766_v44, %v765_v42  ;;  %v768_v46 = vpop.f32.mrb[6].mxu0  ;;  %570 = vadd.xlane.f32.xlu1 %v565_v43  ;;  %554 = vadd.xlane.f32.xlu0 %v526_v41 }
 0x112   : > { %v769_v47 = vpop.f32.mrb[7].mxu0 }
 0x113   : > { %v531_v48 = vadd.f32 %v799_v31, %v767_v45  ;;  %v770_v49 = vadd.f32 %v769_v47, %v768_v46 }
 0x115   : > { %v978_v51 = vadd.f32 %v800_v36, %v770_v49  ;;  %556 = vadd.xlane.f32.xlu1 %v531_v48  ;;  %568 = vadd.xlane.f32.xlu0 %v564_v50  ;;  %v566_v52 = vmul.f32 %v531_v48, %v531_v48 }
 0x117   : > { %v567_v53 = vmul.f32 %v978_v51, %v978_v51 }
 0x119   : > { %558 = vadd.xlane.f32.xlu1 %v978_v51  ;;  %572 = vadd.xlane.f32.xlu0 %v566_v52 }
 0x11d   : > { %574 = vadd.xlane.f32.xlu1 %v567_v53 }
 0x19a   : > { %v553_v54 = vpop.xlane.xlu0 %552 }
 0x19b   : > { %v560_v57 = vmul.f32 0.0625, %v553_v54 }
 0x19d   : > { %v580_v63 = vmul.f32 %v560_v57, %v560_v57  ;;  %v592_v24 = vsub.f32 %v973_v39, %v560_v57 }
 0x19e   : > { %v571_v55 = vpop.xlane.xlu1 %570  ;;  %v555_v56 = vpop.xlane.xlu0 %554 }
 0x19f   : > { %v561_v58 = vmul.f32 0.0625, %v555_v56  ;;  %v577_v59 = vmul.f32 0.0625, %v571_v55 }
 0x1a1   : > { %v581_v60 = vmul.f32 %v561_v58, %v561_v58  ;;  %v593_v22 = vsub.f32 %v526_v41, %v561_v58 }
 0x1a2   : > { %v557_v61 = vpop.xlane.xlu1 %556  ;;  %v569_v62 = vpop.xlane.xlu0 %568 }
 0x1a3   : > { %v585_v0 = vsub.f32 %v577_v59, %v581_v60  ;;  %v576_v1 = vmul.f32 0.0625, %v569_v62  ;;  %v562_v2 = vmul.f32 0.0625, %v557_v61 }
 0x1a5   : > { %v589_v3 = vmax.f32 %v585_v0, 0.0  ;;  %v584_v4 = vsub.f32 %v576_v1, %v580_v63  ;;  %v582_v11 = vmul.f32 %v562_v2, %v562_v2  ;;  %v594_v30 = vsub.f32 %v531_v48, %v562_v2 }
 0x1a6   : > { %v559_v5 = vpop.xlane.xlu1 %558  ;;  %v573_v6 = vpop.xlane.xlu0 %572 }
 0x1a7   : > { %v597_v7 = vadd.f32 1e-05, %v589_v3  ;;  %v588_v8 = vmax.f32 %v584_v4, 0.0  ;;  %v563_v9 = vmul.f32 0.0625, %v559_v5  ;;  %v578_v10 = vmul.f32 0.0625, %v573_v6 }
 0x1a9   : > { %858 = vrsqrt.f32 %v597_v7  ;;  %v596_v12 = vadd.f32 1e-05, %v588_v8  ;;  %v586_v13 = vsub.f32 %v578_v10, %v582_v11  ;;  %v583_v15 = vmul.f32 %v563_v9, %v563_v9 }
 0x1aa   : > { %v575_v14 = vpop.xlane.xlu1 %574  ;;  %v595_v33 = vsub.f32 %v978_v51, %v563_v9 }
 0x1ab   : > { %860 = vrsqrt.f32 %v596_v12  ;;  %v579_v16 = vmul.f32 0.0625, %v575_v14  ;;  %v590_v17 = vmax.f32 %v586_v13, 0.0 }
 0x1ad   : > { %v587_v18 = vsub.f32 %v579_v16, %v583_v15  ;;  %v598_v19 = vadd.f32 1e-05, %v590_v17 }
 0x1af   : > { %v591_v20 = vmax.f32 %v587_v18, 0.0  ;;  %862 = vrsqrt.f32 %v598_v19 }
 0x1b1   : > { %v599_v21 = vadd.f32 1e-05, %v591_v20 }
 0x1b3   : > { %v859_v23 = vpop.eup %858  ;;  %864 = vrsqrt.f32 %v599_v21 }
 0x1b4   : > { %v605_v25 = vmul.f32 %v859_v23, %v593_v22 }
 0x1b5   : > { %v861_v26 = vpop.eup %860 }
 0x1b6   : > { %v609_v27 = vmax.f32 %v605_v25, 0.0  ;;  %v604_v28 = vmul.f32 %v861_v26, %v592_v24 }
 0x1b8   : > { %613 = vst [vmem:[%s193_s4 + $0x8] sm:$0xff] %v609_v27  ;;  %v608_v29 = vmax.f32 %v604_v28, 0.0 }
 0x1b9   : > { %v863_v31 = vpop.eup %862 }
 0x1ba   : > { %612 = vst [vmem:[%s193_s4] sm:$0xff] %v608_v29  ;;  %v606_v32 = vmul.f32 %v863_v31, %v594_v30 }
 0x1bc   : > { %v610_v35 = vmax.f32 %v606_v32, 0.0 }
 0x1bd   : > { %v865_v34 = vpop.eup %864 }
 0x1be   : > { %v607_v36 = vmul.f32 %v865_v34, %v595_v33  ;;  %614 = vst [vmem:[%s193_s4 + $0x10] sm:$0xff] %v610_v35 }
 0x1c0   : > { %v611_v37 = vmax.f32 %v607_v36, 0.0 }
 0x1c2   : > { %615 = vst [vmem:[%s193_s4 + $0x18] sm:$0xff] %v611_v37 }
 0x1c3 PF: > { %s12_s11 = sadd.s32 1, %s888_s11   ;;  %s1001_s9 = smov %s884_s10 }
 0x1c4   : > { %p9_p5 = scmp.ge.s32.totalorder %s12_s11, 4   ;;  %s1002_s10 = smov %s1004_s12 }
 0x1c6   :  { %11 = sbr.rel (!%p9_p5) target bundleno = 2 (0x2), region = 69 }

// kernel: munit_forward.27
= control target key start
LH: loop header
LB: loop body
LE: loop exit
PB: predicated region body
PF: predicated region fallthrough
CT: control target
= control target key end

     0   :  { %s901_s9 = smov 0   ;;  %s903_s10 = smov 0   ;;  %s994_s0 = inlined_call_operand.vmem [shape: bf16[32,384], index: 0, kind: input, shape index: {}]   ;;  %s995_s1 = inlined_call_operand.vmem [shape: bf16[2,384,128], index: 1, kind: input, shape index: {}]   ;;  %s996_s2 = inlined_call_operand.vmem [shape: f32[2,32,128], index: 2, kind: output, shape index: {}]  }
   0x1   :  { %s905_s11 = smov 0  }
   0x2 LB: > { %s24_s12 = sadd.s32 1, %s880_s10  ;;  %p702_p0 = scmp.ge.s32.totalorder %s884_s11, 1  ;;  %s884_s11 = sphi %s905_s11, %s12_s11   ;;  %s880_s10 = sphi %s903_s10, %s998_s10   ;;  %s876_s9 = sphi %s901_s9, %s997_s9  }
   0x3   : > { %p26_p1 = scmp.ge.s32.totalorder %s24_s12, 2  ;;  %p142_p2 = scmp.lt.s32.totalorder %s884_s11, 3 }
   0x5   : > { %s1000_s12 = smov (%p26_p1, %s24_s12), 0  ;;  %p143_p3 = pnand %p702_p0, %p142_p2 }
   0x6   : > { %p180_p4 = scmp.lt.s32.totalorder (!%p143_p3), %s876_s9, 1  ;;  %v848_v0 = vld [vmem:[%s994_s0 + $0x4] ss:$12 sps:$4 sm:$0xff] (!%p143_p3)   ;;  %v849_v1 = vld [vmem:[%s994_s0 + $0x8] ss:$12 sps:$4 sm:$0xff] (!%p143_p3)  }
   0x7   : > { %146 = sbr.rel (%p143_p3) target bundleno = 449 (0x1c1), region = 28  ;;  %471 = vmatprep.mubr.bf16.mxu0 (!%p143_p3), %v848_v0  ;;  %793 = vmatprep.mubr.bf16.mxu1 (!%p143_p3), %v849_v1  ;;  %v846_v26 = vld [vmem:[%s994_s0] ss:$12 sps:$4 sm:$0xff] (!%p143_p3)   ;;  %v851_v28 = vld [vmem:[%s994_s0 + $0x1c] ss:$12 sps:$4 sm:$0xff] (!%p143_p3)  }
   0x8   : > { %v850_v27 = vld [vmem:[%s994_s0 + $0x20] ss:$12 sps:$4 sm:$0xff] (!%p143_p3)   ;;  %v853_v29 = vld [vmem:[%s994_s0 + $0x18] ss:$12 sps:$4 sm:$0xff] (!%p143_p3)  }
   0xe   : > { %s1002_s9 = smov (!%p180_p4, %s876_s9), 1 }
   0xf   : > { %s797_s17 = smul.u32 192, %s1002_s9  ;;  %s738_s29 = sshll.u32 %s1002_s9, 5 }
  0x10   : > { %s193_s4 = scalar_lea.vmem %s996_s2, %s738_s29 }
  0x11   : > { %s931_s20 = scalar_lea.vmem %s995_s1, %s797_s17 }
  0x12   : > { %v822_v2 = vld [vmem:[%s931_s20 + $0x40] sm:$0xff]   ;;  %v825_v5 = vld [vmem:[%s931_s20 + $0x48] sm:$0xff]   ;;  %v828_v8 = vld [vmem:[%s931_s20 + $0x50] sm:$0xff]  }
  0x13   : > { %v823_v3 = vld [vmem:[%s931_s20 + $0x80] sm:$0xff]   ;;  %739 = vmatprep.subr.bf16.mxu0 %v822_v2  ;;  %v826_v6 = vld [vmem:[%s931_s20 + $0x88] sm:$0xff]   ;;  %v829_v9 = vld [vmem:[%s931_s20 + $0x90] sm:$0xff]  }
  0x14   : > { %v824_v4 = vld [vmem:[%s931_s20] sm:$0xff]   ;;  %777 = vmatprep.subr.bf16.mxu1 %v823_v3  ;;  %v827_v7 = vld [vmem:[%s931_s20 + $0x8] sm:$0xff]   ;;  %v830_v10 = vld [vmem:[%s931_s20 + $0x10] sm:$0xff]  }
  0x15   : > { %740 = vmatpush3.bf16.msra.mxu0 %v824_v4  ;;  %778 = vmatpush3.bf16.msra.mxu1 %v823_v3  ;;  %v831_v11 = vld [vmem:[%s931_s20 + $0x58] sm:$0xff]   ;;  %v834_v14 = vld [vmem:[%s931_s20 + $0x60] sm:$0xff]   ;;  %v837_v17 = vld [vmem:[%s931_s20 + $0x68] sm:$0xff]  }
  0x16   : > { %741 = vmatprep.subr.bf16.mxu0 %v825_v5  ;;  %779 = vmatprep.subr.bf16.mxu1 %v826_v6  ;;  %v832_v12 = vld [vmem:[%s931_s20 + $0x98] sm:$0xff]   ;;  %v835_v15 = vld [vmem:[%s931_s20 + $0xa0] sm:$0xff]   ;;  %v838_v18 = vld [vmem:[%s931_s20 + $0xa8] sm:$0xff]  }
  0x17   : > { %v833_v13 = vld [vmem:[%s931_s20 + $0x18] sm:$0xff]   ;;  %v836_v16 = vld [vmem:[%s931_s20 + $0x20] sm:$0xff]   ;;  %v839_v19 = vld [vmem:[%s931_s20 + $0x28] sm:$0xff]  }
  0x18   : > { %v840_v20 = vld [vmem:[%s931_s20 + $0x70] sm:$0xff]   ;;  %v843_v23 = vld [vmem:[%s931_s20 + $0x78] sm:$0xff]  }
  0x19   : > { %742 = vmatpush3.bf16.msra.mxu0 %v827_v7  ;;  %780 = vmatpush3.bf16.msra.mxu1 %v826_v6  ;;  %v841_v21 = vld [vmem:[%s931_s20 + $0xb0] sm:$0xff]   ;;  %v844_v24 = vld [vmem:[%s931_s20 + $0xb8] sm:$0xff]  }
  0x1a   : > { %743 = vmatprep.subr.bf16.mxu0 %v828_v8  ;;  %781 = vmatprep.subr.bf16.mxu1 %v829_v9  ;;  %v842_v22 = vld [vmem:[%s931_s20 + $0x30] sm:$0xff]   ;;  %v845_v25 = vld [vmem:[%s931_s20 + $0x38] sm:$0xff]  }
  0x1d   : > { %744 = vmatpush3.bf16.msra.mxu0 %v830_v10  ;;  %782 = vmatpush3.bf16.msra.mxu1 %v829_v9 }
  0x1e   : > { %745 = vmatprep.subr.bf16.mxu0 %v831_v11  ;;  %783 = vmatprep.subr.bf16.mxu1 %v832_v12 }
  0x21   : > { %746 = vmatpush3.bf16.msra.mxu0 %v833_v13  ;;  %784 = vmatpush3.bf16.msra.mxu1 %v832_v12 }
  0x22   : > { %747 = vmatprep.subr.bf16.mxu0 %v834_v14  ;;  %785 = vmatprep.subr.bf16.mxu1 %v835_v15 }
  0x25   : > { %748 = vmatpush3.bf16.msra.mxu0 %v836_v16  ;;  %786 = vmatpush3.bf16.msra.mxu1 %v835_v15 }
  0x26   : > { %749 = vmatprep.subr.bf16.mxu0 %v837_v17  ;;  %787 = vmatprep.subr.bf16.mxu1 %v838_v18 }
  0x29   : > { %750 = vmatpush3.bf16.msra.mxu0 %v839_v19  ;;  %788 = vmatpush3.bf16.msra.mxu1 %v838_v18 }
  0x2a   : > { %751 = vmatprep.subr.bf16.mxu0 %v840_v20  ;;  %789 = vmatprep.subr.bf16.mxu1 %v841_v21 }
  0x2d   : > { %752 = vmatpush3.bf16.msra.mxu0 %v842_v22  ;;  %790 = vmatpush3.bf16.msra.mxu1 %v841_v21 }
  0x2e   : > { %753 = vmatprep.subr.bf16.mxu0 %v843_v23  ;;  %791 = vmatprep.subr.bf16.mxu1 %v844_v24 }
  0x31   : > { %754 = vmatpush3.bf16.msra.mxu0 %v845_v25  ;;  %792 = vmatpush3.bf16.msra.mxu1 %v844_v24 }
  0x34   : > { %472 = vmatmul.mubr.bf16.vlgmr.msra.gmra.mrb[0].mxu0 %v846_v26  ;;  %794 = vmatmul.mubr.bf16.vlgmr.msra.gmra.mrb[0].mxu1 %v850_v27 }
  0x35   : > { %479 = vmatprep.mubr.bf16.mxu0 %v851_v28 }
  0x3c   : > { %480 = vmatmul.mubr.bf16.gmra.mrb[4].mxu0 %v853_v29 }
 0x107   : > { %v755_v30 = vpop.f32.mrb[0].mxu0  ;;  %v795_v31 = vpop.f32.mrb[0].mxu1 }
 0x108   : > { %v756_v32 = vpop.f32.mrb[1].mxu0  ;;  %v522_v33 = vpop.f32.mrb[1].mxu1 }
 0x109   : > { %v757_v34 = vadd.f32 %v756_v32, %v755_v30  ;;  %v758_v35 = vpop.f32.mrb[2].mxu0  ;;  %v796_v36 = vpop.f32.mrb[2].mxu1 }
 0x10a   : > { %v759_v37 = vpop.f32.mrb[3].mxu0  ;;  %v525_v38 = vpop.f32.mrb[3].mxu1 }
 0x10b   : > { %v969_v39 = vadd.f32 %v757_v34, %v522_v33  ;;  %v760_v40 = vadd.f32 %v759_v37, %v758_v35 }
 0x10d   : > { %v971_v41 = vadd.f32 %v760_v40, %v525_v38  ;;  %552 = vadd.xlane.f32.xlu0 %v969_v39  ;;  %v564_v50 = vmul.f32 %v969_v39, %v969_v39 }
 0x10f   : > { %v761_v42 = vpop.f32.mrb[4].mxu0  ;;  %v565_v43 = vmul.f32 %v971_v41, %v971_v41 }
 0x110   : > { %v762_v44 = vpop.f32.mrb[5].mxu0 }
 0x111   : > { %v763_v45 = vadd.f32 %v762_v44, %v761_v42  ;;  %v764_v46 = vpop.f32.mrb[6].mxu0  ;;  %570 = vadd.xlane.f32.xlu1 %v565_v43  ;;  %554 = vadd.xlane.f32.xlu0 %v971_v41 }
 0x112   : > { %v765_v47 = vpop.f32.mrb[7].mxu0 }
 0x113   : > { %v531_v48 = vadd.f32 %v795_v31, %v763_v45  ;;  %v766_v49 = vadd.f32 %v765_v47, %v764_v46 }
 0x115   : > { %v534_v51 = vadd.f32 %v796_v36, %v766_v49  ;;  %556 = vadd.xlane.f32.xlu1 %v531_v48  ;;  %568 = vadd.xlane.f32.xlu0 %v564_v50  ;;  %v566_v52 = vmul.f32 %v531_v48, %v531_v48 }
 0x117   : > { %v567_v53 = vmul.f32 %v534_v51, %v534_v51 }
 0x119   : > { %558 = vadd.xlane.f32.xlu1 %v534_v51  ;;  %572 = vadd.xlane.f32.xlu0 %v566_v52 }
 0x11d   : > { %574 = vadd.xlane.f32.xlu1 %v567_v53 }
 0x19a   : > { %v553_v54 = vpop.xlane.xlu0 %552 }
 0x19b   : > { %v560_v57 = vmul.f32 0.0625, %v553_v54 }
 0x19d   : > { %v580_v63 = vmul.f32 %v560_v57, %v560_v57  ;;  %v592_v24 = vsub.f32 %v969_v39, %v560_v57 }
 0x19e   : > { %v571_v55 = vpop.xlane.xlu1 %570  ;;  %v555_v56 = vpop.xlane.xlu0 %554 }
 0x19f   : > { %v561_v58 = vmul.f32 0.0625, %v555_v56  ;;  %v577_v59 = vmul.f32 0.0625, %v571_v55 }
 0x1a1   : > { %v581_v60 = vmul.f32 %v561_v58, %v561_v58  ;;  %v593_v22 = vsub.f32 %v971_v41, %v561_v58 }
 0x1a2   : > { %v557_v61 = vpop.xlane.xlu1 %556  ;;  %v569_v62 = vpop.xlane.xlu0 %568 }
 0x1a3   : > { %v585_v0 = vsub.f32 %v577_v59, %v581_v60  ;;  %v576_v1 = vmul.f32 0.0625, %v569_v62  ;;  %v562_v2 = vmul.f32 0.0625, %v557_v61 }
 0x1a5   : > { %v589_v3 = vmax.f32 %v585_v0, 0.0  ;;  %v584_v4 = vsub.f32 %v576_v1, %v580_v63  ;;  %v582_v11 = vmul.f32 %v562_v2, %v562_v2  ;;  %v594_v28 = vsub.f32 %v531_v48, %v562_v2 }
 0x1a6   : > { %v559_v5 = vpop.xlane.xlu1 %558  ;;  %v573_v6 = vpop.xlane.xlu0 %572 }
 0x1a7   : > { %v597_v7 = vadd.f32 1e-05, %v589_v3  ;;  %v588_v8 = vmax.f32 %v584_v4, 0.0  ;;  %v563_v9 = vmul.f32 0.0625, %v559_v5  ;;  %v578_v10 = vmul.f32 0.0625, %v573_v6 }
 0x1a9   : > { %854 = vrsqrt.f32 %v597_v7  ;;  %v596_v12 = vadd.f32 1e-05, %v588_v8  ;;  %v586_v13 = vsub.f32 %v578_v10, %v582_v11  ;;  %v583_v15 = vmul.f32 %v563_v9, %v563_v9 }
 0x1aa   : > { %v575_v14 = vpop.xlane.xlu1 %574  ;;  %v595_v31 = vsub.f32 %v534_v51, %v563_v9 }
 0x1ab   : > { %856 = vrsqrt.f32 %v596_v12  ;;  %v579_v16 = vmul.f32 0.0625, %v575_v14  ;;  %v590_v17 = vmax.f32 %v586_v13, 0.0 }
 0x1ad   : > { %v587_v18 = vsub.f32 %v579_v16, %v583_v15  ;;  %v598_v19 = vadd.f32 1e-05, %v590_v17 }
 0x1af   : > { %v591_v20 = vmax.f32 %v587_v18, 0.0  ;;  %858 = vrsqrt.f32 %v598_v19 }
 0x1b1   : > { %v599_v21 = vadd.f32 1e-05, %v591_v20 }
 0x1b3   : > { %v855_v23 = vpop.eup %854  ;;  %860 = vrsqrt.f32 %v599_v21 }
 0x1b4   : > { %v605_v25 = vmul.f32 %v855_v23, %v593_v22 }
 0x1b5   : > { %v857_v26 = vpop.eup %856 }
 0x1b6   : > { %609 = vst [vmem:[%s193_s4 + $0x8] sm:$0xff] %v605_v25  ;;  %v604_v27 = vmul.f32 %v857_v26, %v592_v24 }
 0x1b8   : > { %608 = vst [vmem:[%s193_s4] sm:$0xff] %v604_v27 }
 0x1b9   : > { %v859_v29 = vpop.eup %858 }
 0x1ba   : > { %v606_v30 = vmul.f32 %v859_v29, %v594_v28 }
 0x1bc   : > { %610 = vst [vmem:[%s193_s4 + $0x10] sm:$0xff] %v606_v30 }
 0x1bd   : > { %v861_v32 = vpop.eup %860 }
 0x1be   : > { %v607_v33 = vmul.f32 %v861_v32, %v595_v31 }
 0x1c0   : > { %611 = vst [vmem:[%s193_s4 + $0x18] sm:$0xff] %v607_v33 }
 0x1c1 PF: > { %s12_s11 = sadd.s32 1, %s884_s11   ;;  %s997_s9 = smov %s880_s10 }
 0x1c2   : > { %p9_p5 = scmp.ge.s32.totalorder %s12_s11, 4   ;;  %s998_s10 = smov %s1000_s12 }
 0x1c4   :  { %11 = sbr.rel (!%p9_p5) target bundleno = 2 (0x2), region = 69 }

// kernel: munit_forward.30
= control target key start
LH: loop header
LB: loop body
LE: loop exit
PB: predicated region body
PF: predicated region fallthrough
CT: control target
= control target key end

     0   :  { %s1095_s15 = smov 0   ;;  %s1097_s16 = smov 0   ;;  %s1211_s0 = inlined_call_operand.vmem [shape: bf16[32,384], index: 0, kind: input, shape index: {}]   ;;  %s1212_s1 = inlined_call_operand.vmem [shape: bf16[2,384,128], index: 1, kind: input, shape index: {}]   ;;  %s1213_s2 = inlined_call_operand.vmem [shape: f32[2,32,1], index: 2, kind: input, shape index: {}]   ;;  %s1214_s3 = inlined_call_operand.vmem [shape: f32[2,32,1], index: 3, kind: input, shape index: {}]   ;;  %s1215_s4 = inlined_call_operand.vmem [shape: f32[2,32,128], index: 4, kind: output, shape index: {}]  }
   0x1   :  { %s1099_s17 = smov 0  }
   0x2 LB: > { %s26_s18 = sadd.s32 1, %s1063_s16  ;;  %p876_p0 = scmp.ge.s32.totalorder %s1067_s17, 1  ;;  %s1067_s17 = sphi %s1099_s17, %s14_s17   ;;  %s1063_s16 = sphi %s1097_s16, %s1217_s16   ;;  %s1059_s15 = sphi %s1095_s15, %s1216_s15  }
   0x3   : > { %p28_p1 = scmp.ge.s32.totalorder %s26_s18, 2  ;;  %p212_p2 = scmp.lt.s32.totalorder %s1067_s17, 3 }
   0x5   : > { %s1219_s18 = smov (%p28_p1, %s26_s18), 0  ;;  %p213_p3 = pnand %p876_p0, %p212_p2 }
   0x6   : > { %p264_p4 = scmp.lt.s32.totalorder (!%p213_p3), %s1059_s15, 1  ;;  %v1031_v0 = vld [vmem:[%s1211_s0 + $0x4] ss:$12 sps:$4 sm:$0xff] (!%p213_p3)   ;;  %v1032_v1 = vld [vmem:[%s1211_s0 + $0x8] ss:$12 sps:$4 sm:$0xff] (!%p213_p3)   ;;  %v1069_v30 = vmov (!%p213_p3), 0  }
   0x7   : > { %216 = sbr.rel (%p213_p3) target bundleno = 522 (0x20a), region = 36  ;;  %565 = vmatprep.mubr.bf16.mxu0 (!%p213_p3), %v1031_v0  ;;  %973 = vmatprep.mubr.bf16.mxu1 (!%p213_p3), %v1032_v1  ;;  %v1029_v26 = vld [vmem:[%s1211_s0] ss:$12 sps:$4 sm:$0xff] (!%p213_p3)   ;;  %v1034_v28 = vld [vmem:[%s1211_s0 + $0x1c] ss:$12 sps:$4 sm:$0xff] (!%p213_p3)  }
   0x8   : > { %v1033_v27 = vld [vmem:[%s1211_s0 + $0x20] ss:$12 sps:$4 sm:$0xff] (!%p213_p3)   ;;  %v1036_v29 = vld [vmem:[%s1211_s0 + $0x18] ss:$12 sps:$4 sm:$0xff] (!%p213_p3)   ;;  %1004 = vset.pattern.permute.xlu1 (!%p213_p3), %v1069_v30  ;;  %1003 = vset.pattern.permute.xlu0 (!%p213_p3), %v1069_v30 }
   0xe   : > { %s1221_s15 = smov (!%p264_p4, %s1059_s15), 1 }
   0xf   : > { %s977_s23 = smul.u32 192, %s1221_s15  ;;  %s1182_s9 = sshll.u32 %s1221_s15, 5 }
  0x10   : > { %s277_s12 = scalar_lea.vmem %s1213_s2, %s1182_s9  ;;  %s282_s19 = scalar_lea.vmem %s1214_s3, %s1182_s9 }
  0x11   : > { %s1125_s26 = scalar_lea.vmem %s1212_s1, %s977_s23  ;;  %v703_v54 = vld [vmem:[%s277_s12 + $0x8] sm:$0xff]  ;;  %v704_v55 = vld [vmem:[%s277_s12 + $0x10] sm:$0xff]  ;;  %v702_v56 = vld [vmem:[%s277_s12] sm:$0xff]  ;;  %s287_s21 = scalar_lea.vmem %s1215_s4, %s1182_s9 }
  0x12   : > { %v1005_v2 = vld [vmem:[%s1125_s26 + $0x40] sm:$0xff]   ;;  %v1008_v5 = vld [vmem:[%s1125_s26 + $0x48] sm:$0xff]   ;;  %v1011_v8 = vld [vmem:[%s1125_s26 + $0x50] sm:$0xff]  }
  0x13   : > { %v1006_v3 = vld [vmem:[%s1125_s26 + $0x80] sm:$0xff]   ;;  %919 = vmatprep.subr.bf16.mxu0 %v1005_v2  ;;  %v1009_v6 = vld [vmem:[%s1125_s26 + $0x88] sm:$0xff]   ;;  %v1012_v9 = vld [vmem:[%s1125_s26 + $0x90] sm:$0xff]  }
  0x14   : > { %v1007_v4 = vld [vmem:[%s1125_s26] sm:$0xff]   ;;  %957 = vmatprep.subr.bf16.mxu1 %v1006_v3  ;;  %v1010_v7 = vld [vmem:[%s1125_s26 + $0x8] sm:$0xff]   ;;  %v1013_v10 = vld [vmem:[%s1125_s26 + $0x10] sm:$0xff]  }
  0x15   : > { %920 = vmatpush3.bf16.msra.mxu0 %v1007_v4  ;;  %958 = vmatpush3.bf16.msra.mxu1 %v1006_v3  ;;  %v1014_v11 = vld [vmem:[%s1125_s26 + $0x58] sm:$0xff]   ;;  %v1017_v14 = vld [vmem:[%s1125_s26 + $0x60] sm:$0xff]   ;;  %v1020_v17 = vld [vmem:[%s1125_s26 + $0x68] sm:$0xff]  }
  0x16   : > { %921 = vmatprep.subr.bf16.mxu0 %v1008_v5  ;;  %959 = vmatprep.subr.bf16.mxu1 %v1009_v6  ;;  %v1015_v12 = vld [vmem:[%s1125_s26 + $0x98] sm:$0xff]   ;;  %v1018_v15 = vld [vmem:[%s1125_s26 + $0xa0] sm:$0xff]   ;;  %v1021_v18 = vld [vmem:[%s1125_s26 + $0xa8] sm:$0xff]  }
  0x17   : > { %v1016_v13 = vld [vmem:[%s1125_s26 + $0x18] sm:$0xff]   ;;  %v1019_v16 = vld [vmem:[%s1125_s26 + $0x20] sm:$0xff]   ;;  %v1022_v19 = vld [vmem:[%s1125_s26 + $0x28] sm:$0xff]  }
  0x18   : > { %v1023_v20 = vld [vmem:[%s1125_s26 + $0x70] sm:$0xff]   ;;  %v1026_v23 = vld [vmem:[%s1125_s26 + $0x78] sm:$0xff]   ;;  %v730_v58 = vld [vmem:[%s282_s19] sm:$0xff] }
  0x19   : > { %922 = vmatpush3.bf16.msra.mxu0 %v1010_v7  ;;  %960 = vmatpush3.bf16.msra.mxu1 %v1009_v6  ;;  %v1024_v21 = vld [vmem:[%s1125_s26 + $0xb0] sm:$0xff]   ;;  %v1027_v24 = vld [vmem:[%s1125_s26 + $0xb8] sm:$0xff]   ;;  %v731_v59 = vld [vmem:[%s282_s19 + $0x8] sm:$0xff] }
  0x1a   : > { %923 = vmatprep.subr.bf16.mxu0 %v1011_v8  ;;  %961 = vmatprep.subr.bf16.mxu1 %v1012_v9  ;;  %v1025_v22 = vld [vmem:[%s1125_s26 + $0x30] sm:$0xff]   ;;  %v1028_v25 = vld [vmem:[%s1125_s26 + $0x38] sm:$0xff]  }
  0x1b   : > { %v705_v57 = vld [vmem:[%s277_s12 + $0x18] sm:$0xff]  ;;  %v732_v60 = vld [vmem:[%s282_s19 + $0x10] sm:$0xff] }
  0x1c   : > { %v733_v62 = vld [vmem:[%s282_s19 + $0x18] sm:$0xff] }
  0x1d   : > { %924 = vmatpush3.bf16.msra.mxu0 %v1013_v10  ;;  %962 = vmatpush3.bf16.msra.mxu1 %v1012_v9 }
  0x1e   : > { %925 = vmatprep.subr.bf16.mxu0 %v1014_v11  ;;  %963 = vmatprep.subr.bf16.mxu1 %v1015_v12 }
  0x21   : > { %926 = vmatpush3.bf16.msra.mxu0 %v1016_v13  ;;  %964 = vmatpush3.bf16.msra.mxu1 %v1015_v12 }
  0x22   : > { %927 = vmatprep.subr.bf16.mxu0 %v1017_v14  ;;  %965 = vmatprep.subr.bf16.mxu1 %v1018_v15 }
  0x25   : > { %928 = vmatpush3.bf16.msra.mxu0 %v1019_v16  ;;  %966 = vmatpush3.bf16.msra.mxu1 %v1018_v15 }
  0x26   : > { %929 = vmatprep.subr.bf16.mxu0 %v1020_v17  ;;  %967 = vmatprep.subr.bf16.mxu1 %v1021_v18 }
  0x29   : > { %930 = vmatpush3.bf16.msra.mxu0 %v1022_v19  ;;  %968 = vmatpush3.bf16.msra.mxu1 %v1021_v18 }
  0x2a   : > { %931 = vmatprep.subr.bf16.mxu0 %v1023_v20  ;;  %969 = vmatprep.subr.bf16.mxu1 %v1024_v21 }
  0x2d   : > { %932 = vmatpush3.bf16.msra.mxu0 %v1025_v22  ;;  %970 = vmatpush3.bf16.msra.mxu1 %v1024_v21 }
  0x2e   : > { %933 = vmatprep.subr.bf16.mxu0 %v1026_v23  ;;  %971 = vmatprep.subr.bf16.mxu1 %v1027_v24 }
  0x31   : > { %934 = vmatpush3.bf16.msra.mxu0 %v1028_v25  ;;  %972 = vmatpush3.bf16.msra.mxu1 %v1027_v24 }
  0x34   : > { %566 = vmatmul.mubr.bf16.vlgmr.msra.gmra.mrb[0].mxu0 %v1029_v26  ;;  %974 = vmatmul.mubr.bf16.vlgmr.msra.gmra.mrb[0].mxu1 %v1033_v27 }
  0x35   : > { %573 = vmatprep.mubr.bf16.mxu0 %v1034_v28 }
  0x3c   : > { %574 = vmatmul.mubr.bf16.gmra.mrb[4].mxu0 %v1036_v29 }
 0x107   : > { %v935_v31 = vpop.f32.mrb[0].mxu0  ;;  %v975_v32 = vpop.f32.mrb[0].mxu1 }
 0x108   : > { %v936_v33 = vpop.f32.mrb[1].mxu0  ;;  %v616_v34 = vpop.f32.mrb[1].mxu1 }
 0x109   : > { %v937_v35 = vadd.f32 %v936_v33, %v935_v31  ;;  %v938_v36 = vpop.f32.mrb[2].mxu0  ;;  %v976_v37 = vpop.f32.mrb[2].mxu1 }
 0x10a   : > { %v939_v38 = vpop.f32.mrb[3].mxu0  ;;  %v619_v39 = vpop.f32.mrb[3].mxu1 }
 0x10b   : > { %v1163_v40 = vadd.f32 %v937_v35, %v616_v34  ;;  %v940_v41 = vadd.f32 %v939_v38, %v938_v36 }
 0x10d   : > { %v1165_v42 = vadd.f32 %v940_v41, %v619_v39  ;;  %646 = vadd.xlane.f32.xlu0 %v1163_v40  ;;  %v658_v51 = vmul.f32 %v1163_v40, %v1163_v40 }
 0x10f   : > { %v941_v43 = vpop.f32.mrb[4].mxu0  ;;  %v659_v44 = vmul.f32 %v1165_v42, %v1165_v42 }
 0x110   : > { %v942_v45 = vpop.f32.mrb[5].mxu0 }
 0x111   : > { %v943_v46 = vadd.f32 %v942_v45, %v941_v43  ;;  %v944_v47 = vpop.f32.mrb[6].mxu0  ;;  %664 = vadd.xlane.f32.xlu1 %v659_v44  ;;  %648 = vadd.xlane.f32.xlu0 %v1165_v42 }
 0x112   : > { %v945_v48 = vpop.f32.mrb[7].mxu0 }
 0x113   : > { %v1171_v49 = vadd.f32 %v975_v32, %v943_v46  ;;  %v946_v50 = vadd.f32 %v945_v48, %v944_v47 }
 0x115   : > { %v1175_v52 = vadd.f32 %v976_v37, %v946_v50  ;;  %650 = vadd.xlane.f32.xlu1 %v1171_v49  ;;  %662 = vadd.xlane.f32.xlu0 %v658_v51  ;;  %v660_v53 = vmul.f32 %v1171_v49, %v1171_v49 }
 0x117   : > { %v661_v61 = vmul.f32 %v1175_v52, %v1175_v52 }
 0x119   : > { %652 = vadd.xlane.f32.xlu1 %v1175_v52  ;;  %666 = vadd.xlane.f32.xlu0 %v660_v53 }
 0x12a   : > { %713 = vperm.xlu1 %1004, %v703_v54  }
 0x12e   : > { %718 = vperm.xlu1 %1004, %v704_v55  }
 0x12f   : > { %708 = vperm.xlu0 %1003, %v702_v56  }
 0x132   : > { %723 = vperm.xlu1 %1004, %v705_v57  }
 0x136   : > { %736 = vperm.xlu1 %1004, %v730_v58  }
 0x13a   : > { %741 = vperm.xlu1 %1004, %v731_v59  }
 0x13e   : > { %746 = vperm.xlu1 %1004, %v732_v60  }
 0x162   : > { %668 = vadd.xlane.f32.xlu1 %v661_v61 }
 0x173   : > { %751 = vperm.xlu1 %1004, %v733_v62  }
 0x19a   : > { %v647_v63 = vpop.xlane.xlu0 %646 }
 0x19b   : > { %v654_v2 = vmul.f32 0.0625, %v647_v63 }
 0x19d   : > { %v674_v8 = vmul.f32 %v654_v2, %v654_v2  ;;  %v686_v29 = vsub.f32 %v1163_v40, %v654_v2 }
 0x19e   : > { %v665_v0 = vpop.xlane.xlu1 %664  ;;  %v649_v1 = vpop.xlane.xlu0 %648 }
 0x19f   : > { %v655_v3 = vmul.f32 0.0625, %v649_v1  ;;  %v671_v4 = vmul.f32 0.0625, %v665_v0 }
 0x1a1   : > { %v675_v5 = vmul.f32 %v655_v3, %v655_v3  ;;  %v687_v28 = vsub.f32 %v1165_v42, %v655_v3 }
 0x1a2   : > { %v651_v6 = vpop.xlane.xlu1 %650  ;;  %v663_v7 = vpop.xlane.xlu0 %662 }
 0x1a3   : > { %v679_v9 = vsub.f32 %v671_v4, %v675_v5  ;;  %v670_v10 = vmul.f32 0.0625, %v663_v7  ;;  %v656_v11 = vmul.f32 0.0625, %v651_v6 }
 0x1a5   : > { %v683_v12 = vmax.f32 %v679_v9, 0.0  ;;  %v678_v13 = vsub.f32 %v670_v10, %v674_v8  ;;  %v676_v19 = vmul.f32 %v656_v11, %v656_v11  ;;  %v688_v36 = vsub.f32 %v1171_v49, %v656_v11 }
 0x1a6   : > { %v653_v14 = vpop.xlane.xlu1 %652  ;;  %v667_v15 = vpop.xlane.xlu0 %666 }
 0x1a7   : > { %v691_v16 = vadd.f32 1e-05, %v683_v12  ;;  %v682_v17 = vmax.f32 %v678_v13, 0.0  ;;  %v672_v18 = vmul.f32 0.0625, %v667_v15  ;;  %v657_v46 = vmul.f32 0.0625, %v653_v14 }
 0x1a9   : > { %1037 = vrsqrt.f32 %v691_v16  ;;  %v690_v20 = vadd.f32 1e-05, %v682_v17  ;;  %v680_v21 = vsub.f32 %v672_v18, %v676_v19  ;;  %v677_v48 = vmul.f32 %v657_v46, %v657_v46 }
 0x1aa   : > { %v714_v22 = vpop.permute.xlu1 %713  ;;  %v689_v54 = vsub.f32 %v1175_v52, %v657_v46 }
 0x1ab   : > { %1039 = vrsqrt.f32 %v690_v20  ;;  %v684_v23 = vmax.f32 %v680_v21, 0.0 }
 0x1ad   : > { %v692_v24 = vadd.f32 1e-05, %v684_v23 }
 0x1ae   : > { %v719_v25 = vpop.permute.xlu1 %718  ;;  %v709_v32 = vpop.permute.xlu0 %708 }
 0x1af   : > { %1041 = vrsqrt.f32 %v692_v24 }
 0x1b2   : > { %v724_v26 = vpop.permute.xlu1 %723 }
 0x1b3   : > { %v1038_v27 = vpop.eup %1037 }
 0x1b4   : > { %v699_v31 = vmul.f32 %v1038_v27, %v687_v28 }
 0x1b5   : > { %v1040_v30 = vpop.eup %1039 }
 0x1b6   : > { %v737_v33 = vpop.permute.xlu1 %736  ;;  %v698_v34 = vmul.f32 %v1040_v30, %v686_v29  ;;  %v727_v37 = vmul.f32 %v714_v22, %v699_v31 }
 0x1b8   : > { %v726_v35 = vmul.f32 %v709_v32, %v698_v34 }
 0x1b9   : > { %v1042_v38 = vpop.eup %1041 }
 0x1ba   : > { %v754_v39 = vadd.f32 %v737_v33, %v726_v35  ;;  %v742_v41 = vpop.permute.xlu1 %741  ;;  %v700_v43 = vmul.f32 %v1042_v38, %v688_v36 }
 0x1bb   : > { %v755_v42 = vadd.f32 %v742_v41, %v727_v37 }
 0x1bc   : > { %758 = vst [vmem:[%s287_s21] sm:$0xff] %v754_v39  ;;  %v728_v40 = vmul.f32 %v719_v25, %v700_v43 }
 0x1bd   : > { %759 = vst [vmem:[%s287_s21 + $0x8] sm:$0xff] %v755_v42 }
 0x1be   : > { %v747_v44 = vpop.permute.xlu1 %746 }
 0x1bf   : > { %v756_v45 = vadd.f32 %v747_v44, %v728_v40 }
 0x1c1   : > { %760 = vst [vmem:[%s287_s21 + $0x10] sm:$0xff] %v756_v45 }
 0x1ef   : > { %v669_v47 = vpop.xlane.xlu1 %668 }
 0x1f0   : > { %v673_v49 = vmul.f32 0.0625, %v669_v47 }
 0x1f2   : > { %v681_v50 = vsub.f32 %v673_v49, %v677_v48 }
 0x1f3   : > { %v752_v58 = vpop.permute.xlu1 %751 }
 0x1f4   : > { %v685_v51 = vmax.f32 %v681_v50, 0.0 }
 0x1f6   : > { %v693_v53 = vadd.f32 1e-05, %v685_v51 }
 0x1f8   : > { %1043 = vrsqrt.f32 %v693_v53 }
 0x202   : > { %v1044_v55 = vpop.eup %1043 }
 0x203   : > { %v701_v56 = vmul.f32 %v1044_v55, %v689_v54 }
 0x205   : > { %v729_v57 = vmul.f32 %v724_v26, %v701_v56 }
 0x207   : > { %v757_v59 = vadd.f32 %v752_v58, %v729_v57 }
 0x209   : > { %761 = vst [vmem:[%s287_s21 + $0x18] sm:$0xff] %v757_v59 }
 0x20a PF: > { %s14_s17 = sadd.s32 1, %s1067_s17   ;;  %s1216_s15 = smov %s1063_s16 }
 0x20b   : > { %p11_p5 = scmp.ge.s32.totalorder %s14_s17, 4   ;;  %s1217_s16 = smov %s1219_s18 }
 0x20d   :  { %13 = sbr.rel (!%p11_p5) target bundleno = 2 (0x2), region = 83 }

// kernel: munit_forward.29
= control target key start
LH: loop header
LB: loop body
LE: loop exit
PB: predicated region body
PF: predicated region fallthrough
CT: control target
= control target key end

     0   :  { %s1099_s15 = smov 0   ;;  %s1101_s16 = smov 0   ;;  %s1215_s0 = inlined_call_operand.vmem [shape: bf16[32,384], index: 0, kind: input, shape index: {}]   ;;  %s1216_s1 = inlined_call_operand.vmem [shape: bf16[2,384,128], index: 1, kind: input, shape index: {}]   ;;  %s1217_s2 = inlined_call_operand.vmem [shape: f32[2,32,1], index: 2, kind: input, shape index: {}]   ;;  %s1218_s3 = inlined_call_operand.vmem [shape: f32[2,32,1], index: 3, kind: input, shape index: {}]   ;;  %s1219_s4 = inlined_call_operand.vmem [shape: f32[2,32,128], index: 4, kind: output, shape index: {}]  }
   0x1   :  { %s1103_s17 = smov 0  }
   0x2 LB: > { %s26_s18 = sadd.s32 1, %s1067_s16  ;;  %p880_p0 = scmp.ge.s32.totalorder %s1071_s17, 1  ;;  %s1071_s17 = sphi %s1103_s17, %s14_s17   ;;  %s1067_s16 = sphi %s1101_s16, %s1221_s16   ;;  %s1063_s15 = sphi %s1099_s15, %s1220_s15  }
   0x3   : > { %p28_p1 = scmp.ge.s32.totalorder %s26_s18, 2  ;;  %p212_p2 = scmp.lt.s32.totalorder %s1071_s17, 3 }
   0x5   : > { %s1223_s18 = smov (%p28_p1, %s26_s18), 0  ;;  %p213_p3 = pnand %p880_p0, %p212_p2 }
   0x6   : > { %p264_p4 = scmp.lt.s32.totalorder (!%p213_p3), %s1063_s15, 1  ;;  %v1035_v0 = vld [vmem:[%s1215_s0 + $0x4] ss:$12 sps:$4 sm:$0xff] (!%p213_p3)   ;;  %v1036_v1 = vld [vmem:[%s1215_s0 + $0x8] ss:$12 sps:$4 sm:$0xff] (!%p213_p3)   ;;  %v1073_v30 = vmov (!%p213_p3), 0  }
   0x7   : > { %216 = sbr.rel (%p213_p3) target bundleno = 524 (0x20c), region = 36  ;;  %565 = vmatprep.mubr.bf16.mxu0 (!%p213_p3), %v1035_v0  ;;  %977 = vmatprep.mubr.bf16.mxu1 (!%p213_p3), %v1036_v1  ;;  %v1033_v26 = vld [vmem:[%s1215_s0] ss:$12 sps:$4 sm:$0xff] (!%p213_p3)   ;;  %v1038_v28 = vld [vmem:[%s1215_s0 + $0x1c] ss:$12 sps:$4 sm:$0xff] (!%p213_p3)  }
   0x8   : > { %v1037_v27 = vld [vmem:[%s1215_s0 + $0x20] ss:$12 sps:$4 sm:$0xff] (!%p213_p3)   ;;  %v1040_v29 = vld [vmem:[%s1215_s0 + $0x18] ss:$12 sps:$4 sm:$0xff] (!%p213_p3)   ;;  %1008 = vset.pattern.permute.xlu1 (!%p213_p3), %v1073_v30  ;;  %1007 = vset.pattern.permute.xlu0 (!%p213_p3), %v1073_v30 }
   0xe   : > { %s1225_s15 = smov (!%p264_p4, %s1063_s15), 1 }
   0xf   : > { %s981_s23 = smul.u32 192, %s1225_s15  ;;  %s1186_s9 = sshll.u32 %s1225_s15, 5 }
  0x10   : > { %s277_s12 = scalar_lea.vmem %s1217_s2, %s1186_s9  ;;  %s282_s19 = scalar_lea.vmem %s1218_s3, %s1186_s9 }
  0x11   : > { %s1129_s26 = scalar_lea.vmem %s1216_s1, %s981_s23  ;;  %v703_v54 = vld [vmem:[%s277_s12 + $0x8] sm:$0xff]  ;;  %v704_v55 = vld [vmem:[%s277_s12 + $0x10] sm:$0xff]  ;;  %v702_v56 = vld [vmem:[%s277_s12] sm:$0xff]  ;;  %s287_s21 = scalar_lea.vmem %s1219_s4, %s1186_s9 }
  0x12   : > { %v1009_v2 = vld [vmem:[%s1129_s26 + $0x40] sm:$0xff]   ;;  %v1012_v5 = vld [vmem:[%s1129_s26 + $0x48] sm:$0xff]   ;;  %v1015_v8 = vld [vmem:[%s1129_s26 + $0x50] sm:$0xff]  }
  0x13   : > { %v1010_v3 = vld [vmem:[%s1129_s26 + $0x80] sm:$0xff]   ;;  %923 = vmatprep.subr.bf16.mxu0 %v1009_v2  ;;  %v1013_v6 = vld [vmem:[%s1129_s26 + $0x88] sm:$0xff]   ;;  %v1016_v9 = vld [vmem:[%s1129_s26 + $0x90] sm:$0xff]  }
  0x14   : > { %v1011_v4 = vld [vmem:[%s1129_s26] sm:$0xff]   ;;  %961 = vmatprep.subr.bf16.mxu1 %v1010_v3  ;;  %v1014_v7 = vld [vmem:[%s1129_s26 + $0x8] sm:$0xff]   ;;  %v1017_v10 = vld [vmem:[%s1129_s26 + $0x10] sm:$0xff]  }
  0x15   : > { %924 = vmatpush3.bf16.msra.mxu0 %v1011_v4  ;;  %962 = vmatpush3.bf16.msra.mxu1 %v1010_v3  ;;  %v1018_v11 = vld [vmem:[%s1129_s26 + $0x58] sm:$0xff]   ;;  %v1021_v14 = vld [vmem:[%s1129_s26 + $0x60] sm:$0xff]   ;;  %v1024_v17 = vld [vmem:[%s1129_s26 + $0x68] sm:$0xff]  }
  0x16   : > { %925 = vmatprep.subr.bf16.mxu0 %v1012_v5  ;;  %963 = vmatprep.subr.bf16.mxu1 %v1013_v6  ;;  %v1019_v12 = vld [vmem:[%s1129_s26 + $0x98] sm:$0xff]   ;;  %v1022_v15 = vld [vmem:[%s1129_s26 + $0xa0] sm:$0xff]   ;;  %v1025_v18 = vld [vmem:[%s1129_s26 + $0xa8] sm:$0xff]  }
  0x17   : > { %v1020_v13 = vld [vmem:[%s1129_s26 + $0x18] sm:$0xff]   ;;  %v1023_v16 = vld [vmem:[%s1129_s26 + $0x20] sm:$0xff]   ;;  %v1026_v19 = vld [vmem:[%s1129_s26 + $0x28] sm:$0xff]  }
  0x18   : > { %v1027_v20 = vld [vmem:[%s1129_s26 + $0x70] sm:$0xff]   ;;  %v1030_v23 = vld [vmem:[%s1129_s26 + $0x78] sm:$0xff]   ;;  %v730_v58 = vld [vmem:[%s282_s19] sm:$0xff] }
  0x19   : > { %926 = vmatpush3.bf16.msra.mxu0 %v1014_v7  ;;  %964 = vmatpush3.bf16.msra.mxu1 %v1013_v6  ;;  %v1028_v21 = vld [vmem:[%s1129_s26 + $0xb0] sm:$0xff]   ;;  %v1031_v24 = vld [vmem:[%s1129_s26 + $0xb8] sm:$0xff]   ;;  %v731_v59 = vld [vmem:[%s282_s19 + $0x8] sm:$0xff] }
  0x1a   : > { %927 = vmatprep.subr.bf16.mxu0 %v1015_v8  ;;  %965 = vmatprep.subr.bf16.mxu1 %v1016_v9  ;;  %v1029_v22 = vld [vmem:[%s1129_s26 + $0x30] sm:$0xff]   ;;  %v1032_v25 = vld [vmem:[%s1129_s26 + $0x38] sm:$0xff]  }
  0x1b   : > { %v705_v57 = vld [vmem:[%s277_s12 + $0x18] sm:$0xff]  ;;  %v732_v60 = vld [vmem:[%s282_s19 + $0x10] sm:$0xff] }
  0x1c   : > { %v733_v62 = vld [vmem:[%s282_s19 + $0x18] sm:$0xff] }
  0x1d   : > { %928 = vmatpush3.bf16.msra.mxu0 %v1017_v10  ;;  %966 = vmatpush3.bf16.msra.mxu1 %v1016_v9 }
  0x1e   : > { %929 = vmatprep.subr.bf16.mxu0 %v1018_v11  ;;  %967 = vmatprep.subr.bf16.mxu1 %v1019_v12 }
  0x21   : > { %930 = vmatpush3.bf16.msra.mxu0 %v1020_v13  ;;  %968 = vmatpush3.bf16.msra.mxu1 %v1019_v12 }
  0x22   : > { %931 = vmatprep.subr.bf16.mxu0 %v1021_v14  ;;  %969 = vmatprep.subr.bf16.mxu1 %v1022_v15 }
  0x25   : > { %932 = vmatpush3.bf16.msra.mxu0 %v1023_v16  ;;  %970 = vmatpush3.bf16.msra.mxu1 %v1022_v15 }
  0x26   : > { %933 = vmatprep.subr.bf16.mxu0 %v1024_v17  ;;  %971 = vmatprep.subr.bf16.mxu1 %v1025_v18 }
  0x29   : > { %934 = vmatpush3.bf16.msra.mxu0 %v1026_v19  ;;  %972 = vmatpush3.bf16.msra.mxu1 %v1025_v18 }
  0x2a   : > { %935 = vmatprep.subr.bf16.mxu0 %v1027_v20  ;;  %973 = vmatprep.subr.bf16.mxu1 %v1028_v21 }
  0x2d   : > { %936 = vmatpush3.bf16.msra.mxu0 %v1029_v22  ;;  %974 = vmatpush3.bf16.msra.mxu1 %v1028_v21 }
  0x2e   : > { %937 = vmatprep.subr.bf16.mxu0 %v1030_v23  ;;  %975 = vmatprep.subr.bf16.mxu1 %v1031_v24 }
  0x31   : > { %938 = vmatpush3.bf16.msra.mxu0 %v1032_v25  ;;  %976 = vmatpush3.bf16.msra.mxu1 %v1031_v24 }
  0x34   : > { %566 = vmatmul.mubr.bf16.vlgmr.msra.gmra.mrb[0].mxu0 %v1033_v26  ;;  %978 = vmatmul.mubr.bf16.vlgmr.msra.gmra.mrb[0].mxu1 %v1037_v27 }
  0x35   : > { %573 = vmatprep.mubr.bf16.mxu0 %v1038_v28 }
  0x3c   : > { %574 = vmatmul.mubr.bf16.gmra.mrb[4].mxu0 %v1040_v29 }
 0x107   : > { %v939_v31 = vpop.f32.mrb[0].mxu0  ;;  %v979_v32 = vpop.f32.mrb[0].mxu1 }
 0x108   : > { %v940_v33 = vpop.f32.mrb[1].mxu0  ;;  %v616_v34 = vpop.f32.mrb[1].mxu1 }
 0x109   : > { %v941_v35 = vadd.f32 %v940_v33, %v939_v31  ;;  %v942_v36 = vpop.f32.mrb[2].mxu0  ;;  %v980_v37 = vpop.f32.mrb[2].mxu1 }
 0x10a   : > { %v943_v38 = vpop.f32.mrb[3].mxu0  ;;  %v619_v39 = vpop.f32.mrb[3].mxu1 }
 0x10b   : > { %v1167_v40 = vadd.f32 %v941_v35, %v616_v34  ;;  %v944_v41 = vadd.f32 %v943_v38, %v942_v36 }
 0x10d   : > { %v1169_v42 = vadd.f32 %v944_v41, %v619_v39  ;;  %646 = vadd.xlane.f32.xlu0 %v1167_v40  ;;  %v658_v51 = vmul.f32 %v1167_v40, %v1167_v40 }
 0x10f   : > { %v945_v43 = vpop.f32.mrb[4].mxu0  ;;  %v659_v44 = vmul.f32 %v1169_v42, %v1169_v42 }
 0x110   : > { %v946_v45 = vpop.f32.mrb[5].mxu0 }
 0x111   : > { %v947_v46 = vadd.f32 %v946_v45, %v945_v43  ;;  %v948_v47 = vpop.f32.mrb[6].mxu0  ;;  %664 = vadd.xlane.f32.xlu1 %v659_v44  ;;  %648 = vadd.xlane.f32.xlu0 %v1169_v42 }
 0x112   : > { %v949_v48 = vpop.f32.mrb[7].mxu0 }
 0x113   : > { %v1175_v49 = vadd.f32 %v979_v32, %v947_v46  ;;  %v950_v50 = vadd.f32 %v949_v48, %v948_v47 }
 0x115   : > { %v1179_v52 = vadd.f32 %v980_v37, %v950_v50  ;;  %650 = vadd.xlane.f32.xlu1 %v1175_v49  ;;  %662 = vadd.xlane.f32.xlu0 %v658_v51  ;;  %v660_v53 = vmul.f32 %v1175_v49, %v1175_v49 }
 0x117   : > { %v661_v61 = vmul.f32 %v1179_v52, %v1179_v52 }
 0x119   : > { %652 = vadd.xlane.f32.xlu1 %v1179_v52  ;;  %666 = vadd.xlane.f32.xlu0 %v660_v53 }
 0x12a   : > { %713 = vperm.xlu1 %1008, %v703_v54  }
 0x12e   : > { %718 = vperm.xlu1 %1008, %v704_v55  }
 0x12f   : > { %708 = vperm.xlu0 %1007, %v702_v56  }
 0x132   : > { %723 = vperm.xlu1 %1008, %v705_v57  }
 0x136   : > { %736 = vperm.xlu1 %1008, %v730_v58  }
 0x13a   : > { %741 = vperm.xlu1 %1008, %v731_v59  }
 0x13e   : > { %746 = vperm.xlu1 %1008, %v732_v60  }
 0x162   : > { %668 = vadd.xlane.f32.xlu1 %v661_v61 }
 0x173   : > { %751 = vperm.xlu1 %1008, %v733_v62  }
 0x19a   : > { %v647_v63 = vpop.xlane.xlu0 %646 }
 0x19b   : > { %v654_v2 = vmul.f32 0.0625, %v647_v63 }
 0x19d   : > { %v674_v8 = vmul.f32 %v654_v2, %v654_v2  ;;  %v686_v29 = vsub.f32 %v1167_v40, %v654_v2 }
 0x19e   : > { %v665_v0 = vpop.xlane.xlu1 %664  ;;  %v649_v1 = vpop.xlane.xlu0 %648 }
 0x19f   : > { %v655_v3 = vmul.f32 0.0625, %v649_v1  ;;  %v671_v4 = vmul.f32 0.0625, %v665_v0 }
 0x1a1   : > { %v675_v5 = vmul.f32 %v655_v3, %v655_v3  ;;  %v687_v28 = vsub.f32 %v1169_v42, %v655_v3 }
 0x1a2   : > { %v651_v6 = vpop.xlane.xlu1 %650  ;;  %v663_v7 = vpop.xlane.xlu0 %662 }
 0x1a3   : > { %v679_v9 = vsub.f32 %v671_v4, %v675_v5  ;;  %v670_v10 = vmul.f32 0.0625, %v663_v7  ;;  %v656_v11 = vmul.f32 0.0625, %v651_v6 }
 0x1a5   : > { %v683_v12 = vmax.f32 %v679_v9, 0.0  ;;  %v678_v13 = vsub.f32 %v670_v10, %v674_v8  ;;  %v676_v19 = vmul.f32 %v656_v11, %v656_v11  ;;  %v688_v36 = vsub.f32 %v1175_v49, %v656_v11 }
 0x1a6   : > { %v653_v14 = vpop.xlane.xlu1 %652  ;;  %v667_v15 = vpop.xlane.xlu0 %666 }
 0x1a7   : > { %v691_v16 = vadd.f32 1e-05, %v683_v12  ;;  %v682_v17 = vmax.f32 %v678_v13, 0.0  ;;  %v672_v18 = vmul.f32 0.0625, %v667_v15  ;;  %v657_v49 = vmul.f32 0.0625, %v653_v14 }
 0x1a9   : > { %1041 = vrsqrt.f32 %v691_v16  ;;  %v690_v20 = vadd.f32 1e-05, %v682_v17  ;;  %v680_v21 = vsub.f32 %v672_v18, %v676_v19  ;;  %v677_v51 = vmul.f32 %v657_v49, %v657_v49 }
 0x1aa   : > { %v714_v22 = vpop.permute.xlu1 %713  ;;  %v689_v57 = vsub.f32 %v1179_v52, %v657_v49 }
 0x1ab   : > { %1043 = vrsqrt.f32 %v690_v20  ;;  %v684_v23 = vmax.f32 %v680_v21, 0.0 }
 0x1ad   : > { %v692_v24 = vadd.f32 1e-05, %v684_v23 }
 0x1ae   : > { %v719_v25 = vpop.permute.xlu1 %718  ;;  %v709_v32 = vpop.permute.xlu0 %708 }
 0x1af   : > { %1045 = vrsqrt.f32 %v692_v24 }
 0x1b2   : > { %v724_v26 = vpop.permute.xlu1 %723 }
 0x1b3   : > { %v1042_v27 = vpop.eup %1041 }
 0x1b4   : > { %v699_v31 = vmul.f32 %v1042_v27, %v687_v28 }
 0x1b5   : > { %v1044_v30 = vpop.eup %1043 }
 0x1b6   : > { %v737_v33 = vpop.permute.xlu1 %736  ;;  %v698_v34 = vmul.f32 %v1044_v30, %v686_v29  ;;  %v727_v37 = vmul.f32 %v714_v22, %v699_v31 }
 0x1b8   : > { %v726_v35 = vmul.f32 %v709_v32, %v698_v34 }
 0x1b9   : > { %v1046_v38 = vpop.eup %1045 }
 0x1ba   : > { %v754_v39 = vadd.f32 %v737_v33, %v726_v35  ;;  %v742_v41 = vpop.permute.xlu1 %741  ;;  %v700_v43 = vmul.f32 %v1046_v38, %v688_v36 }
 0x1bb   : > { %v755_v42 = vadd.f32 %v742_v41, %v727_v37 }
 0x1bc   : > { %v758_v44 = vmax.f32 %v754_v39, 0.0  ;;  %v728_v40 = vmul.f32 %v719_v25, %v700_v43 }
 0x1bd   : > { %v759_v45 = vmax.f32 %v755_v42, 0.0 }
 0x1be   : > { %762 = vst [vmem:[%s287_s21] sm:$0xff] %v758_v44  ;;  %v747_v46 = vpop.permute.xlu1 %746 }
 0x1bf   : > { %763 = vst [vmem:[%s287_s21 + $0x8] sm:$0xff] %v759_v45  ;;  %v756_v47 = vadd.f32 %v747_v46, %v728_v40 }
 0x1c1   : > { %v760_v48 = vmax.f32 %v756_v47, 0.0 }
 0x1c3   : > { %764 = vst [vmem:[%s287_s21 + $0x10] sm:$0xff] %v760_v48 }
 0x1ef   : > { %v669_v50 = vpop.xlane.xlu1 %668 }
 0x1f0   : > { %v673_v53 = vmul.f32 0.0625, %v669_v50 }
 0x1f2   : > { %v681_v54 = vsub.f32 %v673_v53, %v677_v51 }
 0x1f3   : > { %v752_v61 = vpop.permute.xlu1 %751 }
 0x1f4   : > { %v685_v55 = vmax.f32 %v681_v54, 0.0 }
 0x1f6   : > { %v693_v56 = vadd.f32 1e-05, %v685_v55 }
 0x1f8   : > { %1047 = vrsqrt.f32 %v693_v56 }
 0x202   : > { %v1048_v58 = vpop.eup %1047 }
 0x203   : > { %v701_v59 = vmul.f32 %v1048_v58, %v689_v57 }
 0x205   : > { %v729_v60 = vmul.f32 %v724_v26, %v701_v59 }
 0x207   : > { %v757_v62 = vadd.f32 %v752_v61, %v729_v60 }
 0x209   : > { %v761_v63 = vmax.f32 %v757_v62, 0.0 }
 0x20b   : > { %765 = vst [vmem:[%s287_s21 + $0x18] sm:$0xff] %v761_v63 }
 0x20c PF: > { %s14_s17 = sadd.s32 1, %s1071_s17   ;;  %s1220_s15 = smov %s1067_s16 }
 0x20d   : > { %p11_p5 = scmp.ge.s32.totalorder %s14_s17, 4   ;;  %s1221_s16 = smov %s1223_s18 }
 0x20f   :  { %13 = sbr.rel (!%p11_p5) target bundleno = 2 (0x2), region = 83 }

// kernel: munit_forward.31
= control target key start
LH: loop header
LB: loop body
LE: loop exit
PB: predicated region body
PF: predicated region fallthrough
CT: control target
= control target key end

     0   :  { %s1404_s15 = smov 0   ;;  %s1406_s16 = smov 0   ;;  %s1532_s0 = inlined_call_operand.vmem [shape: bf16[16,896], index: 0, kind: input, shape index: {}]   ;;  %s1533_s1 = inlined_call_operand.vmem [shape: bf16[2,896,128], index: 1, kind: input, shape index: {}]   ;;  %s1534_s2 = inlined_call_operand.vmem [shape: f32[16,1], index: 2, kind: input, shape index: {}]   ;;  %s1535_s3 = inlined_call_operand.vmem [shape: f32[16,1], index: 3, kind: input, shape index: {}]   ;;  %s1536_s4 = inlined_call_operand.vmem [shape: f32[2,16,128], index: 4, kind: output, shape index: {}]  }
   0x1   :  { %s1408_s17 = smov 0  }
   0x2 LB: > { %s26_s18 = sadd.s32 1, %s1370_s16  ;;  %p1087_p0 = scmp.ge.s32.totalorder %s1374_s17, 1  ;;  %s1374_s17 = sphi %s1408_s17, %s14_s17   ;;  %s1370_s16 = sphi %s1406_s16, %s1538_s16   ;;  %s1366_s15 = sphi %s1404_s15, %s1537_s15  }
   0x3   : > { %p28_p1 = scmp.ge.s32.totalorder %s26_s18, 2  ;;  %p192_p2 = scmp.lt.s32.totalorder %s1374_s17, 3 }
   0x5   : > { %s1540_s18 = smov (%p28_p1, %s26_s18), 0  ;;  %p193_p3 = pnand %p1087_p0, %p192_p2 }
   0x6   : > { %p234_p4 = scmp.lt.s32.totalorder (!%p193_p3), %s1366_s15, 1  ;;  %v1316_v0 = vld [vmem:[%s1532_s0 + $0x4] ss:$28 sps:$4 sm:$0xff] (!%p193_p3)   ;;  %v1319_v1 = vld [vmem:[%s1532_s0 + $0xc] ss:$28 sps:$4 sm:$0xff] (!%p193_p3)   ;;  %v1376_v39 = vmov (!%p193_p3), 0.0  }
   0x7   : > { %196 = sbr.rel (%p193_p3) target bundleno = 510 (0x1fe), region = 36  ;;  %781 = vmatprep.mubr.bf16.mxu0 (!%p193_p3), %v1316_v0  ;;  %822 = vmatprep.mubr.bf16.mxu1 (!%p193_p3), %v1319_v1  ;;  %v1314_v32 = vld [vmem:[%s1532_s0] ss:$28 sps:$4 sm:$0xff] (!%p193_p3)   ;;  %v1317_v34 = vld [vmem:[%s1532_s0 + $0x8] ss:$28 sps:$4 sm:$0xff] (!%p193_p3)   ;;  %vm1377_vm0 = vmmov (!%p193_p3), 0  }
   0x8   : > { %v1345_v37 = vld [vmem:[%s1532_s0 + $0x14] ss:$28 sps:$4 sm:$0xff] (!%p193_p3)   ;;  %v1378_v0 = vmov (!%p193_p3), 0  }
   0x9   : > { %v1343_v62 = vld [vmem:[%s1532_s0 + $0x10] ss:$28 sps:$4 sm:$0xff] (!%p193_p3)   ;;  %v1347_v63 = vld [vmem:[%s1532_s0 + $0x18] ss:$28 sps:$4 sm:$0xff] (!%p193_p3)   ;;  %1281 = vset.pattern.permute.xlu1 (!%p193_p3), %v1378_v0  ;;  %1280 = vset.pattern.permute.xlu0 (!%p193_p3), %v1378_v0 }
   0xe   : > { %s1542_s15 = smov (!%p234_p4, %s1366_s15), 1 }
   0xf   : > { %s1252_s23 = smul.u32 448, %s1542_s15 }
  0x11   : > { %s1434_s26 = scalar_lea.vmem %s1533_s1, %s1252_s23  ;;  %s1156_s23 = sshll.u32 %s1542_s15, 4 }
  0x12   : > { %v1282_v2 = vld [vmem:[%s1434_s26 + $0x40] sm:$0xff]   ;;  %v1286_v6 = vld [vmem:[%s1434_s26 + $0x48] sm:$0xff]   ;;  %v1290_v10 = vld [vmem:[%s1434_s26 + $0x50] sm:$0xff]  }
  0x13   : > { %v1283_v3 = vld [vmem:[%s1434_s26 + $0xc0] sm:$0xff]   ;;  %1157 = vmatprep.subr.bf16.mxu0 %v1282_v2  ;;  %v1287_v7 = vld [vmem:[%s1434_s26 + $0xc8] sm:$0xff]   ;;  %v1291_v11 = vld [vmem:[%s1434_s26 + $0xd0] sm:$0xff]  }
  0x14   : > { %v1284_v4 = vld [vmem:[%s1434_s26] sm:$0xff]   ;;  %1179 = vmatprep.subr.bf16.mxu1 %v1283_v3  ;;  %v1288_v8 = vld [vmem:[%s1434_s26 + $0x8] sm:$0xff]   ;;  %v1292_v12 = vld [vmem:[%s1434_s26 + $0x10] sm:$0xff]  }
  0x15   : > { %v1285_v5 = vld [vmem:[%s1434_s26 + $0x80] sm:$0xff]   ;;  %1158 = vmatpush3.bf16.msra.mxu0 %v1284_v4  ;;  %v1289_v9 = vld [vmem:[%s1434_s26 + $0x88] sm:$0xff]   ;;  %v1293_v13 = vld [vmem:[%s1434_s26 + $0x90] sm:$0xff]  }
  0x16   : > { %1180 = vmatpush3.bf16.msra.mxu1 %v1285_v5  ;;  %1159 = vmatprep.subr.bf16.mxu0 %v1286_v6  ;;  %v1294_v14 = vld [vmem:[%s1434_s26 + $0x58] sm:$0xff]   ;;  %v1298_v18 = vld [vmem:[%s1434_s26 + $0x60] sm:$0xff]   ;;  %v1302_v22 = vld [vmem:[%s1434_s26 + $0x68] sm:$0xff]  }
  0x17   : > { %1181 = vmatprep.subr.bf16.mxu1 %v1287_v7  ;;  %v1295_v15 = vld [vmem:[%s1434_s26 + $0xd8] sm:$0xff]   ;;  %v1299_v19 = vld [vmem:[%s1434_s26 + $0xe0] sm:$0xff]   ;;  %v1303_v23 = vld [vmem:[%s1434_s26 + $0xe8] sm:$0xff]  }
  0x18   : > { %v1296_v16 = vld [vmem:[%s1434_s26 + $0x18] sm:$0xff]   ;;  %v1300_v20 = vld [vmem:[%s1434_s26 + $0x20] sm:$0xff]   ;;  %v1304_v24 = vld [vmem:[%s1434_s26 + $0x28] sm:$0xff]  }
  0x19   : > { %1160 = vmatpush3.bf16.msra.mxu0 %v1288_v8  ;;  %v1297_v17 = vld [vmem:[%s1434_s26 + $0x98] sm:$0xff]   ;;  %v1301_v21 = vld [vmem:[%s1434_s26 + $0xa0] sm:$0xff]   ;;  %v1305_v25 = vld [vmem:[%s1434_s26 + $0xa8] sm:$0xff]  }
  0x1a   : > { %1182 = vmatpush3.bf16.msra.mxu1 %v1289_v9  ;;  %1161 = vmatprep.subr.bf16.mxu0 %v1290_v10  ;;  %v1306_v26 = vld [vmem:[%s1434_s26 + $0x70] sm:$0xff]   ;;  %v1310_v30 = vld [vmem:[%s1434_s26 + $0x78] sm:$0xff]   ;;  %v1320_v36 = vld [vmem:[%s1434_s26 + $0x140] sm:$0xff]  }
  0x1b   : > { %1183 = vmatprep.subr.bf16.mxu1 %v1291_v11  ;;  %v1307_v27 = vld [vmem:[%s1434_s26 + $0xf0] sm:$0xff]   ;;  %v1311_v31 = vld [vmem:[%s1434_s26 + $0xf8] sm:$0xff]   ;;  %v1321_v38 = vld [vmem:[%s1434_s26 + $0x100] sm:$0xff]  }
  0x1c   : > { %v1308_v28 = vld [vmem:[%s1434_s26 + $0x30] sm:$0xff]   ;;  %v1312_v33 = vld [vmem:[%s1434_s26 + $0x38] sm:$0xff]   ;;  %v1322_v40 = vld [vmem:[%s1434_s26 + $0x180] sm:$0xff]  }
  0x1d   : > { %1162 = vmatpush3.bf16.msra.mxu0 %v1292_v12  ;;  %v1309_v29 = vld [vmem:[%s1434_s26 + $0xb0] sm:$0xff]   ;;  %v1313_v35 = vld [vmem:[%s1434_s26 + $0xb8] sm:$0xff]   ;;  %v1323_v41 = vld [vmem:[%s1434_s26 + $0x148] sm:$0xff]  }
  0x1e   : > { %1184 = vmatpush3.bf16.msra.mxu1 %v1293_v13  ;;  %1163 = vmatprep.subr.bf16.mxu0 %v1294_v14  ;;  %v1324_v42 = vld [vmem:[%s1434_s26 + $0x108] sm:$0xff]   ;;  %v1326_v44 = vld [vmem:[%s1434_s26 + $0x150] sm:$0xff]   ;;  %v1329_v47 = vld [vmem:[%s1434_s26 + $0x158] sm:$0xff]  }
  0x1f   : > { %1185 = vmatprep.subr.bf16.mxu1 %v1295_v15  ;;  %v1325_v43 = vld [vmem:[%s1434_s26 + $0x188] sm:$0xff]   ;;  %v1327_v45 = vld [vmem:[%s1434_s26 + $0x110] sm:$0xff]   ;;  %v1330_v48 = vld [vmem:[%s1434_s26 + $0x118] sm:$0xff]  }
  0x20   : > { %v1328_v46 = vld [vmem:[%s1434_s26 + $0x190] sm:$0xff]   ;;  %v1331_v49 = vld [vmem:[%s1434_s26 + $0x198] sm:$0xff]   ;;  %v1332_v50 = vld [vmem:[%s1434_s26 + $0x160] sm:$0xff]  }
  0x21   : > { %1164 = vmatpush3.bf16.msra.mxu0 %v1296_v16  ;;  %v1333_v51 = vld [vmem:[%s1434_s26 + $0x120] sm:$0xff]   ;;  %v1335_v53 = vld [vmem:[%s1434_s26 + $0x168] sm:$0xff]   ;;  %v1338_v56 = vld [vmem:[%s1434_s26 + $0x170] sm:$0xff]  }
  0x22   : > { %1186 = vmatpush3.bf16.msra.mxu1 %v1297_v17  ;;  %1165 = vmatprep.subr.bf16.mxu0 %v1298_v18  ;;  %v1334_v52 = vld [vmem:[%s1434_s26 + $0x1a0] sm:$0xff]   ;;  %v1336_v54 = vld [vmem:[%s1434_s26 + $0x128] sm:$0xff]   ;;  %v1339_v57 = vld [vmem:[%s1434_s26 + $0x130] sm:$0xff]  }
  0x23   : > { %1187 = vmatprep.subr.bf16.mxu1 %v1299_v19  ;;  %v1337_v55 = vld [vmem:[%s1434_s26 + $0x1a8] sm:$0xff]   ;;  %v1340_v58 = vld [vmem:[%s1434_s26 + $0x1b0] sm:$0xff]   ;;  %v1341_v59 = vld [vmem:[%s1434_s26 + $0x178] sm:$0xff]  }
  0x24   : > { %v1342_v60 = vld [vmem:[%s1434_s26 + $0x138] sm:$0xff]  }
  0x25   : > { %1166 = vmatpush3.bf16.msra.mxu0 %v1300_v20  ;;  %v1346_v61 = vld [vmem:[%s1434_s26 + $0x1b8] sm:$0xff]   ;;  %s247_s26 = scalar_lea.vmem %s1536_s4, %s1156_s23 }
  0x26   : > { %1188 = vmatpush3.bf16.msra.mxu1 %v1301_v21  ;;  %1167 = vmatprep.subr.bf16.mxu0 %v1302_v22 }
  0x27   : > { %1189 = vmatprep.subr.bf16.mxu1 %v1303_v23 }
  0x29   : > { %1168 = vmatpush3.bf16.msra.mxu0 %v1304_v24 }
  0x2a   : > { %1190 = vmatpush3.bf16.msra.mxu1 %v1305_v25  ;;  %1169 = vmatprep.subr.bf16.mxu0 %v1306_v26 }
  0x2b   : > { %1191 = vmatprep.subr.bf16.mxu1 %v1307_v27 }
  0x2d   : > { %1170 = vmatpush3.bf16.msra.mxu0 %v1308_v28 }
  0x2e   : > { %1192 = vmatpush3.bf16.msra.mxu1 %v1309_v29  ;;  %1171 = vmatprep.subr.bf16.mxu0 %v1310_v30 }
  0x2f   : > { %1193 = vmatprep.subr.bf16.mxu1 %v1311_v31  ;;  %v966_v31 = vld [vmem:[%s1534_s2 + $0x8] sm:$0xff] }
  0x31   : > { %1172 = vmatpush3.bf16.msra.mxu0 %v1312_v33  ;;  %v979_v33 = vld [vmem:[%s1535_s3] sm:$0xff] }
  0x32   : > { %1194 = vmatpush3.bf16.msra.mxu1 %v1313_v35  ;;  %1201 = vmatprep.subr.bf16.mxu0 %v1320_v36 }
  0x33   : > { %1232 = vmatprep.subr.bf16.mxu1 %v1376_v39 }
  0x34   : > { %782 = vmatmul.mubr.bf16.vlgmr.msra.gmra.mrb[0].mxu0 %v1314_v32  ;;  %v965_v32 = vld [vmem:[%s1534_s2] sm:$0xff] }
  0x35   : > { %823 = vmatmul.mubr.bf16.vlgmr.msra.gmra.mrb[0].mxu1 %v1317_v34  ;;  %1202 = vmatpush3.bf16.msra.mxu0 %v1321_v38  ;;  %v980_v34 = vld [vmem:[%s1535_s3 + $0x8] sm:$0xff] }
  0x36   : > { %1233 = vmatpush3.bf16.msra.mxu1 %v1322_v40  ;;  %1203 = vmatprep.subr.bf16.mxu0 %v1323_v41 }
  0x37   : > { %1234 = vmatprep.subr.bf16.mxu1 %v1376_v39  ;;  %863 = vmatprep.mubr.bf16.mxu0 %v1345_v37 }
  0x38   : > { %1248 = vmatprep.mubr.msk.bf16.mxu1 %vm1377_vm0, %v1376_v39 }
  0x39   : > { %1204 = vmatpush3.bf16.msra.mxu0 %v1324_v42 }
  0x3a   : > { %1235 = vmatpush3.bf16.msra.mxu1 %v1325_v43  ;;  %1205 = vmatprep.subr.bf16.mxu0 %v1326_v44 }
  0x3b   : > { %1236 = vmatprep.subr.bf16.mxu1 %v1376_v39 }
  0x3d   : > { %1206 = vmatpush3.bf16.msra.mxu0 %v1327_v45 }
  0x3e   : > { %1237 = vmatpush3.bf16.msra.mxu1 %v1328_v46  ;;  %1207 = vmatprep.subr.bf16.mxu0 %v1329_v47 }
  0x3f   : > { %1238 = vmatprep.subr.bf16.mxu1 %v1376_v39 }
  0x41   : > { %1208 = vmatpush3.bf16.msra.mxu0 %v1330_v48 }
  0x42   : > { %1239 = vmatpush3.bf16.msra.mxu1 %v1331_v49  ;;  %1209 = vmatprep.subr.bf16.mxu0 %v1332_v50 }
  0x43   : > { %1240 = vmatprep.subr.bf16.mxu1 %v1376_v39 }
  0x45   : > { %1210 = vmatpush3.bf16.msra.mxu0 %v1333_v51 }
  0x46   : > { %1241 = vmatpush3.bf16.msra.mxu1 %v1334_v52  ;;  %1211 = vmatprep.subr.bf16.mxu0 %v1335_v53 }
  0x47   : > { %1242 = vmatprep.subr.bf16.mxu1 %v1376_v39 }
  0x49   : > { %1212 = vmatpush3.bf16.msra.mxu0 %v1336_v54 }
  0x4a   : > { %1243 = vmatpush3.bf16.msra.mxu1 %v1337_v55  ;;  %1213 = vmatprep.subr.bf16.mxu0 %v1338_v56 }
  0x4b   : > { %1244 = vmatprep.subr.bf16.mxu1 %v1376_v39 }
  0x4d   : > { %1214 = vmatpush3.bf16.msra.mxu0 %v1339_v57 }
  0x4e   : > { %1245 = vmatpush3.bf16.msra.mxu1 %v1340_v58  ;;  %1215 = vmatprep.subr.bf16.mxu0 %v1341_v59 }
  0x4f   : > { %1246 = vmatprep.subr.bf16.mxu1 %v1376_v39 }
  0x51   : > { %1216 = vmatpush3.bf16.msra.mxu0 %v1342_v60 }
  0x52   : > { %1247 = vmatpush3.bf16.msra.mxu1 %v1346_v61 }
  0x54   : > { %864 = vmatmul.mubr.bf16.vlgmr.msra.gmra.mrb[4].mxu0 %v1343_v62 }
  0x55   : > { %1249 = vmatmul.mubr.bf16.vlgmr.msra.gmra.mrb[4].mxu1 %v1347_v63 }
 0x107   : > { %v1173_v1 = vpop.f32.mrb[0].mxu0 }
 0x108   : > { %v1195_v2 = vpop.f32.mrb[0].mxu1  ;;  %v1174_v3 = vpop.f32.mrb[1].mxu0 }
 0x109   : > { %v1175_v4 = vadd.f32 %v1174_v3, %v1173_v1  ;;  %v1196_v5 = vpop.f32.mrb[1].mxu1  ;;  %v1176_v6 = vpop.f32.mrb[2].mxu0 }
 0x10a   : > { %v1197_v7 = vadd.f32 %v1196_v5, %v1195_v2  ;;  %v1198_v8 = vpop.f32.mrb[2].mxu1  ;;  %v1177_v9 = vpop.f32.mrb[3].mxu0 }
 0x10b   : > { %v1178_v10 = vadd.f32 %v1177_v9, %v1176_v6  ;;  %v1199_v11 = vpop.f32.mrb[3].mxu1 }
 0x10c   : > { %v825_v12 = vadd.f32 %v1197_v7, %v1175_v4  ;;  %v1200_v13 = vadd.f32 %v1199_v11, %v1198_v8 }
 0x10e   : > { %v828_v14 = vadd.f32 %v1200_v13, %v1178_v10 }
 0x127   : > { %v1217_v15 = vpop.f32.mrb[4].mxu0 }
 0x128   : > { %v1218_v16 = vpop.f32.mrb[5].mxu0  ;;  %v906_v17 = vpop.f32.mrb[4].mxu1 }
 0x129   : > { %v1219_v18 = vadd.f32 %v1218_v16, %v1217_v15  ;;  %v1220_v19 = vpop.f32.mrb[6].mxu0  ;;  %v1250_v20 = vpop.f32.mrb[5].mxu1 }
 0x12a   : > { %v1221_v21 = vpop.f32.mrb[7].mxu0  ;;  %v909_v22 = vpop.f32.mrb[6].mxu1 }
 0x12b   : > { %v866_v23 = vadd.f32 %v1219_v18, %v825_v12  ;;  %v1222_v24 = vadd.f32 %v1221_v21, %v1220_v19  ;;  %v1251_v25 = vpop.f32.mrb[7].mxu1 }
 0x12d   : > { %v907_v26 = vadd.f32 %v906_v17, %v866_v23  ;;  %v869_v27 = vadd.f32 %v1222_v24, %v828_v14 }
 0x12f   : > { %v910_v28 = vadd.f32 %v909_v22, %v869_v27  ;;  %922 = vadd.xlane.f32.xlu0 %v907_v26  ;;  %v926_v29 = vmul.f32 %v907_v26, %v907_v26 }
 0x131   : > { %928 = vadd.xlane.f32.xlu1 %v926_v29  ;;  %v927_v30 = vmul.f32 %v910_v28, %v910_v28 }
 0x133   : > { %924 = vadd.xlane.f32.xlu0 %v910_v28 }
 0x135   : > { %930 = vadd.xlane.f32.xlu1 %v927_v30 }
 0x146   : > { %974 = vperm.xlu1 %1281, %v966_v31  }
 0x149   : > { %969 = vperm.xlu0 %1280, %v965_v32  }
 0x14a   : > { %983 = vperm.xlu1 %1281, %v979_v33  }
 0x14e   : > { %988 = vperm.xlu1 %1281, %v980_v34  }
 0x1bc   : > { %v923_v35 = vpop.xlane.xlu0 %922 }
 0x1be   : > { %v929_v36 = vpop.xlane.xlu1 %928 }
 0x1c0   : > { %v925_v37 = vpop.xlane.xlu0 %924 }
 0x1c1   : > { %v932_v38 = vadd.f32 %v925_v37, %v923_v35 }
 0x1c2   : > { %v931_v39 = vpop.xlane.xlu1 %930 }
 0x1c3   : > { %v933_v40 = vrot.slane %v932_v38, 4  ;;  %v940_v41 = vadd.f32 %v931_v39, %v929_v36 }
 0x1c5   : > { %v934_v42 = vadd.f32 %v933_v40, %v932_v38  ;;  %v941_v43 = vrot.slane %v940_v41, 4 }
 0x1c6   : > { %v975_v1 = vpop.permute.xlu1 %974 }
 0x1c7   : > { %v935_v44 = vrot.slane %v934_v42, 2  ;;  %v942_v45 = vadd.f32 %v941_v43, %v940_v41 }
 0x1c8   : > { %v970_v6 = vpop.permute.xlu0 %969 }
 0x1c9   : > { %v936_v46 = vadd.f32 %v935_v44, %v934_v42  ;;  %v943_v47 = vrot.slane %v942_v45, 2 }
 0x1ca   : > { %v984_v2 = vpop.permute.xlu1 %983 }
 0x1cb   : > { %v937_v48 = vrot.slane %v936_v46, 1  ;;  %v944_v49 = vadd.f32 %v943_v47, %v942_v45 }
 0x1cd   : > { %v938_v50 = vadd.f32 %v937_v48, %v936_v46  ;;  %v945_v51 = vrot.slane %v944_v49, 1 }
 0x1ce   : > { %v989_v11 = vpop.permute.xlu1 %988 }
 0x1cf   : > { %v939_v52 = vmul.f32 0.0009765625, %v938_v50  ;;  %v946_v53 = vadd.f32 %v945_v51, %v944_v49 }
 0x1d1   : > { %v948_v54 = vmul.f32 %v939_v52, %v939_v52  ;;  %v947_v55 = vmul.f32 0.0009765625, %v946_v53  ;;  %v960_v3 = vsub.f32 %v910_v28, %v939_v52  ;;  %v959_v4 = vsub.f32 %v907_v26, %v939_v52 }
 0x1d3   : > { %v949_v56 = vsub.f32 %v947_v55, %v948_v54 }
 0x1d5   : > { %v950_v57 = vmax.f32 %v949_v56, 0.0 }
 0x1d7   : > { %v951_v58 = vmul.f32 1.0009775, %v950_v57 }
 0x1d9   : > { %1348 = vrsqrt.f32 %v951_v58  ;;  %vm954_vm1 = vcmp.eq.f32.partialorder %v951_v58, inf  ;;  %v957_v61 = vand.u32 2147483648, %v951_v58  ;;  %vm956_vm2 = vcmp.eq.f32.partialorder %v951_v58, 0.0 }
 0x1e3   : > { %v1349_v59 = vpop.eup %1348 }
 0x1e4   : > { %v953_v60 = vmul.f32 %v1349_v59, %v951_v58 }
 0x1e6   : > { %v955_v62 = vsel %vm954_vm1, %v951_v58, %v953_v60 }
 0x1e7   : > { %v958_v63 = vsel %vm956_vm2, %v957_v61, %v955_v62 }
 0x1e8   : > { %v961_v0 = vadd.f32 1e-05, %v958_v63 }
 0x1ea   : > { %1350 = vrcp.f32 %v961_v0 }
 0x1f4   : > { %v1351_v5 = vpop.eup %1350 }
 0x1f5   : > { %v964_v7 = vmul.f32 %v1351_v5, %v960_v3  ;;  %v963_v8 = vmul.f32 %v1351_v5, %v959_v4 }
 0x1f7   : > { %v978_v9 = vmul.f32 %v975_v1, %v964_v7  ;;  %v977_v10 = vmul.f32 %v970_v6, %v963_v8 }
 0x1f9   : > { %v992_v12 = vadd.f32 %v989_v11, %v978_v9  ;;  %v991_v13 = vadd.f32 %v984_v2, %v977_v10 }
 0x1fb   : > { %v994_v14 = vmax.f32 %v992_v12, 0.0  ;;  %v993_v15 = vmax.f32 %v991_v13, 0.0 }
 0x1fd   : > { %996 = vst [vmem:[%s247_s26 + $0x8] sm:$0xff] %v994_v14  ;;  %995 = vst [vmem:[%s247_s26] sm:$0xff] %v993_v15 }
 0x1fe PF: > { %s14_s17 = sadd.s32 1, %s1374_s17   ;;  %s1537_s15 = smov %s1370_s16 }
 0x1ff   : > { %p11_p5 = scmp.ge.s32.totalorder %s14_s17, 4   ;;  %s1538_s16 = smov %s1540_s18 }
 0x201   :  { %13 = sbr.rel (!%p11_p5) target bundleno = 2 (0x2), region = 77 }

// kernel: munit_forward.32
= control target key start
LH: loop header
LB: loop body
LE: loop exit
PB: predicated region body
PF: predicated region fallthrough
CT: control target
= control target key end

     0   :  { %s1222_s15 = smov 0   ;;  %s1224_s16 = smov 0   ;;  %s1373_s0 = inlined_call_operand.vmem [shape: bf16[16,512], index: 0, kind: input, shape index: {}]   ;;  %s1374_s1 = inlined_call_operand.vmem [shape: bf16[2,512,256], index: 1, kind: input, shape index: {}]   ;;  %s1375_s2 = inlined_call_operand.vmem [shape: f32[16,1], index: 2, kind: input, shape index: {}]   ;;  %s1376_s3 = inlined_call_operand.vmem [shape: f32[16,1], index: 3, kind: input, shape index: {}]   ;;  %s1377_s4 = inlined_call_operand.vmem [shape: f32[2,16,256], index: 4, kind: output, shape index: {}]  }
   0x1   :  { %s1226_s17 = smov 0  }
   0x2 LB: > { %s26_s18 = sadd.s32 1, %s1190_s16  ;;  %p958_p0 = scmp.ge.s32.totalorder %s1194_s17, 1  ;;  %s1194_s17 = sphi %s1226_s17, %s14_s17   ;;  %s1190_s16 = sphi %s1224_s16, %s1379_s16   ;;  %s1186_s15 = sphi %s1222_s15, %s1378_s15  }
   0x3   : > { %p28_p1 = scmp.ge.s32.totalorder %s26_s18, 2  ;;  %p193_p2 = scmp.lt.s32.totalorder %s1194_s17, 3 }
   0x5   : > { %s1381_s18 = smov (%p28_p1, %s26_s18), 0  ;;  %p194_p3 = pnand %p958_p0, %p193_p2 }
   0x6   : > { %p236_p4 = scmp.lt.s32.totalorder (!%p194_p3), %s1186_s15, 1  ;;  %v1164_v0 = vld [vmem:[%s1373_s0 + $0x4] ss:$16 sps:$4 sm:$0xff] (!%p194_p3)   ;;  %v1167_v1 = vld [vmem:[%s1373_s0 + $0xc] ss:$16 sps:$4 sm:$0xff] (!%p194_p3)  }
   0x7   : > { %197 = sbr.rel (%p194_p3) target bundleno = 508 (0x1fc), region = 36  ;;  %703 = vmatprep.mubr.bf16.mxu1 (!%p194_p3), %v1164_v0  ;;  %746 = vmatprep.mubr.bf16.mxu0 (!%p194_p3), %v1167_v1 }
   0xe   : > { %s1383_s15 = smov (!%p236_p4, %s1186_s15), 1 }
   0xf   : > { %s1033_s23 = sshll.u32 %s1383_s15, 9  ;;  %s1034_s13 = sshll.u32 %s1383_s15, 5 }
  0x10   : > { %s1252_s26 = scalar_lea.vmem %s1374_s1, %s1033_s23  ;;  %s250_s20 = scalar_lea.vmem %s1377_s4, %s1034_s13 }
  0x11   : > { %v1066_v2 = vld [vmem:[%s1252_s26 + $0x4] ss:$8 sps:$4 sm:$0xff]   ;;  %v1070_v4 = vld [vmem:[%s1252_s26] ss:$8 sps:$4 sm:$0xff]   ;;  %v1072_v6 = vld [vmem:[%s1252_s26 + $0x14] ss:$8 sps:$4 sm:$0xff]  }
  0x12   : > { %v1068_v3 = vld [vmem:[%s1252_s26 + $0x104] ss:$8 sps:$4 sm:$0xff]   ;;  %671 = vmatprep.subr.bf16.mxu1 %v1066_v2  ;;  %v1071_v5 = vld [vmem:[%s1252_s26 + $0x100] ss:$8 sps:$4 sm:$0xff]   ;;  %v1074_v7 = vld [vmem:[%s1252_s26 + $0x114] ss:$8 sps:$4 sm:$0xff]  }
  0x13   : > { %714 = vmatprep.subr.bf16.mxu0 %v1068_v3  ;;  %672 = vmatpush1.bf16.msra.mxu1 %v1070_v4  ;;  %v1076_v8 = vld [vmem:[%s1252_s26 + $0x10] ss:$8 sps:$4 sm:$0xff]   ;;  %v1078_v10 = vld [vmem:[%s1252_s26 + $0x24] ss:$8 sps:$4 sm:$0xff]   ;;  %v1082_v12 = vld [vmem:[%s1252_s26 + $0x20] ss:$8 sps:$4 sm:$0xff]  }
  0x14   : > { %715 = vmatpush1.bf16.msra.mxu0 %v1071_v5  ;;  %673 = vmatprep.subr.bf16.mxu1 %v1072_v6  ;;  %v1077_v9 = vld [vmem:[%s1252_s26 + $0x110] ss:$8 sps:$4 sm:$0xff]   ;;  %v1080_v11 = vld [vmem:[%s1252_s26 + $0x124] ss:$8 sps:$4 sm:$0xff]   ;;  %v1083_v13 = vld [vmem:[%s1252_s26 + $0x120] ss:$8 sps:$4 sm:$0xff]  }
  0x15   : > { %716 = vmatprep.subr.bf16.mxu0 %v1074_v7  ;;  %v1084_v14 = vld [vmem:[%s1252_s26 + $0x34] ss:$8 sps:$4 sm:$0xff]   ;;  %v1088_v16 = vld [vmem:[%s1252_s26 + $0x30] ss:$8 sps:$4 sm:$0xff]   ;;  %v1090_v18 = vld [vmem:[%s1252_s26 + $0x44] ss:$8 sps:$4 sm:$0xff]  }
  0x16   : > { %v1086_v15 = vld [vmem:[%s1252_s26 + $0x134] ss:$8 sps:$4 sm:$0xff]   ;;  %v1089_v17 = vld [vmem:[%s1252_s26 + $0x130] ss:$8 sps:$4 sm:$0xff]   ;;  %v1092_v19 = vld [vmem:[%s1252_s26 + $0x144] ss:$8 sps:$4 sm:$0xff]  }
  0x17   : > { %674 = vmatpush1.bf16.msra.mxu1 %v1076_v8  ;;  %v1094_v20 = vld [vmem:[%s1252_s26 + $0x40] ss:$8 sps:$4 sm:$0xff]   ;;  %v1096_v22 = vld [vmem:[%s1252_s26 + $0x54] ss:$8 sps:$4 sm:$0xff]   ;;  %v1100_v24 = vld [vmem:[%s1252_s26 + $0x50] ss:$8 sps:$4 sm:$0xff]  }
  0x18   : > { %717 = vmatpush1.bf16.msra.mxu0 %v1077_v9  ;;  %675 = vmatprep.subr.bf16.mxu1 %v1078_v10  ;;  %v1095_v21 = vld [vmem:[%s1252_s26 + $0x140] ss:$8 sps:$4 sm:$0xff]   ;;  %v1098_v23 = vld [vmem:[%s1252_s26 + $0x154] ss:$8 sps:$4 sm:$0xff]   ;;  %v1101_v25 = vld [vmem:[%s1252_s26 + $0x150] ss:$8 sps:$4 sm:$0xff]  }
  0x19   : > { %718 = vmatprep.subr.bf16.mxu0 %v1080_v11  ;;  %v1102_v26 = vld [vmem:[%s1252_s26 + $0x64] ss:$8 sps:$4 sm:$0xff]   ;;  %v1106_v28 = vld [vmem:[%s1252_s26 + $0x60] ss:$8 sps:$4 sm:$0xff]   ;;  %v1108_v30 = vld [vmem:[%s1252_s26 + $0x74] ss:$8 sps:$4 sm:$0xff]  }
  0x1a   : > { %v1104_v27 = vld [vmem:[%s1252_s26 + $0x164] ss:$8 sps:$4 sm:$0xff]   ;;  %v1107_v29 = vld [vmem:[%s1252_s26 + $0x160] ss:$8 sps:$4 sm:$0xff]   ;;  %v1110_v31 = vld [vmem:[%s1252_s26 + $0x174] ss:$8 sps:$4 sm:$0xff]  }
  0x1b   : > { %676 = vmatpush1.bf16.msra.mxu1 %v1082_v12  ;;  %v1112_v32 = vld [vmem:[%s1252_s26 + $0x70] ss:$8 sps:$4 sm:$0xff]   ;;  %v1114_v34 = vld [vmem:[%s1252_s26 + $0x84] ss:$8 sps:$4 sm:$0xff]   ;;  %v1118_v36 = vld [vmem:[%s1252_s26 + $0x80] ss:$8 sps:$4 sm:$0xff]  }
  0x1c   : > { %719 = vmatpush1.bf16.msra.mxu0 %v1083_v13  ;;  %677 = vmatprep.subr.bf16.mxu1 %v1084_v14  ;;  %v1113_v33 = vld [vmem:[%s1252_s26 + $0x170] ss:$8 sps:$4 sm:$0xff]   ;;  %v1116_v35 = vld [vmem:[%s1252_s26 + $0x184] ss:$8 sps:$4 sm:$0xff]   ;;  %v1119_v37 = vld [vmem:[%s1252_s26 + $0x180] ss:$8 sps:$4 sm:$0xff]  }
  0x1d   : > { %720 = vmatprep.subr.bf16.mxu0 %v1086_v15  ;;  %v1120_v38 = vld [vmem:[%s1252_s26 + $0x94] ss:$8 sps:$4 sm:$0xff]   ;;  %v1124_v40 = vld [vmem:[%s1252_s26 + $0x90] ss:$8 sps:$4 sm:$0xff]   ;;  %v1126_v42 = vld [vmem:[%s1252_s26 + $0xa4] ss:$8 sps:$4 sm:$0xff]  }
  0x1e   : > { %v1122_v39 = vld [vmem:[%s1252_s26 + $0x194] ss:$8 sps:$4 sm:$0xff]   ;;  %v1125_v41 = vld [vmem:[%s1252_s26 + $0x190] ss:$8 sps:$4 sm:$0xff]   ;;  %v1128_v43 = vld [vmem:[%s1252_s26 + $0x1a4] ss:$8 sps:$4 sm:$0xff]  }
  0x1f   : > { %678 = vmatpush1.bf16.msra.mxu1 %v1088_v16  ;;  %v1130_v44 = vld [vmem:[%s1252_s26 + $0xa0] ss:$8 sps:$4 sm:$0xff]   ;;  %v1132_v46 = vld [vmem:[%s1252_s26 + $0xb4] ss:$8 sps:$4 sm:$0xff]   ;;  %v1136_v48 = vld [vmem:[%s1252_s26 + $0xb0] ss:$8 sps:$4 sm:$0xff]  }
  0x20   : > { %721 = vmatpush1.bf16.msra.mxu0 %v1089_v17  ;;  %679 = vmatprep.subr.bf16.mxu1 %v1090_v18  ;;  %v1131_v45 = vld [vmem:[%s1252_s26 + $0x1a0] ss:$8 sps:$4 sm:$0xff]   ;;  %v1134_v47 = vld [vmem:[%s1252_s26 + $0x1b4] ss:$8 sps:$4 sm:$0xff]   ;;  %v1137_v49 = vld [vmem:[%s1252_s26 + $0x1b0] ss:$8 sps:$4 sm:$0xff]  }
  0x21   : > { %722 = vmatprep.subr.bf16.mxu0 %v1092_v19  ;;  %v1138_v50 = vld [vmem:[%s1252_s26 + $0xc4] ss:$8 sps:$4 sm:$0xff]   ;;  %v1142_v52 = vld [vmem:[%s1252_s26 + $0xc0] ss:$8 sps:$4 sm:$0xff]   ;;  %v1144_v54 = vld [vmem:[%s1252_s26 + $0xd4] ss:$8 sps:$4 sm:$0xff]  }
  0x22   : > { %v1140_v51 = vld [vmem:[%s1252_s26 + $0x1c4] ss:$8 sps:$4 sm:$0xff]   ;;  %v1143_v53 = vld [vmem:[%s1252_s26 + $0x1c0] ss:$8 sps:$4 sm:$0xff]   ;;  %v1146_v55 = vld [vmem:[%s1252_s26 + $0x1d4] ss:$8 sps:$4 sm:$0xff]  }
  0x23   : > { %680 = vmatpush1.bf16.msra.mxu1 %v1094_v20  ;;  %v1148_v56 = vld [vmem:[%s1252_s26 + $0xd0] ss:$8 sps:$4 sm:$0xff]   ;;  %v1150_v58 = vld [vmem:[%s1252_s26 + $0xe4] ss:$8 sps:$4 sm:$0xff]   ;;  %v1154_v60 = vld [vmem:[%s1252_s26 + $0xe0] ss:$8 sps:$4 sm:$0xff]  }
  0x24   : > { %723 = vmatpush1.bf16.msra.mxu0 %v1095_v21  ;;  %681 = vmatprep.subr.bf16.mxu1 %v1096_v22  ;;  %v1149_v57 = vld [vmem:[%s1252_s26 + $0x1d0] ss:$8 sps:$4 sm:$0xff]   ;;  %v1152_v59 = vld [vmem:[%s1252_s26 + $0x1e4] ss:$8 sps:$4 sm:$0xff]   ;;  %v1155_v61 = vld [vmem:[%s1252_s26 + $0x1e0] ss:$8 sps:$4 sm:$0xff]  }
  0x25   : > { %724 = vmatprep.subr.bf16.mxu0 %v1098_v23  ;;  %v1156_v62 = vld [vmem:[%s1252_s26 + $0xf4] ss:$8 sps:$4 sm:$0xff]   ;;  %v1160_v0 = vld [vmem:[%s1252_s26 + $0xf0] ss:$8 sps:$4 sm:$0xff]   ;;  %v1196_v4 = vmov 0  }
  0x26   : > { %v1158_v63 = vld [vmem:[%s1252_s26 + $0x1f4] ss:$8 sps:$4 sm:$0xff]   ;;  %v1161_v1 = vld [vmem:[%s1252_s26 + $0x1f0] ss:$8 sps:$4 sm:$0xff]   ;;  %1065 = vset.pattern.permute.xlu1 %v1196_v4  ;;  %1064 = vset.pattern.permute.xlu0 %v1196_v4 }
  0x27   : > { %682 = vmatpush1.bf16.msra.mxu1 %v1100_v24  ;;  %v1162_v2 = vld [vmem:[%s1373_s0] ss:$16 sps:$4 sm:$0xff]   ;;  %v1165_v3 = vld [vmem:[%s1373_s0 + $0x8] ss:$16 sps:$4 sm:$0xff]  }
  0x28   : > { %725 = vmatpush1.bf16.msra.mxu0 %v1101_v25  ;;  %683 = vmatprep.subr.bf16.mxu1 %v1102_v26  ;;  %v826_v25 = vld [vmem:[%s1375_s2 + $0x8] sm:$0xff]  ;;  %v825_v26 = vld [vmem:[%s1375_s2] sm:$0xff] }
  0x29   : > { %726 = vmatprep.subr.bf16.mxu0 %v1104_v27  ;;  %v841_v27 = vld [vmem:[%s1376_s3] sm:$0xff] }
  0x2b   : > { %684 = vmatpush1.bf16.msra.mxu1 %v1106_v28  ;;  %v842_v28 = vld [vmem:[%s1376_s3 + $0x8] sm:$0xff] }
  0x2c   : > { %727 = vmatpush1.bf16.msra.mxu0 %v1107_v29  ;;  %685 = vmatprep.subr.bf16.mxu1 %v1108_v30 }
  0x2d   : > { %728 = vmatprep.subr.bf16.mxu0 %v1110_v31 }
  0x2f   : > { %686 = vmatpush1.bf16.msra.mxu1 %v1112_v32 }
  0x30   : > { %729 = vmatpush1.bf16.msra.mxu0 %v1113_v33  ;;  %687 = vmatprep.subr.bf16.mxu1 %v1114_v34 }
  0x31   : > { %730 = vmatprep.subr.bf16.mxu0 %v1116_v35 }
  0x33   : > { %688 = vmatpush1.bf16.msra.mxu1 %v1118_v36 }
  0x34   : > { %731 = vmatpush1.bf16.msra.mxu0 %v1119_v37  ;;  %689 = vmatprep.subr.bf16.mxu1 %v1120_v38 }
  0x35   : > { %732 = vmatprep.subr.bf16.mxu0 %v1122_v39 }
  0x37   : > { %690 = vmatpush1.bf16.msra.mxu1 %v1124_v40 }
  0x38   : > { %733 = vmatpush1.bf16.msra.mxu0 %v1125_v41  ;;  %691 = vmatprep.subr.bf16.mxu1 %v1126_v42 }
  0x39   : > { %734 = vmatprep.subr.bf16.mxu0 %v1128_v43 }
  0x3b   : > { %692 = vmatpush1.bf16.msra.mxu1 %v1130_v44 }
  0x3c   : > { %735 = vmatpush1.bf16.msra.mxu0 %v1131_v45  ;;  %693 = vmatprep.subr.bf16.mxu1 %v1132_v46 }
  0x3d   : > { %736 = vmatprep.subr.bf16.mxu0 %v1134_v47 }
  0x3f   : > { %694 = vmatpush1.bf16.msra.mxu1 %v1136_v48 }
  0x40   : > { %737 = vmatpush1.bf16.msra.mxu0 %v1137_v49  ;;  %695 = vmatprep.subr.bf16.mxu1 %v1138_v50 }
  0x41   : > { %738 = vmatprep.subr.bf16.mxu0 %v1140_v51 }
  0x43   : > { %696 = vmatpush1.bf16.msra.mxu1 %v1142_v52 }
  0x44   : > { %739 = vmatpush1.bf16.msra.mxu0 %v1143_v53  ;;  %697 = vmatprep.subr.bf16.mxu1 %v1144_v54 }
  0x45   : > { %740 = vmatprep.subr.bf16.mxu0 %v1146_v55 }
  0x47   : > { %698 = vmatpush1.bf16.msra.mxu1 %v1148_v56 }
  0x48   : > { %741 = vmatpush1.bf16.msra.mxu0 %v1149_v57  ;;  %699 = vmatprep.subr.bf16.mxu1 %v1150_v58 }
  0x49   : > { %742 = vmatprep.subr.bf16.mxu0 %v1152_v59 }
  0x4b   : > { %700 = vmatpush1.bf16.msra.mxu1 %v1154_v60 }
  0x4c   : > { %743 = vmatpush1.bf16.msra.mxu0 %v1155_v61  ;;  %701 = vmatprep.subr.bf16.mxu1 %v1156_v62 }
  0x4d   : > { %744 = vmatprep.subr.bf16.mxu0 %v1158_v63 }
  0x4f   : > { %702 = vmatpush1.bf16.msra.mxu1 %v1160_v0 }
  0x50   : > { %745 = vmatpush1.bf16.msra.mxu0 %v1161_v1 }
  0x52   : > { %704 = vmatmul.mubr.bf16.vlgmr.msra.gmra.mrb[0].mxu1 %v1162_v2 }
  0x53   : > { %747 = vmatmul.mubr.bf16.vlgmr.msra.gmra.mrb[0].mxu0 %v1165_v3 }
 0x125   : > { %v705_v5 = vpop.f32.mrb[0].mxu1 }
 0x126   : > { %v748_v6 = vpop.f32.mrb[0].mxu0  ;;  %v707_v8 = vpop.f32.mrb[1].mxu1 }
 0x127   : > { %v1324_v7 = vadd.f32 %v748_v6, %v705_v5  ;;  %v750_v9 = vpop.f32.mrb[1].mxu0  ;;  %v709_v11 = vpop.f32.mrb[2].mxu1 }
 0x128   : > { %v1326_v10 = vadd.f32 %v750_v9, %v707_v8  ;;  %v752_v12 = vpop.f32.mrb[2].mxu0  ;;  %v711_v14 = vpop.f32.mrb[3].mxu1 }
 0x129   : > { %v1328_v13 = vadd.f32 %v752_v12, %v709_v11  ;;  %v754_v15 = vpop.f32.mrb[3].mxu0  ;;  %v778_v16 = vmul.f32 %v1324_v7, %v1324_v7 }
 0x12a   : > { %v1332_v17 = vadd.f32 %v754_v15, %v711_v14  ;;  %v772_v18 = vadd.f32 %v1326_v10, %v1324_v7  ;;  %v779_v19 = vmul.f32 %v1326_v10, %v1326_v10 }
 0x12b   : > { %v780_v21 = vmul.f32 %v1328_v13, %v1328_v13 }
 0x12c   : > { %773 = vadd.xlane.f32.xlu0 %v772_v18  ;;  %v782_v20 = vadd.f32 %v779_v19, %v778_v16  ;;  %v781_v22 = vmul.f32 %v1332_v17, %v1332_v17  ;;  %v775_v23 = vadd.f32 %v1332_v17, %v1328_v13 }
 0x12e   : > { %783 = vadd.xlane.f32.xlu1 %v782_v20  ;;  %v785_v24 = vadd.f32 %v781_v22, %v780_v21 }
 0x130   : > { %776 = vadd.xlane.f32.xlu0 %v775_v23 }
 0x132   : > { %786 = vadd.xlane.f32.xlu1 %v785_v24 }
 0x143   : > { %834 = vperm.xlu1 %1065, %v826_v25  }
 0x146   : > { %829 = vperm.xlu0 %1064, %v825_v26  }
 0x147   : > { %845 = vperm.xlu1 %1065, %v841_v27  }
 0x14b   : > { %850 = vperm.xlu1 %1065, %v842_v28  }
 0x1b9   : > { %v774_v29 = vpop.xlane.xlu0 %773 }
 0x1bb   : > { %v784_v30 = vpop.xlane.xlu1 %783 }
 0x1bd   : > { %v777_v31 = vpop.xlane.xlu0 %776 }
 0x1be   : > { %v788_v32 = vadd.f32 %v777_v31, %v774_v29 }
 0x1bf   : > { %v787_v33 = vpop.xlane.xlu1 %786 }
 0x1c0   : > { %v789_v34 = vrot.slane %v788_v32, 4  ;;  %v796_v35 = vadd.f32 %v787_v33, %v784_v30 }
 0x1c2   : > { %v790_v36 = vadd.f32 %v789_v34, %v788_v32  ;;  %v797_v37 = vrot.slane %v796_v35, 4 }
 0x1c3   : > { %v835_v59 = vpop.permute.xlu1 %834 }
 0x1c4   : > { %v791_v38 = vrot.slane %v790_v36, 2  ;;  %v798_v39 = vadd.f32 %v797_v37, %v796_v35 }
 0x1c5   : > { %v830_v2 = vpop.permute.xlu0 %829 }
 0x1c6   : > { %v792_v40 = vadd.f32 %v791_v38, %v790_v36  ;;  %v799_v41 = vrot.slane %v798_v39, 2 }
 0x1c7   : > { %v846_v60 = vpop.permute.xlu1 %845 }
 0x1c8   : > { %v793_v42 = vrot.slane %v792_v40, 1  ;;  %v800_v43 = vadd.f32 %v799_v41, %v798_v39 }
 0x1ca   : > { %v794_v44 = vadd.f32 %v793_v42, %v792_v40  ;;  %v801_v45 = vrot.slane %v800_v43, 1 }
 0x1cb   : > { %v851_v14 = vpop.permute.xlu1 %850 }
 0x1cc   : > { %v795_v46 = vmul.f32 0.00048828125, %v794_v44  ;;  %v802_v47 = vadd.f32 %v801_v45, %v800_v43 }
 0x1ce   : > { %v803_v48 = vmul.f32 0.00048828125, %v802_v47  ;;  %v804_v49 = vmul.f32 %v795_v46, %v795_v46  ;;  %v817_v61 = vsub.f32 %v1328_v13, %v795_v46  ;;  %v818_v62 = vsub.f32 %v1332_v17, %v795_v46 }
 0x1cf   : > { %v815_v63 = vsub.f32 %v1324_v7, %v795_v46  ;;  %v816_v0 = vsub.f32 %v1326_v10, %v795_v46 }
 0x1d0   : > { %v805_v50 = vsub.f32 %v803_v48, %v804_v49 }
 0x1d2   : > { %v806_v51 = vmax.f32 %v805_v50, 0.0 }
 0x1d4   : > { %v807_v52 = vmul.f32 1.0004885, %v806_v51 }
 0x1d6   : > { %1168 = vrsqrt.f32 %v807_v52  ;;  %vm810_vm0 = vcmp.eq.f32.partialorder %v807_v52, inf  ;;  %v813_v55 = vand.u32 2147483648, %v807_v52  ;;  %vm812_vm1 = vcmp.eq.f32.partialorder %v807_v52, 0.0 }
 0x1e0   : > { %v1169_v53 = vpop.eup %1168 }
 0x1e1   : > { %v809_v54 = vmul.f32 %v1169_v53, %v807_v52 }
 0x1e3   : > { %v811_v56 = vsel %vm810_vm0, %v807_v52, %v809_v54 }
 0x1e4   : > { %v814_v57 = vsel %vm812_vm1, %v813_v55, %v811_v56 }
 0x1e5   : > { %v819_v58 = vadd.f32 1e-05, %v814_v57 }
 0x1e7   : > { %1170 = vrcp.f32 %v819_v58 }
 0x1f1   : > { %v1171_v1 = vpop.eup %1170 }
 0x1f2   : > { %v823_v3 = vmul.f32 %v1171_v1, %v817_v61  ;;  %v824_v4 = vmul.f32 %v1171_v1, %v818_v62  ;;  %v821_v5 = vmul.f32 %v1171_v1, %v815_v63  ;;  %v822_v6 = vmul.f32 %v1171_v1, %v816_v0 }
 0x1f4   : > { %v839_v8 = vmul.f32 %v835_v59, %v823_v3  ;;  %v840_v9 = vmul.f32 %v835_v59, %v824_v4  ;;  %v837_v11 = vmul.f32 %v830_v2, %v821_v5  ;;  %v838_v12 = vmul.f32 %v830_v2, %v822_v6 }
 0x1f6   : > { %v855_v15 = vadd.f32 %v851_v14, %v839_v8  ;;  %v856_v13 = vadd.f32 %v851_v14, %v840_v9  ;;  %v853_v16 = vadd.f32 %v846_v60, %v837_v11  ;;  %v854_v17 = vadd.f32 %v846_v60, %v838_v12 }
 0x1f8   : > { %v859_v7 = vmax.f32 %v855_v15, 0.0  ;;  %v860_v10 = vmax.f32 %v856_v13, 0.0  ;;  %v857_v18 = vmax.f32 %v853_v16, 0.0  ;;  %v858_v19 = vmax.f32 %v854_v17, 0.0 }
 0x1fa   : > { %863 = vst [vmem:[%s250_s20 + $0x10] sm:$0xff] %v859_v7  ;;  %864 = vst [vmem:[%s250_s20 + $0x18] sm:$0xff] %v860_v10 }
 0x1fb   : > { %861 = vst [vmem:[%s250_s20] sm:$0xff] %v857_v18  ;;  %862 = vst [vmem:[%s250_s20 + $0x8] sm:$0xff] %v858_v19 }
 0x1fc PF: > { %s14_s17 = sadd.s32 1, %s1194_s17   ;;  %s1378_s15 = smov %s1190_s16 }
 0x1fd   : > { %p11_p5 = scmp.ge.s32.totalorder %s14_s17, 4   ;;  %s1379_s16 = smov %s1381_s18 }
 0x1ff   :  { %13 = sbr.rel (!%p11_p5) target bundleno = 2 (0x2), region = 77 }

// kernel: munit_forward.33
= control target key start
LH: loop header
LB: loop body
LE: loop exit
PB: predicated region body
PF: predicated region fallthrough
CT: control target
= control target key end

     0   :  { %s1073_s9 = smov 0   ;;  %s1075_s10 = smov 0   ;;  %s1188_s0 = inlined_call_operand.vmem [shape: bf16[16,512], index: 0, kind: input, shape index: {}]   ;;  %s1189_s1 = inlined_call_operand.vmem [shape: bf16[2,512,256], index: 1, kind: input, shape index: {}]   ;;  %s1190_s2 = inlined_call_operand.vmem [shape: f32[2,16,256], index: 2, kind: output, shape index: {}]  }
   0x1   :  { %s1077_s11 = smov 0  }
   0x2 LB: > { %s24_s12 = sadd.s32 1, %s1052_s10  ;;  %p819_p0 = scmp.ge.s32.totalorder %s1056_s11, 1  ;;  %s1056_s11 = sphi %s1077_s11, %s12_s11   ;;  %s1052_s10 = sphi %s1075_s10, %s1192_s10   ;;  %s1048_s9 = sphi %s1073_s9, %s1191_s9  }
   0x3   : > { %p26_p1 = scmp.ge.s32.totalorder %s24_s12, 2  ;;  %p143_p2 = scmp.lt.s32.totalorder %s1056_s11, 3 }
   0x5   : > { %s1194_s12 = smov (%p26_p1, %s24_s12), 0  ;;  %p144_p3 = pnand %p819_p0, %p143_p2 }
   0x6   : > { %p182_p4 = scmp.lt.s32.totalorder (!%p144_p3), %s1048_s9, 1  ;;  %v1022_v0 = vld [vmem:[%s1188_s0 + $0x4] ss:$16 sps:$4 sm:$0xff] (!%p144_p3)   ;;  %v1025_v1 = vld [vmem:[%s1188_s0 + $0xc] ss:$16 sps:$4 sm:$0xff] (!%p144_p3)  }
   0x7   : > { %147 = sbr.rel (%p144_p3) target bundleno = 312 (0x138), region = 28  ;;  %649 = vmatprep.mubr.bf16.mxu1 (!%p144_p3), %v1022_v0  ;;  %692 = vmatprep.mubr.bf16.mxu0 (!%p144_p3), %v1025_v1 }
   0xe   : > { %s1196_s9 = smov (!%p182_p4, %s1048_s9), 1 }
   0xf   : > { %s894_s17 = sshll.u32 %s1196_s9, 9  ;;  %s895_s25 = sshll.u32 %s1196_s9, 5 }
  0x10   : > { %s1103_s20 = scalar_lea.vmem %s1189_s1, %s894_s17  ;;  %s196_s28 = scalar_lea.vmem %s1190_s2, %s895_s25 }
  0x11   : > { %v924_v2 = vld [vmem:[%s1103_s20 + $0x4] ss:$8 sps:$4 sm:$0xff]   ;;  %v928_v4 = vld [vmem:[%s1103_s20] ss:$8 sps:$4 sm:$0xff]   ;;  %v930_v6 = vld [vmem:[%s1103_s20 + $0x14] ss:$8 sps:$4 sm:$0xff]  }
  0x12   : > { %v926_v3 = vld [vmem:[%s1103_s20 + $0x104] ss:$8 sps:$4 sm:$0xff]   ;;  %617 = vmatprep.subr.bf16.mxu1 %v924_v2  ;;  %v929_v5 = vld [vmem:[%s1103_s20 + $0x100] ss:$8 sps:$4 sm:$0xff]   ;;  %v932_v7 = vld [vmem:[%s1103_s20 + $0x114] ss:$8 sps:$4 sm:$0xff]  }
  0x13   : > { %660 = vmatprep.subr.bf16.mxu0 %v926_v3  ;;  %618 = vmatpush1.bf16.msra.mxu1 %v928_v4  ;;  %v934_v8 = vld [vmem:[%s1103_s20 + $0x10] ss:$8 sps:$4 sm:$0xff]   ;;  %v936_v10 = vld [vmem:[%s1103_s20 + $0x24] ss:$8 sps:$4 sm:$0xff]   ;;  %v940_v12 = vld [vmem:[%s1103_s20 + $0x20] ss:$8 sps:$4 sm:$0xff]  }
  0x14   : > { %661 = vmatpush1.bf16.msra.mxu0 %v929_v5  ;;  %619 = vmatprep.subr.bf16.mxu1 %v930_v6  ;;  %v935_v9 = vld [vmem:[%s1103_s20 + $0x110] ss:$8 sps:$4 sm:$0xff]   ;;  %v938_v11 = vld [vmem:[%s1103_s20 + $0x124] ss:$8 sps:$4 sm:$0xff]   ;;  %v941_v13 = vld [vmem:[%s1103_s20 + $0x120] ss:$8 sps:$4 sm:$0xff]  }
  0x15   : > { %662 = vmatprep.subr.bf16.mxu0 %v932_v7  ;;  %v942_v14 = vld [vmem:[%s1103_s20 + $0x34] ss:$8 sps:$4 sm:$0xff]   ;;  %v946_v16 = vld [vmem:[%s1103_s20 + $0x30] ss:$8 sps:$4 sm:$0xff]   ;;  %v948_v18 = vld [vmem:[%s1103_s20 + $0x44] ss:$8 sps:$4 sm:$0xff]  }
  0x16   : > { %v944_v15 = vld [vmem:[%s1103_s20 + $0x134] ss:$8 sps:$4 sm:$0xff]   ;;  %v947_v17 = vld [vmem:[%s1103_s20 + $0x130] ss:$8 sps:$4 sm:$0xff]   ;;  %v950_v19 = vld [vmem:[%s1103_s20 + $0x144] ss:$8 sps:$4 sm:$0xff]  }
  0x17   : > { %620 = vmatpush1.bf16.msra.mxu1 %v934_v8  ;;  %v952_v20 = vld [vmem:[%s1103_s20 + $0x40] ss:$8 sps:$4 sm:$0xff]   ;;  %v954_v22 = vld [vmem:[%s1103_s20 + $0x54] ss:$8 sps:$4 sm:$0xff]   ;;  %v958_v24 = vld [vmem:[%s1103_s20 + $0x50] ss:$8 sps:$4 sm:$0xff]  }
  0x18   : > { %663 = vmatpush1.bf16.msra.mxu0 %v935_v9  ;;  %621 = vmatprep.subr.bf16.mxu1 %v936_v10  ;;  %v953_v21 = vld [vmem:[%s1103_s20 + $0x140] ss:$8 sps:$4 sm:$0xff]   ;;  %v956_v23 = vld [vmem:[%s1103_s20 + $0x154] ss:$8 sps:$4 sm:$0xff]   ;;  %v959_v25 = vld [vmem:[%s1103_s20 + $0x150] ss:$8 sps:$4 sm:$0xff]  }
  0x19   : > { %664 = vmatprep.subr.bf16.mxu0 %v938_v11  ;;  %v960_v26 = vld [vmem:[%s1103_s20 + $0x64] ss:$8 sps:$4 sm:$0xff]   ;;  %v964_v28 = vld [vmem:[%s1103_s20 + $0x60] ss:$8 sps:$4 sm:$0xff]   ;;  %v966_v30 = vld [vmem:[%s1103_s20 + $0x74] ss:$8 sps:$4 sm:$0xff]  }
  0x1a   : > { %v962_v27 = vld [vmem:[%s1103_s20 + $0x164] ss:$8 sps:$4 sm:$0xff]   ;;  %v965_v29 = vld [vmem:[%s1103_s20 + $0x160] ss:$8 sps:$4 sm:$0xff]   ;;  %v968_v31 = vld [vmem:[%s1103_s20 + $0x174] ss:$8 sps:$4 sm:$0xff]  }
  0x1b   : > { %622 = vmatpush1.bf16.msra.mxu1 %v940_v12  ;;  %v970_v32 = vld [vmem:[%s1103_s20 + $0x70] ss:$8 sps:$4 sm:$0xff]   ;;  %v972_v34 = vld [vmem:[%s1103_s20 + $0x84] ss:$8 sps:$4 sm:$0xff]   ;;  %v976_v36 = vld [vmem:[%s1103_s20 + $0x80] ss:$8 sps:$4 sm:$0xff]  }
  0x1c   : > { %665 = vmatpush1.bf16.msra.mxu0 %v941_v13  ;;  %623 = vmatprep.subr.bf16.mxu1 %v942_v14  ;;  %v971_v33 = vld [vmem:[%s1103_s20 + $0x170] ss:$8 sps:$4 sm:$0xff]   ;;  %v974_v35 = vld [vmem:[%s1103_s20 + $0x184] ss:$8 sps:$4 sm:$0xff]   ;;  %v977_v37 = vld [vmem:[%s1103_s20 + $0x180] ss:$8 sps:$4 sm:$0xff]  }
  0x1d   : > { %666 = vmatprep.subr.bf16.mxu0 %v944_v15  ;;  %v978_v38 = vld [vmem:[%s1103_s20 + $0x94] ss:$8 sps:$4 sm:$0xff]   ;;  %v982_v40 = vld [vmem:[%s1103_s20 + $0x90] ss:$8 sps:$4 sm:$0xff]   ;;  %v984_v42 = vld [vmem:[%s1103_s20 + $0xa4] ss:$8 sps:$4 sm:$0xff]  }
  0x1e   : > { %v980_v39 = vld [vmem:[%s1103_s20 + $0x194] ss:$8 sps:$4 sm:$0xff]   ;;  %v983_v41 = vld [vmem:[%s1103_s20 + $0x190] ss:$8 sps:$4 sm:$0xff]   ;;  %v986_v43 = vld [vmem:[%s1103_s20 + $0x1a4] ss:$8 sps:$4 sm:$0xff]  }
  0x1f   : > { %624 = vmatpush1.bf16.msra.mxu1 %v946_v16  ;;  %v988_v44 = vld [vmem:[%s1103_s20 + $0xa0] ss:$8 sps:$4 sm:$0xff]   ;;  %v990_v46 = vld [vmem:[%s1103_s20 + $0xb4] ss:$8 sps:$4 sm:$0xff]   ;;  %v994_v48 = vld [vmem:[%s1103_s20 + $0xb0] ss:$8 sps:$4 sm:$0xff]  }
  0x20   : > { %667 = vmatpush1.bf16.msra.mxu0 %v947_v17  ;;  %625 = vmatprep.subr.bf16.mxu1 %v948_v18  ;;  %v989_v45 = vld [vmem:[%s1103_s20 + $0x1a0] ss:$8 sps:$4 sm:$0xff]   ;;  %v992_v47 = vld [vmem:[%s1103_s20 + $0x1b4] ss:$8 sps:$4 sm:$0xff]   ;;  %v995_v49 = vld [vmem:[%s1103_s20 + $0x1b0] ss:$8 sps:$4 sm:$0xff]  }
  0x21   : > { %668 = vmatprep.subr.bf16.mxu0 %v950_v19  ;;  %v996_v50 = vld [vmem:[%s1103_s20 + $0xc4] ss:$8 sps:$4 sm:$0xff]   ;;  %v1000_v52 = vld [vmem:[%s1103_s20 + $0xc0] ss:$8 sps:$4 sm:$0xff]   ;;  %v1002_v54 = vld [vmem:[%s1103_s20 + $0xd4] ss:$8 sps:$4 sm:$0xff]  }
  0x22   : > { %v998_v51 = vld [vmem:[%s1103_s20 + $0x1c4] ss:$8 sps:$4 sm:$0xff]   ;;  %v1001_v53 = vld [vmem:[%s1103_s20 + $0x1c0] ss:$8 sps:$4 sm:$0xff]   ;;  %v1004_v55 = vld [vmem:[%s1103_s20 + $0x1d4] ss:$8 sps:$4 sm:$0xff]  }
  0x23   : > { %626 = vmatpush1.bf16.msra.mxu1 %v952_v20  ;;  %v1006_v56 = vld [vmem:[%s1103_s20 + $0xd0] ss:$8 sps:$4 sm:$0xff]   ;;  %v1008_v58 = vld [vmem:[%s1103_s20 + $0xe4] ss:$8 sps:$4 sm:$0xff]   ;;  %v1012_v60 = vld [vmem:[%s1103_s20 + $0xe0] ss:$8 sps:$4 sm:$0xff]  }
  0x24   : > { %669 = vmatpush1.bf16.msra.mxu0 %v953_v21  ;;  %627 = vmatprep.subr.bf16.mxu1 %v954_v22  ;;  %v1007_v57 = vld [vmem:[%s1103_s20 + $0x1d0] ss:$8 sps:$4 sm:$0xff]   ;;  %v1010_v59 = vld [vmem:[%s1103_s20 + $0x1e4] ss:$8 sps:$4 sm:$0xff]   ;;  %v1013_v61 = vld [vmem:[%s1103_s20 + $0x1e0] ss:$8 sps:$4 sm:$0xff]  }
  0x25   : > { %670 = vmatprep.subr.bf16.mxu0 %v956_v23  ;;  %v1014_v62 = vld [vmem:[%s1103_s20 + $0xf4] ss:$8 sps:$4 sm:$0xff]   ;;  %v1018_v0 = vld [vmem:[%s1103_s20 + $0xf0] ss:$8 sps:$4 sm:$0xff]  }
  0x26   : > { %v1016_v63 = vld [vmem:[%s1103_s20 + $0x1f4] ss:$8 sps:$4 sm:$0xff]   ;;  %v1019_v1 = vld [vmem:[%s1103_s20 + $0x1f0] ss:$8 sps:$4 sm:$0xff]  }
  0x27   : > { %628 = vmatpush1.bf16.msra.mxu1 %v958_v24  ;;  %v1020_v2 = vld [vmem:[%s1188_s0] ss:$16 sps:$4 sm:$0xff]   ;;  %v1023_v3 = vld [vmem:[%s1188_s0 + $0x8] ss:$16 sps:$4 sm:$0xff]  }
  0x28   : > { %671 = vmatpush1.bf16.msra.mxu0 %v959_v25  ;;  %629 = vmatprep.subr.bf16.mxu1 %v960_v26 }
  0x29   : > { %672 = vmatprep.subr.bf16.mxu0 %v962_v27 }
  0x2b   : > { %630 = vmatpush1.bf16.msra.mxu1 %v964_v28 }
  0x2c   : > { %673 = vmatpush1.bf16.msra.mxu0 %v965_v29  ;;  %631 = vmatprep.subr.bf16.mxu1 %v966_v30 }
  0x2d   : > { %674 = vmatprep.subr.bf16.mxu0 %v968_v31 }
  0x2f   : > { %632 = vmatpush1.bf16.msra.mxu1 %v970_v32 }
  0x30   : > { %675 = vmatpush1.bf16.msra.mxu0 %v971_v33  ;;  %633 = vmatprep.subr.bf16.mxu1 %v972_v34 }
  0x31   : > { %676 = vmatprep.subr.bf16.mxu0 %v974_v35 }
  0x33   : > { %634 = vmatpush1.bf16.msra.mxu1 %v976_v36 }
  0x34   : > { %677 = vmatpush1.bf16.msra.mxu0 %v977_v37  ;;  %635 = vmatprep.subr.bf16.mxu1 %v978_v38 }
  0x35   : > { %678 = vmatprep.subr.bf16.mxu0 %v980_v39 }
  0x37   : > { %636 = vmatpush1.bf16.msra.mxu1 %v982_v40 }
  0x38   : > { %679 = vmatpush1.bf16.msra.mxu0 %v983_v41  ;;  %637 = vmatprep.subr.bf16.mxu1 %v984_v42 }
  0x39   : > { %680 = vmatprep.subr.bf16.mxu0 %v986_v43 }
  0x3b   : > { %638 = vmatpush1.bf16.msra.mxu1 %v988_v44 }
  0x3c   : > { %681 = vmatpush1.bf16.msra.mxu0 %v989_v45  ;;  %639 = vmatprep.subr.bf16.mxu1 %v990_v46 }
  0x3d   : > { %682 = vmatprep.subr.bf16.mxu0 %v992_v47 }
  0x3f   : > { %640 = vmatpush1.bf16.msra.mxu1 %v994_v48 }
  0x40   : > { %683 = vmatpush1.bf16.msra.mxu0 %v995_v49  ;;  %641 = vmatprep.subr.bf16.mxu1 %v996_v50 }
  0x41   : > { %684 = vmatprep.subr.bf16.mxu0 %v998_v51 }
  0x43   : > { %642 = vmatpush1.bf16.msra.mxu1 %v1000_v52 }
  0x44   : > { %685 = vmatpush1.bf16.msra.mxu0 %v1001_v53  ;;  %643 = vmatprep.subr.bf16.mxu1 %v1002_v54 }
  0x45   : > { %686 = vmatprep.subr.bf16.mxu0 %v1004_v55 }
  0x47   : > { %644 = vmatpush1.bf16.msra.mxu1 %v1006_v56 }
  0x48   : > { %687 = vmatpush1.bf16.msra.mxu0 %v1007_v57  ;;  %645 = vmatprep.subr.bf16.mxu1 %v1008_v58 }
  0x49   : > { %688 = vmatprep.subr.bf16.mxu0 %v1010_v59 }
  0x4b   : > { %646 = vmatpush1.bf16.msra.mxu1 %v1012_v60 }
  0x4c   : > { %689 = vmatpush1.bf16.msra.mxu0 %v1013_v61  ;;  %647 = vmatprep.subr.bf16.mxu1 %v1014_v62 }
  0x4d   : > { %690 = vmatprep.subr.bf16.mxu0 %v1016_v63 }
  0x4f   : > { %648 = vmatpush1.bf16.msra.mxu1 %v1018_v0 }
  0x50   : > { %691 = vmatpush1.bf16.msra.mxu0 %v1019_v1 }
  0x52   : > { %650 = vmatmul.mubr.bf16.vlgmr.msra.gmra.mrb[0].mxu1 %v1020_v2 }
  0x53   : > { %693 = vmatmul.mubr.bf16.vlgmr.msra.gmra.mrb[0].mxu0 %v1023_v3 }
 0x125   : > { %v651_v4 = vpop.f32.mrb[0].mxu1 }
 0x126   : > { %v694_v5 = vpop.f32.mrb[0].mxu0  ;;  %v653_v7 = vpop.f32.mrb[1].mxu1 }
 0x127   : > { %v695_v6 = vadd.f32 %v694_v5, %v651_v4  ;;  %v696_v8 = vpop.f32.mrb[1].mxu0  ;;  %v655_v10 = vpop.f32.mrb[2].mxu1 }
 0x128   : > { %v697_v9 = vadd.f32 %v696_v8, %v653_v7  ;;  %v698_v11 = vpop.f32.mrb[2].mxu0  ;;  %v657_v13 = vpop.f32.mrb[3].mxu1 }
 0x129   : > { %1026 = vtanh.f32 %v695_v6  ;;  %v699_v12 = vadd.f32 %v698_v11, %v655_v10  ;;  %v700_v14 = vpop.f32.mrb[3].mxu0 }
 0x12a   : > { %1028 = vtanh.f32 %v697_v9  ;;  %v701_v15 = vadd.f32 %v700_v14, %v657_v13 }
 0x12b   : > { %1030 = vtanh.f32 %v699_v12 }
 0x12c   : > { %1032 = vtanh.f32 %v701_v15 }
 0x133   : > { %v1027_v16 = vpop.eup %1026 }
 0x134   : > { %v1029_v17 = vpop.eup %1028  ;;  %722 = vst [vmem:[%s196_s28] sm:$0xff] %v1027_v16 }
 0x135   : > { %v1031_v18 = vpop.eup %1030  ;;  %723 = vst [vmem:[%s196_s28 + $0x8] sm:$0xff] %v1029_v17 }
 0x136   : > { %v1033_v19 = vpop.eup %1032  ;;  %724 = vst [vmem:[%s196_s28 + $0x10] sm:$0xff] %v1031_v18 }
 0x137   : > { %725 = vst [vmem:[%s196_s28 + $0x18] sm:$0xff] %v1033_v19 }
 0x138 PF: > { %s12_s11 = sadd.s32 1, %s1056_s11   ;;  %s1191_s9 = smov %s1052_s10 }
 0x139   : > { %p9_p5 = scmp.ge.s32.totalorder %s12_s11, 4   ;;  %s1192_s10 = smov %s1194_s12 }
 0x13b   :  { %11 = sbr.rel (!%p9_p5) target bundleno = 2 (0x2), region = 69 }

</bundles_post_ra>
